<compile_context>
chip_gen: v5e
topology: v5e:2x2
jax: 0.10.0
libtpu: 0.0.40
codegen_flags: <defaults>
</compile_context>

<pallas_src>
import jax
import jax.numpy as jnp
from jax.experimental import pallas as pl
from jax.experimental.pallas import tpu as pltpu


# ---------------------------------------------------------------------------
# settings (synthetic, deterministic)
# ---------------------------------------------------------------------------
class _Settings:
    res_block_num = 4
    connection_style = "symmetric_connection"


settings = _Settings()


# ---------------------------------------------------------------------------
# Single fused kernel: all units + symmetric-connection 1x1 convs
# ---------------------------------------------------------------------------
def _make_blocks_kernel(C, H, W, num):
    HW = H * W
    half = num // 2

    def kernel(x_ref, wconv_ref, bconv_ref, wcat_ref, bcat_ref, o_ref):
        # Flat (h, w) coordinates of every lane position (computed once).
        pos = jax.lax.broadcasted_iota(jnp.int32, (C, HW), 1)
        if W & (W - 1) == 0:
            wq = jnp.bitwise_and(pos, W - 1)
            hq = jax.lax.shift_right_logical(pos, W.bit_length() - 1)
        else:
            # TODO(synk): non-power-of-two W falls back to vector div/rem.
            wq = pos % W
            hq = pos // W

        def tap_specs(d):
            """(lane rotation, border mask) for the 9 taps of a 3x3 dilated conv."""
            specs = []
            for kh in range(3):
                for kw in range(3):
                    dh = (kh - 1) * d
                    dw = (kw - 1) * d
                    shift = (-(dh * W + dw)) % HW
                    conds = []
                    if dh > 0:
                        conds.append(hq < H - dh)
                    elif dh < 0:
                        conds.append(hq >= -dh)
                    if dw > 0:
                        conds.append(wq < W - dw)
                    elif dw < 0:
                        conds.append(wq >= -dw)
                    mask = None
                    for c in conds:
                        mask = c if mask is None else jnp.logical_and(mask, c)
                    specs.append((shift, mask))
            return specs

        def conv3x3(a, w_idx, specs):
            # a: (C, HW) f32.  Shifted taps are built in-register with a lane
            # roll + zero border mask (no im2col buffer, no relayout); the 9
            # (C, C) x (C, HW) dots accumulate into one f32 accumulator.
            acc = None
            for t, (shift, mask) in enumerate(specs):
                src = a if shift == 0 else pltpu.roll(a, shift, axis=1)
                if mask is not None:
                    src = jnp.where(mask, src, 0.0)
                contrib = jnp.dot(wconv_ref[w_idx, t], src,
                                  preferred_element_type=jnp.float32)
                acc = contrib if acc is None else acc + contrib
            return acc

        a = x_ref[0].astype(jnp.float32)          # (C, HW), lane-dense
        outs = [a]                                # skip candidates x0, x1, ...
        cur = a
        for j in range(num):
            d = 2 ** j
            specs = tap_specs(d)                  # shared by both convs of unit j
            # residual unit: y = relu(conv3x3_d(relu(conv3x3_d(x) + b1)) + b2 + x)
            h1 = jnp.maximum(conv3x3(cur, 2 * j, specs) + bconv_ref[2 * j], 0.0)
            y = jnp.maximum(conv3x3(h1, 2 * j + 1, specs)
                            + bconv_ref[2 * j + 1] + cur, 0.0)
            outs.append(y)
            if j >= half:
                # symmetric connection: 1x1 conv over concat([y, skip], ch),
                # fused as ONE (C, 2C) x (2C, HW) dot on a sublane stack.
                skip = outs[2 * half - j - 1]     # == original out[-2*(j-half+1)-1]
                stacked = jnp.concatenate([y, skip], axis=0)   # (2C, HW)
                cur = (jnp.dot(wcat_ref[j - half], stacked,
                               preferred_element_type=jnp.float32)
                       + bcat_ref[j - half])      # no ReLU after cat (as reference)
            else:
                cur = y

        o_ref[0] = cur.astype(o_ref.dtype)

    return kernel


def my_blocks_forward(x_nchw, conv_w, conv_b, cat_w, cat_b, num):
    N, C, H, W = x_nchw.shape
    HW = H * W
    half = num // 2
    x_flat = x_nchw.reshape(N, C, HW)   # trailing dims contiguous -> free reshape

    out = pl.pallas_call(
        _make_blocks_kernel(C, H, W, num),
        out_shape=jax.ShapeDtypeStruct((N, C, HW), x_nchw.dtype),
        grid=(N,),
        in_specs=[
            pl.BlockSpec((1, C, HW), lambda n: (n, 0, 0)),
            pl.BlockSpec((2 * num, 9, C, C), lambda n: (0, 0, 0, 0)),
            pl.BlockSpec((2 * num, C, 1), lambda n: (0, 0, 0)),
            pl.BlockSpec((half, C, 2 * C), lambda n: (0, 0, 0)),
            pl.BlockSpec((half, C, 1), lambda n: (0, 0, 0)),
        ],
        out_specs=pl.BlockSpec((1, C, HW), lambda n: (n, 0, 0)),
        compiler_params=pltpu.CompilerParams(
            dimension_semantics=("parallel",)),
    )(x_flat, conv_w, conv_b, cat_w, cat_b)
    return out.reshape(N, C, H, W)


# ---------------------------------------------------------------------------
# My_blocks (symmetric_connection)
# ---------------------------------------------------------------------------
class MyBlocks:
    """NCHW in / NCHW out to match the PyTorch module; kernel runs lane-dense."""

    def __init__(self, in_channel, key):
        C = in_channel
        self.in_channel = C
        self.out_channel = C
        self.num = settings.res_block_num
        assert self.num % 2 == 0  # symmetric_connection pairing
        half = self.num // 2

        k_conv, k_cat = jax.random.split(key)
        # Each conv: 9 tap matrices of shape (Cout, Cin); 2 convs per unit.
        self.conv_w = (jax.random.normal(
            k_conv, (2 * self.num, 9, C, C), jnp.float32) / jnp.sqrt(9.0 * C))
        self.conv_b = jnp.zeros((2 * self.num, C, 1), jnp.float32)
        # symmetric-connection 1x1 convs over concat([y, skip]) -> (C, 2C).
        self.cat_w = (jax.random.normal(k_cat, (half, C, 2 * C), jnp.float32)
                      / jnp.sqrt(2.0 * C))
        self.cat_b = jnp.zeros((half, C, 1), jnp.float32)

    def __call__(self, x_nchw):
        return my_blocks_forward(x_nchw, self.conv_w, self.conv_b,
                                 self.cat_w, self.cat_b, self.num)


# ---------------------------------------------------------------------------
if __name__ == "__main__":
    key = jax.random.PRNGKey(0)
    k_param, k_x = jax.random.split(key)

    N, C, H, W = 2, 4, 16, 16
    x = jax.random.normal(k_x, (N, C, H, W), jnp.float32)

    model = MyBlocks(in_channel=C, key=k_param)
    fwd = jax.jit(model.__call__)
    y = jax.block_until_ready(fwd(x))

    assert y.shape == (N, C, H, W), y.shape
    assert bool(jnp.all(jnp.isfinite(y)))
    print("KERNEL_OK")
</pallas_src>

<mosaic_0001>
module attributes {stable_mosaic.version = 11 : i64} {
  func.func @kernel(%arg0: i32, %arg1: memref<1x4x256xf32, #tpu.memory_space<vmem>>, %arg2: memref<8x9x4x4xf32, #tpu.memory_space<vmem>>, %arg3: memref<8x4x1xf32, #tpu.memory_space<vmem>>, %arg4: memref<2x4x8xf32, #tpu.memory_space<vmem>>, %arg5: memref<2x4x1xf32, #tpu.memory_space<vmem>>, %arg6: memref<1x4x256xf32, #tpu.memory_space<vmem>>) attributes {dimension_semantics = [#tpu.dimension_semantics<parallel>], iteration_bounds = array<i64: 2>, scalar_prefetch = 0 : i64, scratch_operands = 0 : i64, tpu.core_type = #tpu.core_type<tc>, window_params = [{transform_indices = @transform_0, window_bounds = array<i64: 1, 4, 256>}, {pipeline_mode = #tpu.pipeline_mode<synchronous>, transform_indices = @transform_1, window_bounds = array<i64: 8, 9, 4, 4>}, {pipeline_mode = #tpu.pipeline_mode<synchronous>, transform_indices = @transform_2, window_bounds = array<i64: 8, 4, 1>}, {pipeline_mode = #tpu.pipeline_mode<synchronous>, transform_indices = @transform_3, window_bounds = array<i64: 2, 4, 8>}, {pipeline_mode = #tpu.pipeline_mode<synchronous>, transform_indices = @transform_4, window_bounds = array<i64: 2, 4, 1>}, {transform_indices = @transform_5, window_bounds = array<i64: 1, 4, 256>}]} {
    %0 = tpu.iota {dimensions = array<i32: 1>} : vector<4x256xi32>
    %c15_i32 = arith.constant 15 : i32
    %1 = vector.broadcast %c15_i32 : i32 to vector<4x256xi32>
    %2 = arith.andi %0, %1 : vector<4x256xi32>
    %c4_i32 = arith.constant 4 : i32
    %3 = vector.broadcast %c4_i32 : i32 to vector<4x256xi32>
    %4 = arith.shrui %0, %3 : vector<4x256xi32>
    %c0 = arith.constant 0 : index
    %c0_0 = arith.constant 0 : index
    %c0_1 = arith.constant 0 : index
    %5 = vector.load %arg1[%c0, %c0_0, %c0_1] : memref<1x4x256xf32, #tpu.memory_space<vmem>>, vector<1x4x256xf32>
    %6 = vector.shape_cast %5 : vector<1x4x256xf32> to vector<4x256xf32>
    %c1_i32 = arith.constant 1 : i32
    %7 = vector.broadcast %c1_i32 : i32 to vector<4x256xi32>
    %8 = arith.cmpi sge, %4, %7 : vector<4x256xi32>
    %c1_i32_2 = arith.constant 1 : i32
    %9 = vector.broadcast %c1_i32_2 : i32 to vector<4x256xi32>
    %10 = arith.cmpi sge, %2, %9 : vector<4x256xi32>
    %11 = arith.andi %8, %10 : vector<4x256xi1>
    %c1_i32_3 = arith.constant 1 : i32
    %12 = vector.broadcast %c1_i32_3 : i32 to vector<4x256xi32>
    %13 = arith.cmpi sge, %4, %12 : vector<4x256xi32>
    %c1_i32_4 = arith.constant 1 : i32
    %14 = vector.broadcast %c1_i32_4 : i32 to vector<4x256xi32>
    %15 = arith.cmpi sge, %4, %14 : vector<4x256xi32>
    %c15_i32_5 = arith.constant 15 : i32
    %16 = vector.broadcast %c15_i32_5 : i32 to vector<4x256xi32>
    %17 = arith.cmpi slt, %2, %16 : vector<4x256xi32>
    %18 = arith.andi %15, %17 : vector<4x256xi1>
    %c1_i32_6 = arith.constant 1 : i32
    %19 = vector.broadcast %c1_i32_6 : i32 to vector<4x256xi32>
    %20 = arith.cmpi sge, %2, %19 : vector<4x256xi32>
    %c15_i32_7 = arith.constant 15 : i32
    %21 = vector.broadcast %c15_i32_7 : i32 to vector<4x256xi32>
    %22 = arith.cmpi slt, %2, %21 : vector<4x256xi32>
    %c15_i32_8 = arith.constant 15 : i32
    %23 = vector.broadcast %c15_i32_8 : i32 to vector<4x256xi32>
    %24 = arith.cmpi slt, %4, %23 : vector<4x256xi32>
    %c1_i32_9 = arith.constant 1 : i32
    %25 = vector.broadcast %c1_i32_9 : i32 to vector<4x256xi32>
    %26 = arith.cmpi sge, %2, %25 : vector<4x256xi32>
    %27 = arith.andi %24, %26 : vector<4x256xi1>
    %c15_i32_10 = arith.constant 15 : i32
    %28 = vector.broadcast %c15_i32_10 : i32 to vector<4x256xi32>
    %29 = arith.cmpi slt, %4, %28 : vector<4x256xi32>
    %c15_i32_11 = arith.constant 15 : i32
    %30 = vector.broadcast %c15_i32_11 : i32 to vector<4x256xi32>
    %31 = arith.cmpi slt, %4, %30 : vector<4x256xi32>
    %c15_i32_12 = arith.constant 15 : i32
    %32 = vector.broadcast %c15_i32_12 : i32 to vector<4x256xi32>
    %33 = arith.cmpi slt, %2, %32 : vector<4x256xi32>
    %34 = arith.andi %31, %33 : vector<4x256xi1>
    %c17_i32 = arith.constant 17 : i32
    %35 = tpu.dynamic_rotate %6 by %c17_i32 dim 1 : vector<4x256xf32>, i32 -> vector<4x256xf32>
    %cst = arith.constant 0.000000e+00 : f32
    %36 = vector.broadcast %cst : f32 to vector<4x256xf32>
    %37 = arith.select %11, %35, %36 : vector<4x256xi1>, vector<4x256xf32>
    %c0_13 = arith.constant 0 : index
    %c0_14 = arith.constant 0 : index
    %c0_15 = arith.constant 0 : index
    %c0_16 = arith.constant 0 : index
    %38 = vector.load %arg2[%c0_13, %c0_14, %c0_15, %c0_16] : memref<8x9x4x4xf32, #tpu.memory_space<vmem>>, vector<1x1x4x4xf32>
    %39 = vector.shape_cast %38 : vector<1x1x4x4xf32> to vector<4x4xf32>
    %cst_17 = arith.constant dense<0.000000e+00> : vector<4x256xf32>
    %40 = tpu.matmul %39, %37, %cst_17 {dimension_numbers = #tpu.dot_dimension_numbers<[1], [0], [0], [1], [0, 0, 1, 1], [], []>} : vector<4x4xf32>, vector<4x256xf32>, vector<4x256xf32> -> vector<4x256xf32>
    %c16_i32 = arith.constant 16 : i32
    %41 = tpu.dynamic_rotate %6 by %c16_i32 dim 1 : vector<4x256xf32>, i32 -> vector<4x256xf32>
    %cst_18 = arith.constant 0.000000e+00 : f32
    %42 = vector.broadcast %cst_18 : f32 to vector<4x256xf32>
    %43 = arith.select %13, %41, %42 : vector<4x256xi1>, vector<4x256xf32>
    %c0_19 = arith.constant 0 : index
    %c1 = arith.constant 1 : index
    %c0_20 = arith.constant 0 : index
    %c0_21 = arith.constant 0 : index
    %44 = vector.load %arg2[%c0_19, %c1, %c0_20, %c0_21] : memref<8x9x4x4xf32, #tpu.memory_space<vmem>>, vector<1x1x4x4xf32>
    %45 = vector.shape_cast %44 : vector<1x1x4x4xf32> to vector<4x4xf32>
    %cst_22 = arith.constant dense<0.000000e+00> : vector<4x256xf32>
    %46 = tpu.matmul %45, %43, %cst_22 {dimension_numbers = #tpu.dot_dimension_numbers<[1], [0], [0], [1], [0, 0, 1, 1], [], []>} : vector<4x4xf32>, vector<4x256xf32>, vector<4x256xf32> -> vector<4x256xf32>
    %47 = arith.addf %40, %46 : vector<4x256xf32>
    %c15_i32_23 = arith.constant 15 : i32
    %48 = tpu.dynamic_rotate %6 by %c15_i32_23 dim 1 : vector<4x256xf32>, i32 -> vector<4x256xf32>
    %cst_24 = arith.constant 0.000000e+00 : f32
    %49 = vector.broadcast %cst_24 : f32 to vector<4x256xf32>
    %50 = arith.select %18, %48, %49 : vector<4x256xi1>, vector<4x256xf32>
    %c0_25 = arith.constant 0 : index
    %c2 = arith.constant 2 : index
    %c0_26 = arith.constant 0 : index
    %c0_27 = arith.constant 0 : index
    %51 = vector.load %arg2[%c0_25, %c2, %c0_26, %c0_27] : memref<8x9x4x4xf32, #tpu.memory_space<vmem>>, vector<1x1x4x4xf32>
    %52 = vector.shape_cast %51 : vector<1x1x4x4xf32> to vector<4x4xf32>
    %cst_28 = arith.constant dense<0.000000e+00> : vector<4x256xf32>
    %53 = tpu.matmul %52, %50, %cst_28 {dimension_numbers = #tpu.dot_dimension_numbers<[1], [0], [0], [1], [0, 0, 1, 1], [], []>} : vector<4x4xf32>, vector<4x256xf32>, vector<4x256xf32> -> vector<4x256xf32>
    %54 = arith.addf %47, %53 : vector<4x256xf32>
    %c1_i32_29 = arith.constant 1 : i32
    %55 = tpu.dynamic_rotate %6 by %c1_i32_29 dim 1 : vector<4x256xf32>, i32 -> vector<4x256xf32>
    %cst_30 = arith.constant 0.000000e+00 : f32
    %56 = vector.broadcast %cst_30 : f32 to vector<4x256xf32>
    %57 = arith.select %20, %55, %56 : vector<4x256xi1>, vector<4x256xf32>
    %c0_31 = arith.constant 0 : index
    %c3 = arith.constant 3 : index
    %c0_32 = arith.constant 0 : index
    %c0_33 = arith.constant 0 : index
    %58 = vector.load %arg2[%c0_31, %c3, %c0_32, %c0_33] : memref<8x9x4x4xf32, #tpu.memory_space<vmem>>, vector<1x1x4x4xf32>
    %59 = vector.shape_cast %58 : vector<1x1x4x4xf32> to vector<4x4xf32>
    %cst_34 = arith.constant dense<0.000000e+00> : vector<4x256xf32>
    %60 = tpu.matmul %59, %57, %cst_34 {dimension_numbers = #tpu.dot_dimension_numbers<[1], [0], [0], [1], [0, 0, 1, 1], [], []>} : vector<4x4xf32>, vector<4x256xf32>, vector<4x256xf32> -> vector<4x256xf32>
    %61 = arith.addf %54, %60 : vector<4x256xf32>
    %c0_35 = arith.constant 0 : index
    %c4 = arith.constant 4 : index
    %c0_36 = arith.constant 0 : index
    %c0_37 = arith.constant 0 : index
    %62 = vector.load %arg2[%c0_35, %c4, %c0_36, %c0_37] : memref<8x9x4x4xf32, #tpu.memory_space<vmem>>, vector<1x1x4x4xf32>
    %63 = vector.shape_cast %62 : vector<1x1x4x4xf32> to vector<4x4xf32>
    %cst_38 = arith.constant dense<0.000000e+00> : vector<4x256xf32>
    %64 = tpu.matmul %63, %6, %cst_38 {dimension_numbers = #tpu.dot_dimension_numbers<[1], [0], [0], [1], [0, 0, 1, 1], [], []>} : vector<4x4xf32>, vector<4x256xf32>, vector<4x256xf32> -> vector<4x256xf32>
    %65 = arith.addf %61, %64 : vector<4x256xf32>
    %c255_i32 = arith.constant 255 : i32
    %66 = tpu.dynamic_rotate %6 by %c255_i32 dim 1 : vector<4x256xf32>, i32 -> vector<4x256xf32>
    %cst_39 = arith.constant 0.000000e+00 : f32
    %67 = vector.broadcast %cst_39 : f32 to vector<4x256xf32>
    %68 = arith.select %22, %66, %67 : vector<4x256xi1>, vector<4x256xf32>
    %c0_40 = arith.constant 0 : index
    %c5 = arith.constant 5 : index
    %c0_41 = arith.constant 0 : index
    %c0_42 = arith.constant 0 : index
    %69 = vector.load %arg2[%c0_40, %c5, %c0_41, %c0_42] : memref<8x9x4x4xf32, #tpu.memory_space<vmem>>, vector<1x1x4x4xf32>
    %70 = vector.shape_cast %69 : vector<1x1x4x4xf32> to vector<4x4xf32>
    %cst_43 = arith.constant dense<0.000000e+00> : vector<4x256xf32>
    %71 = tpu.matmul %70, %68, %cst_43 {dimension_numbers = #tpu.dot_dimension_numbers<[1], [0], [0], [1], [0, 0, 1, 1], [], []>} : vector<4x4xf32>, vector<4x256xf32>, vector<4x256xf32> -> vector<4x256xf32>
    %72 = arith.addf %65, %71 : vector<4x256xf32>
    %c241_i32 = arith.constant 241 : i32
    %73 = tpu.dynamic_rotate %6 by %c241_i32 dim 1 : vector<4x256xf32>, i32 -> vector<4x256xf32>
    %cst_44 = arith.constant 0.000000e+00 : f32
    %74 = vector.broadcast %cst_44 : f32 to vector<4x256xf32>
    %75 = arith.select %27, %73, %74 : vector<4x256xi1>, vector<4x256xf32>
    %c0_45 = arith.constant 0 : index
    %c6 = arith.constant 6 : index
    %c0_46 = arith.constant 0 : index
    %c0_47 = arith.constant 0 : index
    %76 = vector.load %arg2[%c0_45, %c6, %c0_46, %c0_47] : memref<8x9x4x4xf32, #tpu.memory_space<vmem>>, vector<1x1x4x4xf32>
    %77 = vector.shape_cast %76 : vector<1x1x4x4xf32> to vector<4x4xf32>
    %cst_48 = arith.constant dense<0.000000e+00> : vector<4x256xf32>
    %78 = tpu.matmul %77, %75, %cst_48 {dimension_numbers = #tpu.dot_dimension_numbers<[1], [0], [0], [1], [0, 0, 1, 1], [], []>} : vector<4x4xf32>, vector<4x256xf32>, vector<4x256xf32> -> vector<4x256xf32>
    %79 = arith.addf %72, %78 : vector<4x256xf32>
    %c240_i32 = arith.constant 240 : i32
    %80 = tpu.dynamic_rotate %6 by %c240_i32 dim 1 : vector<4x256xf32>, i32 -> vector<4x256xf32>
    %cst_49 = arith.constant 0.000000e+00 : f32
    %81 = vector.broadcast %cst_49 : f32 to vector<4x256xf32>
    %82 = arith.select %29, %80, %81 : vector<4x256xi1>, vector<4x256xf32>
    %c0_50 = arith.constant 0 : index
    %c7 = arith.constant 7 : index
    %c0_51 = arith.constant 0 : index
    %c0_52 = arith.constant 0 : index
    %83 = vector.load %arg2[%c0_50, %c7, %c0_51, %c0_52] : memref<8x9x4x4xf32, #tpu.memory_space<vmem>>, vector<1x1x4x4xf32>
    %84 = vector.shape_cast %83 : vector<1x1x4x4xf32> to vector<4x4xf32>
    %cst_53 = arith.constant dense<0.000000e+00> : vector<4x256xf32>
    %85 = tpu.matmul %84, %82, %cst_53 {dimension_numbers = #tpu.dot_dimension_numbers<[1], [0], [0], [1], [0, 0, 1, 1], [], []>} : vector<4x4xf32>, vector<4x256xf32>, vector<4x256xf32> -> vector<4x256xf32>
    %86 = arith.addf %79, %85 : vector<4x256xf32>
    %c239_i32 = arith.constant 239 : i32
    %87 = tpu.dynamic_rotate %6 by %c239_i32 dim 1 : vector<4x256xf32>, i32 -> vector<4x256xf32>
    %cst_54 = arith.constant 0.000000e+00 : f32
    %88 = vector.broadcast %cst_54 : f32 to vector<4x256xf32>
    %89 = arith.select %34, %87, %88 : vector<4x256xi1>, vector<4x256xf32>
    %c0_55 = arith.constant 0 : index
    %c8 = arith.constant 8 : index
    %c0_56 = arith.constant 0 : index
    %c0_57 = arith.constant 0 : index
    %90 = vector.load %arg2[%c0_55, %c8, %c0_56, %c0_57] : memref<8x9x4x4xf32, #tpu.memory_space<vmem>>, vector<1x1x4x4xf32>
    %91 = vector.shape_cast %90 : vector<1x1x4x4xf32> to vector<4x4xf32>
    %cst_58 = arith.constant dense<0.000000e+00> : vector<4x256xf32>
    %92 = tpu.matmul %91, %89, %cst_58 {dimension_numbers = #tpu.dot_dimension_numbers<[1], [0], [0], [1], [0, 0, 1, 1], [], []>} : vector<4x4xf32>, vector<4x256xf32>, vector<4x256xf32> -> vector<4x256xf32>
    %93 = arith.addf %86, %92 : vector<4x256xf32>
    %c0_59 = arith.constant 0 : index
    %c0_60 = arith.constant 0 : index
    %c0_61 = arith.constant 0 : index
    %94 = vector.load %arg3[%c0_59, %c0_60, %c0_61] : memref<8x4x1xf32, #tpu.memory_space<vmem>>, vector<1x4x1xf32>
    %95 = vector.shape_cast %94 : vector<1x4x1xf32> to vector<4x1xf32>
    %96 = vector.broadcast %95 : vector<4x1xf32> to vector<4x256xf32>
    %97 = arith.addf %93, %96 : vector<4x256xf32>
    %cst_62 = arith.constant 0.000000e+00 : f32
    %98 = vector.broadcast %cst_62 : f32 to vector<4x256xf32>
    %99 = arith.maximumf %97, %98 : vector<4x256xf32>
    %c17_i32_63 = arith.constant 17 : i32
    %100 = tpu.dynamic_rotate %99 by %c17_i32_63 dim 1 : vector<4x256xf32>, i32 -> vector<4x256xf32>
    %cst_64 = arith.constant 0.000000e+00 : f32
    %101 = vector.broadcast %cst_64 : f32 to vector<4x256xf32>
    %102 = arith.select %11, %100, %101 : vector<4x256xi1>, vector<4x256xf32>
    %c1_65 = arith.constant 1 : index
    %c0_66 = arith.constant 0 : index
    %c0_67 = arith.constant 0 : index
    %c0_68 = arith.constant 0 : index
    %103 = vector.load %arg2[%c1_65, %c0_66, %c0_67, %c0_68] : memref<8x9x4x4xf32, #tpu.memory_space<vmem>>, vector<1x1x4x4xf32>
    %104 = vector.shape_cast %103 : vector<1x1x4x4xf32> to vector<4x4xf32>
    %cst_69 = arith.constant dense<0.000000e+00> : vector<4x256xf32>
    %105 = tpu.matmul %104, %102, %cst_69 {dimension_numbers = #tpu.dot_dimension_numbers<[1], [0], [0], [1], [0, 0, 1, 1], [], []>} : vector<4x4xf32>, vector<4x256xf32>, vector<4x256xf32> -> vector<4x256xf32>
    %c16_i32_70 = arith.constant 16 : i32
    %106 = tpu.dynamic_rotate %99 by %c16_i32_70 dim 1 : vector<4x256xf32>, i32 -> vector<4x256xf32>
    %cst_71 = arith.constant 0.000000e+00 : f32
    %107 = vector.broadcast %cst_71 : f32 to vector<4x256xf32>
    %108 = arith.select %13, %106, %107 : vector<4x256xi1>, vector<4x256xf32>
    %c1_72 = arith.constant 1 : index
    %c1_73 = arith.constant 1 : index
    %c0_74 = arith.constant 0 : index
    %c0_75 = arith.constant 0 : index
    %109 = vector.load %arg2[%c1_72, %c1_73, %c0_74, %c0_75] : memref<8x9x4x4xf32, #tpu.memory_space<vmem>>, vector<1x1x4x4xf32>
    %110 = vector.shape_cast %109 : vector<1x1x4x4xf32> to vector<4x4xf32>
    %cst_76 = arith.constant dense<0.000000e+00> : vector<4x256xf32>
    %111 = tpu.matmul %110, %108, %cst_76 {dimension_numbers = #tpu.dot_dimension_numbers<[1], [0], [0], [1], [0, 0, 1, 1], [], []>} : vector<4x4xf32>, vector<4x256xf32>, vector<4x256xf32> -> vector<4x256xf32>
    %112 = arith.addf %105, %111 : vector<4x256xf32>
    %c15_i32_77 = arith.constant 15 : i32
    %113 = tpu.dynamic_rotate %99 by %c15_i32_77 dim 1 : vector<4x256xf32>, i32 -> vector<4x256xf32>
    %cst_78 = arith.constant 0.000000e+00 : f32
    %114 = vector.broadcast %cst_78 : f32 to vector<4x256xf32>
    %115 = arith.select %18, %113, %114 : vector<4x256xi1>, vector<4x256xf32>
    %c1_79 = arith.constant 1 : index
    %c2_80 = arith.constant 2 : index
    %c0_81 = arith.constant 0 : index
    %c0_82 = arith.constant 0 : index
    %116 = vector.load %arg2[%c1_79, %c2_80, %c0_81, %c0_82] : memref<8x9x4x4xf32, #tpu.memory_space<vmem>>, vector<1x1x4x4xf32>
    %117 = vector.shape_cast %116 : vector<1x1x4x4xf32> to vector<4x4xf32>
    %cst_83 = arith.constant dense<0.000000e+00> : vector<4x256xf32>
    %118 = tpu.matmul %117, %115, %cst_83 {dimension_numbers = #tpu.dot_dimension_numbers<[1], [0], [0], [1], [0, 0, 1, 1], [], []>} : vector<4x4xf32>, vector<4x256xf32>, vector<4x256xf32> -> vector<4x256xf32>
    %119 = arith.addf %112, %118 : vector<4x256xf32>
    %c1_i32_84 = arith.constant 1 : i32
    %120 = tpu.dynamic_rotate %99 by %c1_i32_84 dim 1 : vector<4x256xf32>, i32 -> vector<4x256xf32>
    %cst_85 = arith.constant 0.000000e+00 : f32
    %121 = vector.broadcast %cst_85 : f32 to vector<4x256xf32>
    %122 = arith.select %20, %120, %121 : vector<4x256xi1>, vector<4x256xf32>
    %c1_86 = arith.constant 1 : index
    %c3_87 = arith.constant 3 : index
    %c0_88 = arith.constant 0 : index
    %c0_89 = arith.constant 0 : index
    %123 = vector.load %arg2[%c1_86, %c3_87, %c0_88, %c0_89] : memref<8x9x4x4xf32, #tpu.memory_space<vmem>>, vector<1x1x4x4xf32>
    %124 = vector.shape_cast %123 : vector<1x1x4x4xf32> to vector<4x4xf32>
    %cst_90 = arith.constant dense<0.000000e+00> : vector<4x256xf32>
    %125 = tpu.matmul %124, %122, %cst_90 {dimension_numbers = #tpu.dot_dimension_numbers<[1], [0], [0], [1], [0, 0, 1, 1], [], []>} : vector<4x4xf32>, vector<4x256xf32>, vector<4x256xf32> -> vector<4x256xf32>
    %126 = arith.addf %119, %125 : vector<4x256xf32>
    %c1_91 = arith.constant 1 : index
    %c4_92 = arith.constant 4 : index
    %c0_93 = arith.constant 0 : index
    %c0_94 = arith.constant 0 : index
    %127 = vector.load %arg2[%c1_91, %c4_92, %c0_93, %c0_94] : memref<8x9x4x4xf32, #tpu.memory_space<vmem>>, vector<1x1x4x4xf32>
    %128 = vector.shape_cast %127 : vector<1x1x4x4xf32> to vector<4x4xf32>
    %cst_95 = arith.constant dense<0.000000e+00> : vector<4x256xf32>
    %129 = tpu.matmul %128, %99, %cst_95 {dimension_numbers = #tpu.dot_dimension_numbers<[1], [0], [0], [1], [0, 0, 1, 1], [], []>} : vector<4x4xf32>, vector<4x256xf32>, vector<4x256xf32> -> vector<4x256xf32>
    %130 = arith.addf %126, %129 : vector<4x256xf32>
    %c255_i32_96 = arith.constant 255 : i32
    %131 = tpu.dynamic_rotate %99 by %c255_i32_96 dim 1 : vector<4x256xf32>, i32 -> vector<4x256xf32>
    %cst_97 = arith.constant 0.000000e+00 : f32
    %132 = vector.broadcast %cst_97 : f32 to vector<4x256xf32>
    %133 = arith.select %22, %131, %132 : vector<4x256xi1>, vector<4x256xf32>
    %c1_98 = arith.constant 1 : index
    %c5_99 = arith.constant 5 : index
    %c0_100 = arith.constant 0 : index
    %c0_101 = arith.constant 0 : index
    %134 = vector.load %arg2[%c1_98, %c5_99, %c0_100, %c0_101] : memref<8x9x4x4xf32, #tpu.memory_space<vmem>>, vector<1x1x4x4xf32>
    %135 = vector.shape_cast %134 : vector<1x1x4x4xf32> to vector<4x4xf32>
    %cst_102 = arith.constant dense<0.000000e+00> : vector<4x256xf32>
    %136 = tpu.matmul %135, %133, %cst_102 {dimension_numbers = #tpu.dot_dimension_numbers<[1], [0], [0], [1], [0, 0, 1, 1], [], []>} : vector<4x4xf32>, vector<4x256xf32>, vector<4x256xf32> -> vector<4x256xf32>
    %137 = arith.addf %130, %136 : vector<4x256xf32>
    %c241_i32_103 = arith.constant 241 : i32
    %138 = tpu.dynamic_rotate %99 by %c241_i32_103 dim 1 : vector<4x256xf32>, i32 -> vector<4x256xf32>
    %cst_104 = arith.constant 0.000000e+00 : f32
    %139 = vector.broadcast %cst_104 : f32 to vector<4x256xf32>
    %140 = arith.select %27, %138, %139 : vector<4x256xi1>, vector<4x256xf32>
    %c1_105 = arith.constant 1 : index
    %c6_106 = arith.constant 6 : index
    %c0_107 = arith.constant 0 : index
    %c0_108 = arith.constant 0 : index
    %141 = vector.load %arg2[%c1_105, %c6_106, %c0_107, %c0_108] : memref<8x9x4x4xf32, #tpu.memory_space<vmem>>, vector<1x1x4x4xf32>
    %142 = vector.shape_cast %141 : vector<1x1x4x4xf32> to vector<4x4xf32>
    %cst_109 = arith.constant dense<0.000000e+00> : vector<4x256xf32>
    %143 = tpu.matmul %142, %140, %cst_109 {dimension_numbers = #tpu.dot_dimension_numbers<[1], [0], [0], [1], [0, 0, 1, 1], [], []>} : vector<4x4xf32>, vector<4x256xf32>, vector<4x256xf32> -> vector<4x256xf32>
    %144 = arith.addf %137, %143 : vector<4x256xf32>
    %c240_i32_110 = arith.constant 240 : i32
    %145 = tpu.dynamic_rotate %99 by %c240_i32_110 dim 1 : vector<4x256xf32>, i32 -> vector<4x256xf32>
    %cst_111 = arith.constant 0.000000e+00 : f32
    %146 = vector.broadcast %cst_111 : f32 to vector<4x256xf32>
    %147 = arith.select %29, %145, %146 : vector<4x256xi1>, vector<4x256xf32>
    %c1_112 = arith.constant 1 : index
    %c7_113 = arith.constant 7 : index
    %c0_114 = arith.constant 0 : index
    %c0_115 = arith.constant 0 : index
    %148 = vector.load %arg2[%c1_112, %c7_113, %c0_114, %c0_115] : memref<8x9x4x4xf32, #tpu.memory_space<vmem>>, vector<1x1x4x4xf32>
    %149 = vector.shape_cast %148 : vector<1x1x4x4xf32> to vector<4x4xf32>
    %cst_116 = arith.constant dense<0.000000e+00> : vector<4x256xf32>
    %150 = tpu.matmul %149, %147, %cst_116 {dimension_numbers = #tpu.dot_dimension_numbers<[1], [0], [0], [1], [0, 0, 1, 1], [], []>} : vector<4x4xf32>, vector<4x256xf32>, vector<4x256xf32> -> vector<4x256xf32>
    %151 = arith.addf %144, %150 : vector<4x256xf32>
    %c239_i32_117 = arith.constant 239 : i32
    %152 = tpu.dynamic_rotate %99 by %c239_i32_117 dim 1 : vector<4x256xf32>, i32 -> vector<4x256xf32>
    %cst_118 = arith.constant 0.000000e+00 : f32
    %153 = vector.broadcast %cst_118 : f32 to vector<4x256xf32>
    %154 = arith.select %34, %152, %153 : vector<4x256xi1>, vector<4x256xf32>
    %c1_119 = arith.constant 1 : index
    %c8_120 = arith.constant 8 : index
    %c0_121 = arith.constant 0 : index
    %c0_122 = arith.constant 0 : index
    %155 = vector.load %arg2[%c1_119, %c8_120, %c0_121, %c0_122] : memref<8x9x4x4xf32, #tpu.memory_space<vmem>>, vector<1x1x4x4xf32>
    %156 = vector.shape_cast %155 : vector<1x1x4x4xf32> to vector<4x4xf32>
    %cst_123 = arith.constant dense<0.000000e+00> : vector<4x256xf32>
    %157 = tpu.matmul %156, %154, %cst_123 {dimension_numbers = #tpu.dot_dimension_numbers<[1], [0], [0], [1], [0, 0, 1, 1], [], []>} : vector<4x4xf32>, vector<4x256xf32>, vector<4x256xf32> -> vector<4x256xf32>
    %158 = arith.addf %151, %157 : vector<4x256xf32>
    %c1_124 = arith.constant 1 : index
    %c0_125 = arith.constant 0 : index
    %c0_126 = arith.constant 0 : index
    %159 = vector.load %arg3[%c1_124, %c0_125, %c0_126] : memref<8x4x1xf32, #tpu.memory_space<vmem>>, vector<1x4x1xf32>
    %160 = vector.shape_cast %159 : vector<1x4x1xf32> to vector<4x1xf32>
    %161 = vector.broadcast %160 : vector<4x1xf32> to vector<4x256xf32>
    %162 = arith.addf %158, %161 : vector<4x256xf32>
    %163 = arith.addf %162, %6 : vector<4x256xf32>
    %cst_127 = arith.constant 0.000000e+00 : f32
    %164 = vector.broadcast %cst_127 : f32 to vector<4x256xf32>
    %165 = arith.maximumf %163, %164 : vector<4x256xf32>
    %c2_i32 = arith.constant 2 : i32
    %166 = vector.broadcast %c2_i32 : i32 to vector<4x256xi32>
    %167 = arith.cmpi sge, %4, %166 : vector<4x256xi32>
    %c2_i32_128 = arith.constant 2 : i32
    %168 = vector.broadcast %c2_i32_128 : i32 to vector<4x256xi32>
    %169 = arith.cmpi sge, %2, %168 : vector<4x256xi32>
    %170 = arith.andi %167, %169 : vector<4x256xi1>
    %c2_i32_129 = arith.constant 2 : i32
    %171 = vector.broadcast %c2_i32_129 : i32 to vector<4x256xi32>
    %172 = arith.cmpi sge, %4, %171 : vector<4x256xi32>
    %c2_i32_130 = arith.constant 2 : i32
    %173 = vector.broadcast %c2_i32_130 : i32 to vector<4x256xi32>
    %174 = arith.cmpi sge, %4, %173 : vector<4x256xi32>
    %c14_i32 = arith.constant 14 : i32
    %175 = vector.broadcast %c14_i32 : i32 to vector<4x256xi32>
    %176 = arith.cmpi slt, %2, %175 : vector<4x256xi32>
    %177 = arith.andi %174, %176 : vector<4x256xi1>
    %c2_i32_131 = arith.constant 2 : i32
    %178 = vector.broadcast %c2_i32_131 : i32 to vector<4x256xi32>
    %179 = arith.cmpi sge, %2, %178 : vector<4x256xi32>
    %c14_i32_132 = arith.constant 14 : i32
    %180 = vector.broadcast %c14_i32_132 : i32 to vector<4x256xi32>
    %181 = arith.cmpi slt, %2, %180 : vector<4x256xi32>
    %c14_i32_133 = arith.constant 14 : i32
    %182 = vector.broadcast %c14_i32_133 : i32 to vector<4x256xi32>
    %183 = arith.cmpi slt, %4, %182 : vector<4x256xi32>
    %c2_i32_134 = arith.constant 2 : i32
    %184 = vector.broadcast %c2_i32_134 : i32 to vector<4x256xi32>
    %185 = arith.cmpi sge, %2, %184 : vector<4x256xi32>
    %186 = arith.andi %183, %185 : vector<4x256xi1>
    %c14_i32_135 = arith.constant 14 : i32
    %187 = vector.broadcast %c14_i32_135 : i32 to vector<4x256xi32>
    %188 = arith.cmpi slt, %4, %187 : vector<4x256xi32>
    %c14_i32_136 = arith.constant 14 : i32
    %189 = vector.broadcast %c14_i32_136 : i32 to vector<4x256xi32>
    %190 = arith.cmpi slt, %4, %189 : vector<4x256xi32>
    %c14_i32_137 = arith.constant 14 : i32
    %191 = vector.broadcast %c14_i32_137 : i32 to vector<4x256xi32>
    %192 = arith.cmpi slt, %2, %191 : vector<4x256xi32>
    %193 = arith.andi %190, %192 : vector<4x256xi1>
    %c34_i32 = arith.constant 34 : i32
    %194 = tpu.dynamic_rotate %165 by %c34_i32 dim 1 : vector<4x256xf32>, i32 -> vector<4x256xf32>
    %cst_138 = arith.constant 0.000000e+00 : f32
    %195 = vector.broadcast %cst_138 : f32 to vector<4x256xf32>
    %196 = arith.select %170, %194, %195 : vector<4x256xi1>, vector<4x256xf32>
    %c2_139 = arith.constant 2 : index
    %c0_140 = arith.constant 0 : index
    %c0_141 = arith.constant 0 : index
    %c0_142 = arith.constant 0 : index
    %197 = vector.load %arg2[%c2_139, %c0_140, %c0_141, %c0_142] : memref<8x9x4x4xf32, #tpu.memory_space<vmem>>, vector<1x1x4x4xf32>
    %198 = vector.shape_cast %197 : vector<1x1x4x4xf32> to vector<4x4xf32>
    %cst_143 = arith.constant dense<0.000000e+00> : vector<4x256xf32>
    %199 = tpu.matmul %198, %196, %cst_143 {dimension_numbers = #tpu.dot_dimension_numbers<[1], [0], [0], [1], [0, 0, 1, 1], [], []>} : vector<4x4xf32>, vector<4x256xf32>, vector<4x256xf32> -> vector<4x256xf32>
    %c32_i32 = arith.constant 32 : i32
    %200 = tpu.dynamic_rotate %165 by %c32_i32 dim 1 : vector<4x256xf32>, i32 -> vector<4x256xf32>
    %cst_144 = arith.constant 0.000000e+00 : f32
    %201 = vector.broadcast %cst_144 : f32 to vector<4x256xf32>
    %202 = arith.select %172, %200, %201 : vector<4x256xi1>, vector<4x256xf32>
    %c2_145 = arith.constant 2 : index
    %c1_146 = arith.constant 1 : index
    %c0_147 = arith.constant 0 : index
    %c0_148 = arith.constant 0 : index
    %203 = vector.load %arg2[%c2_145, %c1_146, %c0_147, %c0_148] : memref<8x9x4x4xf32, #tpu.memory_space<vmem>>, vector<1x1x4x4xf32>
    %204 = vector.shape_cast %203 : vector<1x1x4x4xf32> to vector<4x4xf32>
    %cst_149 = arith.constant dense<0.000000e+00> : vector<4x256xf32>
    %205 = tpu.matmul %204, %202, %cst_149 {dimension_numbers = #tpu.dot_dimension_numbers<[1], [0], [0], [1], [0, 0, 1, 1], [], []>} : vector<4x4xf32>, vector<4x256xf32>, vector<4x256xf32> -> vector<4x256xf32>
    %206 = arith.addf %199, %205 : vector<4x256xf32>
    %c30_i32 = arith.constant 30 : i32
    %207 = tpu.dynamic_rotate %165 by %c30_i32 dim 1 : vector<4x256xf32>, i32 -> vector<4x256xf32>
    %cst_150 = arith.constant 0.000000e+00 : f32
    %208 = vector.broadcast %cst_150 : f32 to vector<4x256xf32>
    %209 = arith.select %177, %207, %208 : vector<4x256xi1>, vector<4x256xf32>
    %c2_151 = arith.constant 2 : index
    %c2_152 = arith.constant 2 : index
    %c0_153 = arith.constant 0 : index
    %c0_154 = arith.constant 0 : index
    %210 = vector.load %arg2[%c2_151, %c2_152, %c0_153, %c0_154] : memref<8x9x4x4xf32, #tpu.memory_space<vmem>>, vector<1x1x4x4xf32>
    %211 = vector.shape_cast %210 : vector<1x1x4x4xf32> to vector<4x4xf32>
    %cst_155 = arith.constant dense<0.000000e+00> : vector<4x256xf32>
    %212 = tpu.matmul %211, %209, %cst_155 {dimension_numbers = #tpu.dot_dimension_numbers<[1], [0], [0], [1], [0, 0, 1, 1], [], []>} : vector<4x4xf32>, vector<4x256xf32>, vector<4x256xf32> -> vector<4x256xf32>
    %213 = arith.addf %206, %212 : vector<4x256xf32>
    %c2_i32_156 = arith.constant 2 : i32
    %214 = tpu.dynamic_rotate %165 by %c2_i32_156 dim 1 : vector<4x256xf32>, i32 -> vector<4x256xf32>
    %cst_157 = arith.constant 0.000000e+00 : f32
    %215 = vector.broadcast %cst_157 : f32 to vector<4x256xf32>
    %216 = arith.select %179, %214, %215 : vector<4x256xi1>, vector<4x256xf32>
    %c2_158 = arith.constant 2 : index
    %c3_159 = arith.constant 3 : index
    %c0_160 = arith.constant 0 : index
    %c0_161 = arith.constant 0 : index
    %217 = vector.load %arg2[%c2_158, %c3_159, %c0_160, %c0_161] : memref<8x9x4x4xf32, #tpu.memory_space<vmem>>, vector<1x1x4x4xf32>
    %218 = vector.shape_cast %217 : vector<1x1x4x4xf32> to vector<4x4xf32>
    %cst_162 = arith.constant dense<0.000000e+00> : vector<4x256xf32>
    %219 = tpu.matmul %218, %216, %cst_162 {dimension_numbers = #tpu.dot_dimension_numbers<[1], [0], [0], [1], [0, 0, 1, 1], [], []>} : vector<4x4xf32>, vector<4x256xf32>, vector<4x256xf32> -> vector<4x256xf32>
    %220 = arith.addf %213, %219 : vector<4x256xf32>
    %c2_163 = arith.constant 2 : index
    %c4_164 = arith.constant 4 : index
    %c0_165 = arith.constant 0 : index
    %c0_166 = arith.constant 0 : index
    %221 = vector.load %arg2[%c2_163, %c4_164, %c0_165, %c0_166] : memref<8x9x4x4xf32, #tpu.memory_space<vmem>>, vector<1x1x4x4xf32>
    %222 = vector.shape_cast %221 : vector<1x1x4x4xf32> to vector<4x4xf32>
    %cst_167 = arith.constant dense<0.000000e+00> : vector<4x256xf32>
    %223 = tpu.matmul %222, %165, %cst_167 {dimension_numbers = #tpu.dot_dimension_numbers<[1], [0], [0], [1], [0, 0, 1, 1], [], []>} : vector<4x4xf32>, vector<4x256xf32>, vector<4x256xf32> -> vector<4x256xf32>
    %224 = arith.addf %220, %223 : vector<4x256xf32>
    %c254_i32 = arith.constant 254 : i32
    %225 = tpu.dynamic_rotate %165 by %c254_i32 dim 1 : vector<4x256xf32>, i32 -> vector<4x256xf32>
    %cst_168 = arith.constant 0.000000e+00 : f32
    %226 = vector.broadcast %cst_168 : f32 to vector<4x256xf32>
    %227 = arith.select %181, %225, %226 : vector<4x256xi1>, vector<4x256xf32>
    %c2_169 = arith.constant 2 : index
    %c5_170 = arith.constant 5 : index
    %c0_171 = arith.constant 0 : index
    %c0_172 = arith.constant 0 : index
    %228 = vector.load %arg2[%c2_169, %c5_170, %c0_171, %c0_172] : memref<8x9x4x4xf32, #tpu.memory_space<vmem>>, vector<1x1x4x4xf32>
    %229 = vector.shape_cast %228 : vector<1x1x4x4xf32> to vector<4x4xf32>
    %cst_173 = arith.constant dense<0.000000e+00> : vector<4x256xf32>
    %230 = tpu.matmul %229, %227, %cst_173 {dimension_numbers = #tpu.dot_dimension_numbers<[1], [0], [0], [1], [0, 0, 1, 1], [], []>} : vector<4x4xf32>, vector<4x256xf32>, vector<4x256xf32> -> vector<4x256xf32>
    %231 = arith.addf %224, %230 : vector<4x256xf32>
    %c226_i32 = arith.constant 226 : i32
    %232 = tpu.dynamic_rotate %165 by %c226_i32 dim 1 : vector<4x256xf32>, i32 -> vector<4x256xf32>
    %cst_174 = arith.constant 0.000000e+00 : f32
    %233 = vector.broadcast %cst_174 : f32 to vector<4x256xf32>
    %234 = arith.select %186, %232, %233 : vector<4x256xi1>, vector<4x256xf32>
    %c2_175 = arith.constant 2 : index
    %c6_176 = arith.constant 6 : index
    %c0_177 = arith.constant 0 : index
    %c0_178 = arith.constant 0 : index
    %235 = vector.load %arg2[%c2_175, %c6_176, %c0_177, %c0_178] : memref<8x9x4x4xf32, #tpu.memory_space<vmem>>, vector<1x1x4x4xf32>
    %236 = vector.shape_cast %235 : vector<1x1x4x4xf32> to vector<4x4xf32>
    %cst_179 = arith.constant dense<0.000000e+00> : vector<4x256xf32>
    %237 = tpu.matmul %236, %234, %cst_179 {dimension_numbers = #tpu.dot_dimension_numbers<[1], [0], [0], [1], [0, 0, 1, 1], [], []>} : vector<4x4xf32>, vector<4x256xf32>, vector<4x256xf32> -> vector<4x256xf32>
    %238 = arith.addf %231, %237 : vector<4x256xf32>
    %c224_i32 = arith.constant 224 : i32
    %239 = tpu.dynamic_rotate %165 by %c224_i32 dim 1 : vector<4x256xf32>, i32 -> vector<4x256xf32>
    %cst_180 = arith.constant 0.000000e+00 : f32
    %240 = vector.broadcast %cst_180 : f32 to vector<4x256xf32>
    %241 = arith.select %188, %239, %240 : vector<4x256xi1>, vector<4x256xf32>
    %c2_181 = arith.constant 2 : index
    %c7_182 = arith.constant 7 : index
    %c0_183 = arith.constant 0 : index
    %c0_184 = arith.constant 0 : index
    %242 = vector.load %arg2[%c2_181, %c7_182, %c0_183, %c0_184] : memref<8x9x4x4xf32, #tpu.memory_space<vmem>>, vector<1x1x4x4xf32>
    %243 = vector.shape_cast %242 : vector<1x1x4x4xf32> to vector<4x4xf32>
    %cst_185 = arith.constant dense<0.000000e+00> : vector<4x256xf32>
    %244 = tpu.matmul %243, %241, %cst_185 {dimension_numbers = #tpu.dot_dimension_numbers<[1], [0], [0], [1], [0, 0, 1, 1], [], []>} : vector<4x4xf32>, vector<4x256xf32>, vector<4x256xf32> -> vector<4x256xf32>
    %245 = arith.addf %238, %244 : vector<4x256xf32>
    %c222_i32 = arith.constant 222 : i32
    %246 = tpu.dynamic_rotate %165 by %c222_i32 dim 1 : vector<4x256xf32>, i32 -> vector<4x256xf32>
    %cst_186 = arith.constant 0.000000e+00 : f32
    %247 = vector.broadcast %cst_186 : f32 to vector<4x256xf32>
    %248 = arith.select %193, %246, %247 : vector<4x256xi1>, vector<4x256xf32>
    %c2_187 = arith.constant 2 : index
    %c8_188 = arith.constant 8 : index
    %c0_189 = arith.constant 0 : index
    %c0_190 = arith.constant 0 : index
    %249 = vector.load %arg2[%c2_187, %c8_188, %c0_189, %c0_190] : memref<8x9x4x4xf32, #tpu.memory_space<vmem>>, vector<1x1x4x4xf32>
    %250 = vector.shape_cast %249 : vector<1x1x4x4xf32> to vector<4x4xf32>
    %cst_191 = arith.constant dense<0.000000e+00> : vector<4x256xf32>
    %251 = tpu.matmul %250, %248, %cst_191 {dimension_numbers = #tpu.dot_dimension_numbers<[1], [0], [0], [1], [0, 0, 1, 1], [], []>} : vector<4x4xf32>, vector<4x256xf32>, vector<4x256xf32> -> vector<4x256xf32>
    %252 = arith.addf %245, %251 : vector<4x256xf32>
    %c2_192 = arith.constant 2 : index
    %c0_193 = arith.constant 0 : index
    %c0_194 = arith.constant 0 : index
    %253 = vector.load %arg3[%c2_192, %c0_193, %c0_194] : memref<8x4x1xf32, #tpu.memory_space<vmem>>, vector<1x4x1xf32>
    %254 = vector.shape_cast %253 : vector<1x4x1xf32> to vector<4x1xf32>
    %255 = vector.broadcast %254 : vector<4x1xf32> to vector<4x256xf32>
    %256 = arith.addf %252, %255 : vector<4x256xf32>
    %cst_195 = arith.constant 0.000000e+00 : f32
    %257 = vector.broadcast %cst_195 : f32 to vector<4x256xf32>
    %258 = arith.maximumf %256, %257 : vector<4x256xf32>
    %c34_i32_196 = arith.constant 34 : i32
    %259 = tpu.dynamic_rotate %258 by %c34_i32_196 dim 1 : vector<4x256xf32>, i32 -> vector<4x256xf32>
    %cst_197 = arith.constant 0.000000e+00 : f32
    %260 = vector.broadcast %cst_197 : f32 to vector<4x256xf32>
    %261 = arith.select %170, %259, %260 : vector<4x256xi1>, vector<4x256xf32>
    %c3_198 = arith.constant 3 : index
    %c0_199 = arith.constant 0 : index
    %c0_200 = arith.constant 0 : index
    %c0_201 = arith.constant 0 : index
    %262 = vector.load %arg2[%c3_198, %c0_199, %c0_200, %c0_201] : memref<8x9x4x4xf32, #tpu.memory_space<vmem>>, vector<1x1x4x4xf32>
    %263 = vector.shape_cast %262 : vector<1x1x4x4xf32> to vector<4x4xf32>
    %cst_202 = arith.constant dense<0.000000e+00> : vector<4x256xf32>
    %264 = tpu.matmul %263, %261, %cst_202 {dimension_numbers = #tpu.dot_dimension_numbers<[1], [0], [0], [1], [0, 0, 1, 1], [], []>} : vector<4x4xf32>, vector<4x256xf32>, vector<4x256xf32> -> vector<4x256xf32>
    %c32_i32_203 = arith.constant 32 : i32
    %265 = tpu.dynamic_rotate %258 by %c32_i32_203 dim 1 : vector<4x256xf32>, i32 -> vector<4x256xf32>
    %cst_204 = arith.constant 0.000000e+00 : f32
    %266 = vector.broadcast %cst_204 : f32 to vector<4x256xf32>
    %267 = arith.select %172, %265, %266 : vector<4x256xi1>, vector<4x256xf32>
    %c3_205 = arith.constant 3 : index
    %c1_206 = arith.constant 1 : index
    %c0_207 = arith.constant 0 : index
    %c0_208 = arith.constant 0 : index
    %268 = vector.load %arg2[%c3_205, %c1_206, %c0_207, %c0_208] : memref<8x9x4x4xf32, #tpu.memory_space<vmem>>, vector<1x1x4x4xf32>
    %269 = vector.shape_cast %268 : vector<1x1x4x4xf32> to vector<4x4xf32>
    %cst_209 = arith.constant dense<0.000000e+00> : vector<4x256xf32>
    %270 = tpu.matmul %269, %267, %cst_209 {dimension_numbers = #tpu.dot_dimension_numbers<[1], [0], [0], [1], [0, 0, 1, 1], [], []>} : vector<4x4xf32>, vector<4x256xf32>, vector<4x256xf32> -> vector<4x256xf32>
    %271 = arith.addf %264, %270 : vector<4x256xf32>
    %c30_i32_210 = arith.constant 30 : i32
    %272 = tpu.dynamic_rotate %258 by %c30_i32_210 dim 1 : vector<4x256xf32>, i32 -> vector<4x256xf32>
    %cst_211 = arith.constant 0.000000e+00 : f32
    %273 = vector.broadcast %cst_211 : f32 to vector<4x256xf32>
    %274 = arith.select %177, %272, %273 : vector<4x256xi1>, vector<4x256xf32>
    %c3_212 = arith.constant 3 : index
    %c2_213 = arith.constant 2 : index
    %c0_214 = arith.constant 0 : index
    %c0_215 = arith.constant 0 : index
    %275 = vector.load %arg2[%c3_212, %c2_213, %c0_214, %c0_215] : memref<8x9x4x4xf32, #tpu.memory_space<vmem>>, vector<1x1x4x4xf32>
    %276 = vector.shape_cast %275 : vector<1x1x4x4xf32> to vector<4x4xf32>
    %cst_216 = arith.constant dense<0.000000e+00> : vector<4x256xf32>
    %277 = tpu.matmul %276, %274, %cst_216 {dimension_numbers = #tpu.dot_dimension_numbers<[1], [0], [0], [1], [0, 0, 1, 1], [], []>} : vector<4x4xf32>, vector<4x256xf32>, vector<4x256xf32> -> vector<4x256xf32>
    %278 = arith.addf %271, %277 : vector<4x256xf32>
    %c2_i32_217 = arith.constant 2 : i32
    %279 = tpu.dynamic_rotate %258 by %c2_i32_217 dim 1 : vector<4x256xf32>, i32 -> vector<4x256xf32>
    %cst_218 = arith.constant 0.000000e+00 : f32
    %280 = vector.broadcast %cst_218 : f32 to vector<4x256xf32>
    %281 = arith.select %179, %279, %280 : vector<4x256xi1>, vector<4x256xf32>
    %c3_219 = arith.constant 3 : index
    %c3_220 = arith.constant 3 : index
    %c0_221 = arith.constant 0 : index
    %c0_222 = arith.constant 0 : index
    %282 = vector.load %arg2[%c3_219, %c3_220, %c0_221, %c0_222] : memref<8x9x4x4xf32, #tpu.memory_space<vmem>>, vector<1x1x4x4xf32>
    %283 = vector.shape_cast %282 : vector<1x1x4x4xf32> to vector<4x4xf32>
    %cst_223 = arith.constant dense<0.000000e+00> : vector<4x256xf32>
    %284 = tpu.matmul %283, %281, %cst_223 {dimension_numbers = #tpu.dot_dimension_numbers<[1], [0], [0], [1], [0, 0, 1, 1], [], []>} : vector<4x4xf32>, vector<4x256xf32>, vector<4x256xf32> -> vector<4x256xf32>
    %285 = arith.addf %278, %284 : vector<4x256xf32>
    %c3_224 = arith.constant 3 : index
    %c4_225 = arith.constant 4 : index
    %c0_226 = arith.constant 0 : index
    %c0_227 = arith.constant 0 : index
    %286 = vector.load %arg2[%c3_224, %c4_225, %c0_226, %c0_227] : memref<8x9x4x4xf32, #tpu.memory_space<vmem>>, vector<1x1x4x4xf32>
    %287 = vector.shape_cast %286 : vector<1x1x4x4xf32> to vector<4x4xf32>
    %cst_228 = arith.constant dense<0.000000e+00> : vector<4x256xf32>
    %288 = tpu.matmul %287, %258, %cst_228 {dimension_numbers = #tpu.dot_dimension_numbers<[1], [0], [0], [1], [0, 0, 1, 1], [], []>} : vector<4x4xf32>, vector<4x256xf32>, vector<4x256xf32> -> vector<4x256xf32>
    %289 = arith.addf %285, %288 : vector<4x256xf32>
    %c254_i32_229 = arith.constant 254 : i32
    %290 = tpu.dynamic_rotate %258 by %c254_i32_229 dim 1 : vector<4x256xf32>, i32 -> vector<4x256xf32>
    %cst_230 = arith.constant 0.000000e+00 : f32
    %291 = vector.broadcast %cst_230 : f32 to vector<4x256xf32>
    %292 = arith.select %181, %290, %291 : vector<4x256xi1>, vector<4x256xf32>
    %c3_231 = arith.constant 3 : index
    %c5_232 = arith.constant 5 : index
    %c0_233 = arith.constant 0 : index
    %c0_234 = arith.constant 0 : index
    %293 = vector.load %arg2[%c3_231, %c5_232, %c0_233, %c0_234] : memref<8x9x4x4xf32, #tpu.memory_space<vmem>>, vector<1x1x4x4xf32>
    %294 = vector.shape_cast %293 : vector<1x1x4x4xf32> to vector<4x4xf32>
    %cst_235 = arith.constant dense<0.000000e+00> : vector<4x256xf32>
    %295 = tpu.matmul %294, %292, %cst_235 {dimension_numbers = #tpu.dot_dimension_numbers<[1], [0], [0], [1], [0, 0, 1, 1], [], []>} : vector<4x4xf32>, vector<4x256xf32>, vector<4x256xf32> -> vector<4x256xf32>
    %296 = arith.addf %289, %295 : vector<4x256xf32>
    %c226_i32_236 = arith.constant 226 : i32
    %297 = tpu.dynamic_rotate %258 by %c226_i32_236 dim 1 : vector<4x256xf32>, i32 -> vector<4x256xf32>
    %cst_237 = arith.constant 0.000000e+00 : f32
    %298 = vector.broadcast %cst_237 : f32 to vector<4x256xf32>
    %299 = arith.select %186, %297, %298 : vector<4x256xi1>, vector<4x256xf32>
    %c3_238 = arith.constant 3 : index
    %c6_239 = arith.constant 6 : index
    %c0_240 = arith.constant 0 : index
    %c0_241 = arith.constant 0 : index
    %300 = vector.load %arg2[%c3_238, %c6_239, %c0_240, %c0_241] : memref<8x9x4x4xf32, #tpu.memory_space<vmem>>, vector<1x1x4x4xf32>
    %301 = vector.shape_cast %300 : vector<1x1x4x4xf32> to vector<4x4xf32>
    %cst_242 = arith.constant dense<0.000000e+00> : vector<4x256xf32>
    %302 = tpu.matmul %301, %299, %cst_242 {dimension_numbers = #tpu.dot_dimension_numbers<[1], [0], [0], [1], [0, 0, 1, 1], [], []>} : vector<4x4xf32>, vector<4x256xf32>, vector<4x256xf32> -> vector<4x256xf32>
    %303 = arith.addf %296, %302 : vector<4x256xf32>
    %c224_i32_243 = arith.constant 224 : i32
    %304 = tpu.dynamic_rotate %258 by %c224_i32_243 dim 1 : vector<4x256xf32>, i32 -> vector<4x256xf32>
    %cst_244 = arith.constant 0.000000e+00 : f32
    %305 = vector.broadcast %cst_244 : f32 to vector<4x256xf32>
    %306 = arith.select %188, %304, %305 : vector<4x256xi1>, vector<4x256xf32>
    %c3_245 = arith.constant 3 : index
    %c7_246 = arith.constant 7 : index
    %c0_247 = arith.constant 0 : index
    %c0_248 = arith.constant 0 : index
    %307 = vector.load %arg2[%c3_245, %c7_246, %c0_247, %c0_248] : memref<8x9x4x4xf32, #tpu.memory_space<vmem>>, vector<1x1x4x4xf32>
    %308 = vector.shape_cast %307 : vector<1x1x4x4xf32> to vector<4x4xf32>
    %cst_249 = arith.constant dense<0.000000e+00> : vector<4x256xf32>
    %309 = tpu.matmul %308, %306, %cst_249 {dimension_numbers = #tpu.dot_dimension_numbers<[1], [0], [0], [1], [0, 0, 1, 1], [], []>} : vector<4x4xf32>, vector<4x256xf32>, vector<4x256xf32> -> vector<4x256xf32>
    %310 = arith.addf %303, %309 : vector<4x256xf32>
    %c222_i32_250 = arith.constant 222 : i32
    %311 = tpu.dynamic_rotate %258 by %c222_i32_250 dim 1 : vector<4x256xf32>, i32 -> vector<4x256xf32>
    %cst_251 = arith.constant 0.000000e+00 : f32
    %312 = vector.broadcast %cst_251 : f32 to vector<4x256xf32>
    %313 = arith.select %193, %311, %312 : vector<4x256xi1>, vector<4x256xf32>
    %c3_252 = arith.constant 3 : index
    %c8_253 = arith.constant 8 : index
    %c0_254 = arith.constant 0 : index
    %c0_255 = arith.constant 0 : index
    %314 = vector.load %arg2[%c3_252, %c8_253, %c0_254, %c0_255] : memref<8x9x4x4xf32, #tpu.memory_space<vmem>>, vector<1x1x4x4xf32>
    %315 = vector.shape_cast %314 : vector<1x1x4x4xf32> to vector<4x4xf32>
    %cst_256 = arith.constant dense<0.000000e+00> : vector<4x256xf32>
    %316 = tpu.matmul %315, %313, %cst_256 {dimension_numbers = #tpu.dot_dimension_numbers<[1], [0], [0], [1], [0, 0, 1, 1], [], []>} : vector<4x4xf32>, vector<4x256xf32>, vector<4x256xf32> -> vector<4x256xf32>
    %317 = arith.addf %310, %316 : vector<4x256xf32>
    %c3_257 = arith.constant 3 : index
    %c0_258 = arith.constant 0 : index
    %c0_259 = arith.constant 0 : index
    %318 = vector.load %arg3[%c3_257, %c0_258, %c0_259] : memref<8x4x1xf32, #tpu.memory_space<vmem>>, vector<1x4x1xf32>
    %319 = vector.shape_cast %318 : vector<1x4x1xf32> to vector<4x1xf32>
    %320 = vector.broadcast %319 : vector<4x1xf32> to vector<4x256xf32>
    %321 = arith.addf %317, %320 : vector<4x256xf32>
    %322 = arith.addf %321, %165 : vector<4x256xf32>
    %cst_260 = arith.constant 0.000000e+00 : f32
    %323 = vector.broadcast %cst_260 : f32 to vector<4x256xf32>
    %324 = arith.maximumf %322, %323 : vector<4x256xf32>
    %c4_i32_261 = arith.constant 4 : i32
    %325 = vector.broadcast %c4_i32_261 : i32 to vector<4x256xi32>
    %326 = arith.cmpi sge, %4, %325 : vector<4x256xi32>
    %c4_i32_262 = arith.constant 4 : i32
    %327 = vector.broadcast %c4_i32_262 : i32 to vector<4x256xi32>
    %328 = arith.cmpi sge, %2, %327 : vector<4x256xi32>
    %329 = arith.andi %326, %328 : vector<4x256xi1>
    %c4_i32_263 = arith.constant 4 : i32
    %330 = vector.broadcast %c4_i32_263 : i32 to vector<4x256xi32>
    %331 = arith.cmpi sge, %4, %330 : vector<4x256xi32>
    %c4_i32_264 = arith.constant 4 : i32
    %332 = vector.broadcast %c4_i32_264 : i32 to vector<4x256xi32>
    %333 = arith.cmpi sge, %4, %332 : vector<4x256xi32>
    %c12_i32 = arith.constant 12 : i32
    %334 = vector.broadcast %c12_i32 : i32 to vector<4x256xi32>
    %335 = arith.cmpi slt, %2, %334 : vector<4x256xi32>
    %336 = arith.andi %333, %335 : vector<4x256xi1>
    %c4_i32_265 = arith.constant 4 : i32
    %337 = vector.broadcast %c4_i32_265 : i32 to vector<4x256xi32>
    %338 = arith.cmpi sge, %2, %337 : vector<4x256xi32>
    %c12_i32_266 = arith.constant 12 : i32
    %339 = vector.broadcast %c12_i32_266 : i32 to vector<4x256xi32>
    %340 = arith.cmpi slt, %2, %339 : vector<4x256xi32>
    %c12_i32_267 = arith.constant 12 : i32
    %341 = vector.broadcast %c12_i32_267 : i32 to vector<4x256xi32>
    %342 = arith.cmpi slt, %4, %341 : vector<4x256xi32>
    %c4_i32_268 = arith.constant 4 : i32
    %343 = vector.broadcast %c4_i32_268 : i32 to vector<4x256xi32>
    %344 = arith.cmpi sge, %2, %343 : vector<4x256xi32>
    %345 = arith.andi %342, %344 : vector<4x256xi1>
    %c12_i32_269 = arith.constant 12 : i32
    %346 = vector.broadcast %c12_i32_269 : i32 to vector<4x256xi32>
    %347 = arith.cmpi slt, %4, %346 : vector<4x256xi32>
    %c12_i32_270 = arith.constant 12 : i32
    %348 = vector.broadcast %c12_i32_270 : i32 to vector<4x256xi32>
    %349 = arith.cmpi slt, %4, %348 : vector<4x256xi32>
    %c12_i32_271 = arith.constant 12 : i32
    %350 = vector.broadcast %c12_i32_271 : i32 to vector<4x256xi32>
    %351 = arith.cmpi slt, %2, %350 : vector<4x256xi32>
    %352 = arith.andi %349, %351 : vector<4x256xi1>
    %c68_i32 = arith.constant 68 : i32
    %353 = tpu.dynamic_rotate %324 by %c68_i32 dim 1 : vector<4x256xf32>, i32 -> vector<4x256xf32>
    %cst_272 = arith.constant 0.000000e+00 : f32
    %354 = vector.broadcast %cst_272 : f32 to vector<4x256xf32>
    %355 = arith.select %329, %353, %354 : vector<4x256xi1>, vector<4x256xf32>
    %c4_273 = arith.constant 4 : index
    %c0_274 = arith.constant 0 : index
    %c0_275 = arith.constant 0 : index
    %c0_276 = arith.constant 0 : index
    %356 = vector.load %arg2[%c4_273, %c0_274, %c0_275, %c0_276] : memref<8x9x4x4xf32, #tpu.memory_space<vmem>>, vector<1x1x4x4xf32>
    %357 = vector.shape_cast %356 : vector<1x1x4x4xf32> to vector<4x4xf32>
    %cst_277 = arith.constant dense<0.000000e+00> : vector<4x256xf32>
    %358 = tpu.matmul %357, %355, %cst_277 {dimension_numbers = #tpu.dot_dimension_numbers<[1], [0], [0], [1], [0, 0, 1, 1], [], []>} : vector<4x4xf32>, vector<4x256xf32>, vector<4x256xf32> -> vector<4x256xf32>
    %c64_i32 = arith.constant 64 : i32
    %359 = tpu.dynamic_rotate %324 by %c64_i32 dim 1 : vector<4x256xf32>, i32 -> vector<4x256xf32>
    %cst_278 = arith.constant 0.000000e+00 : f32
    %360 = vector.broadcast %cst_278 : f32 to vector<4x256xf32>
    %361 = arith.select %331, %359, %360 : vector<4x256xi1>, vector<4x256xf32>
    %c4_279 = arith.constant 4 : index
    %c1_280 = arith.constant 1 : index
    %c0_281 = arith.constant 0 : index
    %c0_282 = arith.constant 0 : index
    %362 = vector.load %arg2[%c4_279, %c1_280, %c0_281, %c0_282] : memref<8x9x4x4xf32, #tpu.memory_space<vmem>>, vector<1x1x4x4xf32>
    %363 = vector.shape_cast %362 : vector<1x1x4x4xf32> to vector<4x4xf32>
    %cst_283 = arith.constant dense<0.000000e+00> : vector<4x256xf32>
    %364 = tpu.matmul %363, %361, %cst_283 {dimension_numbers = #tpu.dot_dimension_numbers<[1], [0], [0], [1], [0, 0, 1, 1], [], []>} : vector<4x4xf32>, vector<4x256xf32>, vector<4x256xf32> -> vector<4x256xf32>
    %365 = arith.addf %358, %364 : vector<4x256xf32>
    %c60_i32 = arith.constant 60 : i32
    %366 = tpu.dynamic_rotate %324 by %c60_i32 dim 1 : vector<4x256xf32>, i32 -> vector<4x256xf32>
    %cst_284 = arith.constant 0.000000e+00 : f32
    %367 = vector.broadcast %cst_284 : f32 to vector<4x256xf32>
    %368 = arith.select %336, %366, %367 : vector<4x256xi1>, vector<4x256xf32>
    %c4_285 = arith.constant 4 : index
    %c2_286 = arith.constant 2 : index
    %c0_287 = arith.constant 0 : index
    %c0_288 = arith.constant 0 : index
    %369 = vector.load %arg2[%c4_285, %c2_286, %c0_287, %c0_288] : memref<8x9x4x4xf32, #tpu.memory_space<vmem>>, vector<1x1x4x4xf32>
    %370 = vector.shape_cast %369 : vector<1x1x4x4xf32> to vector<4x4xf32>
    %cst_289 = arith.constant dense<0.000000e+00> : vector<4x256xf32>
    %371 = tpu.matmul %370, %368, %cst_289 {dimension_numbers = #tpu.dot_dimension_numbers<[1], [0], [0], [1], [0, 0, 1, 1], [], []>} : vector<4x4xf32>, vector<4x256xf32>, vector<4x256xf32> -> vector<4x256xf32>
    %372 = arith.addf %365, %371 : vector<4x256xf32>
    %c4_i32_290 = arith.constant 4 : i32
    %373 = tpu.dynamic_rotate %324 by %c4_i32_290 dim 1 : vector<4x256xf32>, i32 -> vector<4x256xf32>
    %cst_291 = arith.constant 0.000000e+00 : f32
    %374 = vector.broadcast %cst_291 : f32 to vector<4x256xf32>
    %375 = arith.select %338, %373, %374 : vector<4x256xi1>, vector<4x256xf32>
    %c4_292 = arith.constant 4 : index
    %c3_293 = arith.constant 3 : index
    %c0_294 = arith.constant 0 : index
    %c0_295 = arith.constant 0 : index
    %376 = vector.load %arg2[%c4_292, %c3_293, %c0_294, %c0_295] : memref<8x9x4x4xf32, #tpu.memory_space<vmem>>, vector<1x1x4x4xf32>
    %377 = vector.shape_cast %376 : vector<1x1x4x4xf32> to vector<4x4xf32>
    %cst_296 = arith.constant dense<0.000000e+00> : vector<4x256xf32>
    %378 = tpu.matmul %377, %375, %cst_296 {dimension_numbers = #tpu.dot_dimension_numbers<[1], [0], [0], [1], [0, 0, 1, 1], [], []>} : vector<4x4xf32>, vector<4x256xf32>, vector<4x256xf32> -> vector<4x256xf32>
    %379 = arith.addf %372, %378 : vector<4x256xf32>
    %c4_297 = arith.constant 4 : index
    %c4_298 = arith.constant 4 : index
    %c0_299 = arith.constant 0 : index
    %c0_300 = arith.constant 0 : index
    %380 = vector.load %arg2[%c4_297, %c4_298, %c0_299, %c0_300] : memref<8x9x4x4xf32, #tpu.memory_space<vmem>>, vector<1x1x4x4xf32>
    %381 = vector.shape_cast %380 : vector<1x1x4x4xf32> to vector<4x4xf32>
    %cst_301 = arith.constant dense<0.000000e+00> : vector<4x256xf32>
    %382 = tpu.matmul %381, %324, %cst_301 {dimension_numbers = #tpu.dot_dimension_numbers<[1], [0], [0], [1], [0, 0, 1, 1], [], []>} : vector<4x4xf32>, vector<4x256xf32>, vector<4x256xf32> -> vector<4x256xf32>
    %383 = arith.addf %379, %382 : vector<4x256xf32>
    %c252_i32 = arith.constant 252 : i32
    %384 = tpu.dynamic_rotate %324 by %c252_i32 dim 1 : vector<4x256xf32>, i32 -> vector<4x256xf32>
    %cst_302 = arith.constant 0.000000e+00 : f32
    %385 = vector.broadcast %cst_302 : f32 to vector<4x256xf32>
    %386 = arith.select %340, %384, %385 : vector<4x256xi1>, vector<4x256xf32>
    %c4_303 = arith.constant 4 : index
    %c5_304 = arith.constant 5 : index
    %c0_305 = arith.constant 0 : index
    %c0_306 = arith.constant 0 : index
    %387 = vector.load %arg2[%c4_303, %c5_304, %c0_305, %c0_306] : memref<8x9x4x4xf32, #tpu.memory_space<vmem>>, vector<1x1x4x4xf32>
    %388 = vector.shape_cast %387 : vector<1x1x4x4xf32> to vector<4x4xf32>
    %cst_307 = arith.constant dense<0.000000e+00> : vector<4x256xf32>
    %389 = tpu.matmul %388, %386, %cst_307 {dimension_numbers = #tpu.dot_dimension_numbers<[1], [0], [0], [1], [0, 0, 1, 1], [], []>} : vector<4x4xf32>, vector<4x256xf32>, vector<4x256xf32> -> vector<4x256xf32>
    %390 = arith.addf %383, %389 : vector<4x256xf32>
    %c196_i32 = arith.constant 196 : i32
    %391 = tpu.dynamic_rotate %324 by %c196_i32 dim 1 : vector<4x256xf32>, i32 -> vector<4x256xf32>
    %cst_308 = arith.constant 0.000000e+00 : f32
    %392 = vector.broadcast %cst_308 : f32 to vector<4x256xf32>
    %393 = arith.select %345, %391, %392 : vector<4x256xi1>, vector<4x256xf32>
    %c4_309 = arith.constant 4 : index
    %c6_310 = arith.constant 6 : index
    %c0_311 = arith.constant 0 : index
    %c0_312 = arith.constant 0 : index
    %394 = vector.load %arg2[%c4_309, %c6_310, %c0_311, %c0_312] : memref<8x9x4x4xf32, #tpu.memory_space<vmem>>, vector<1x1x4x4xf32>
    %395 = vector.shape_cast %394 : vector<1x1x4x4xf32> to vector<4x4xf32>
    %cst_313 = arith.constant dense<0.000000e+00> : vector<4x256xf32>
    %396 = tpu.matmul %395, %393, %cst_313 {dimension_numbers = #tpu.dot_dimension_numbers<[1], [0], [0], [1], [0, 0, 1, 1], [], []>} : vector<4x4xf32>, vector<4x256xf32>, vector<4x256xf32> -> vector<4x256xf32>
    %397 = arith.addf %390, %396 : vector<4x256xf32>
    %c192_i32 = arith.constant 192 : i32
    %398 = tpu.dynamic_rotate %324 by %c192_i32 dim 1 : vector<4x256xf32>, i32 -> vector<4x256xf32>
    %cst_314 = arith.constant 0.000000e+00 : f32
    %399 = vector.broadcast %cst_314 : f32 to vector<4x256xf32>
    %400 = arith.select %347, %398, %399 : vector<4x256xi1>, vector<4x256xf32>
    %c4_315 = arith.constant 4 : index
    %c7_316 = arith.constant 7 : index
    %c0_317 = arith.constant 0 : index
    %c0_318 = arith.constant 0 : index
    %401 = vector.load %arg2[%c4_315, %c7_316, %c0_317, %c0_318] : memref<8x9x4x4xf32, #tpu.memory_space<vmem>>, vector<1x1x4x4xf32>
    %402 = vector.shape_cast %401 : vector<1x1x4x4xf32> to vector<4x4xf32>
    %cst_319 = arith.constant dense<0.000000e+00> : vector<4x256xf32>
    %403 = tpu.matmul %402, %400, %cst_319 {dimension_numbers = #tpu.dot_dimension_numbers<[1], [0], [0], [1], [0, 0, 1, 1], [], []>} : vector<4x4xf32>, vector<4x256xf32>, vector<4x256xf32> -> vector<4x256xf32>
    %404 = arith.addf %397, %403 : vector<4x256xf32>
    %c188_i32 = arith.constant 188 : i32
    %405 = tpu.dynamic_rotate %324 by %c188_i32 dim 1 : vector<4x256xf32>, i32 -> vector<4x256xf32>
    %cst_320 = arith.constant 0.000000e+00 : f32
    %406 = vector.broadcast %cst_320 : f32 to vector<4x256xf32>
    %407 = arith.select %352, %405, %406 : vector<4x256xi1>, vector<4x256xf32>
    %c4_321 = arith.constant 4 : index
    %c8_322 = arith.constant 8 : index
    %c0_323 = arith.constant 0 : index
    %c0_324 = arith.constant 0 : index
    %408 = vector.load %arg2[%c4_321, %c8_322, %c0_323, %c0_324] : memref<8x9x4x4xf32, #tpu.memory_space<vmem>>, vector<1x1x4x4xf32>
    %409 = vector.shape_cast %408 : vector<1x1x4x4xf32> to vector<4x4xf32>
    %cst_325 = arith.constant dense<0.000000e+00> : vector<4x256xf32>
    %410 = tpu.matmul %409, %407, %cst_325 {dimension_numbers = #tpu.dot_dimension_numbers<[1], [0], [0], [1], [0, 0, 1, 1], [], []>} : vector<4x4xf32>, vector<4x256xf32>, vector<4x256xf32> -> vector<4x256xf32>
    %411 = arith.addf %404, %410 : vector<4x256xf32>
    %c4_326 = arith.constant 4 : index
    %c0_327 = arith.constant 0 : index
    %c0_328 = arith.constant 0 : index
    %412 = vector.load %arg3[%c4_326, %c0_327, %c0_328] : memref<8x4x1xf32, #tpu.memory_space<vmem>>, vector<1x4x1xf32>
    %413 = vector.shape_cast %412 : vector<1x4x1xf32> to vector<4x1xf32>
    %414 = vector.broadcast %413 : vector<4x1xf32> to vector<4x256xf32>
    %415 = arith.addf %411, %414 : vector<4x256xf32>
    %cst_329 = arith.constant 0.000000e+00 : f32
    %416 = vector.broadcast %cst_329 : f32 to vector<4x256xf32>
    %417 = arith.maximumf %415, %416 : vector<4x256xf32>
    %c68_i32_330 = arith.constant 68 : i32
    %418 = tpu.dynamic_rotate %417 by %c68_i32_330 dim 1 : vector<4x256xf32>, i32 -> vector<4x256xf32>
    %cst_331 = arith.constant 0.000000e+00 : f32
    %419 = vector.broadcast %cst_331 : f32 to vector<4x256xf32>
    %420 = arith.select %329, %418, %419 : vector<4x256xi1>, vector<4x256xf32>
    %c5_332 = arith.constant 5 : index
    %c0_333 = arith.constant 0 : index
    %c0_334 = arith.constant 0 : index
    %c0_335 = arith.constant 0 : index
    %421 = vector.load %arg2[%c5_332, %c0_333, %c0_334, %c0_335] : memref<8x9x4x4xf32, #tpu.memory_space<vmem>>, vector<1x1x4x4xf32>
    %422 = vector.shape_cast %421 : vector<1x1x4x4xf32> to vector<4x4xf32>
    %cst_336 = arith.constant dense<0.000000e+00> : vector<4x256xf32>
    %423 = tpu.matmul %422, %420, %cst_336 {dimension_numbers = #tpu.dot_dimension_numbers<[1], [0], [0], [1], [0, 0, 1, 1], [], []>} : vector<4x4xf32>, vector<4x256xf32>, vector<4x256xf32> -> vector<4x256xf32>
    %c64_i32_337 = arith.constant 64 : i32
    %424 = tpu.dynamic_rotate %417 by %c64_i32_337 dim 1 : vector<4x256xf32>, i32 -> vector<4x256xf32>
    %cst_338 = arith.constant 0.000000e+00 : f32
    %425 = vector.broadcast %cst_338 : f32 to vector<4x256xf32>
    %426 = arith.select %331, %424, %425 : vector<4x256xi1>, vector<4x256xf32>
    %c5_339 = arith.constant 5 : index
    %c1_340 = arith.constant 1 : index
    %c0_341 = arith.constant 0 : index
    %c0_342 = arith.constant 0 : index
    %427 = vector.load %arg2[%c5_339, %c1_340, %c0_341, %c0_342] : memref<8x9x4x4xf32, #tpu.memory_space<vmem>>, vector<1x1x4x4xf32>
    %428 = vector.shape_cast %427 : vector<1x1x4x4xf32> to vector<4x4xf32>
    %cst_343 = arith.constant dense<0.000000e+00> : vector<4x256xf32>
    %429 = tpu.matmul %428, %426, %cst_343 {dimension_numbers = #tpu.dot_dimension_numbers<[1], [0], [0], [1], [0, 0, 1, 1], [], []>} : vector<4x4xf32>, vector<4x256xf32>, vector<4x256xf32> -> vector<4x256xf32>
    %430 = arith.addf %423, %429 : vector<4x256xf32>
    %c60_i32_344 = arith.constant 60 : i32
    %431 = tpu.dynamic_rotate %417 by %c60_i32_344 dim 1 : vector<4x256xf32>, i32 -> vector<4x256xf32>
    %cst_345 = arith.constant 0.000000e+00 : f32
    %432 = vector.broadcast %cst_345 : f32 to vector<4x256xf32>
    %433 = arith.select %336, %431, %432 : vector<4x256xi1>, vector<4x256xf32>
    %c5_346 = arith.constant 5 : index
    %c2_347 = arith.constant 2 : index
    %c0_348 = arith.constant 0 : index
    %c0_349 = arith.constant 0 : index
    %434 = vector.load %arg2[%c5_346, %c2_347, %c0_348, %c0_349] : memref<8x9x4x4xf32, #tpu.memory_space<vmem>>, vector<1x1x4x4xf32>
    %435 = vector.shape_cast %434 : vector<1x1x4x4xf32> to vector<4x4xf32>
    %cst_350 = arith.constant dense<0.000000e+00> : vector<4x256xf32>
    %436 = tpu.matmul %435, %433, %cst_350 {dimension_numbers = #tpu.dot_dimension_numbers<[1], [0], [0], [1], [0, 0, 1, 1], [], []>} : vector<4x4xf32>, vector<4x256xf32>, vector<4x256xf32> -> vector<4x256xf32>
    %437 = arith.addf %430, %436 : vector<4x256xf32>
    %c4_i32_351 = arith.constant 4 : i32
    %438 = tpu.dynamic_rotate %417 by %c4_i32_351 dim 1 : vector<4x256xf32>, i32 -> vector<4x256xf32>
    %cst_352 = arith.constant 0.000000e+00 : f32
    %439 = vector.broadcast %cst_352 : f32 to vector<4x256xf32>
    %440 = arith.select %338, %438, %439 : vector<4x256xi1>, vector<4x256xf32>
    %c5_353 = arith.constant 5 : index
    %c3_354 = arith.constant 3 : index
    %c0_355 = arith.constant 0 : index
    %c0_356 = arith.constant 0 : index
    %441 = vector.load %arg2[%c5_353, %c3_354, %c0_355, %c0_356] : memref<8x9x4x4xf32, #tpu.memory_space<vmem>>, vector<1x1x4x4xf32>
    %442 = vector.shape_cast %441 : vector<1x1x4x4xf32> to vector<4x4xf32>
    %cst_357 = arith.constant dense<0.000000e+00> : vector<4x256xf32>
    %443 = tpu.matmul %442, %440, %cst_357 {dimension_numbers = #tpu.dot_dimension_numbers<[1], [0], [0], [1], [0, 0, 1, 1], [], []>} : vector<4x4xf32>, vector<4x256xf32>, vector<4x256xf32> -> vector<4x256xf32>
    %444 = arith.addf %437, %443 : vector<4x256xf32>
    %c5_358 = arith.constant 5 : index
    %c4_359 = arith.constant 4 : index
    %c0_360 = arith.constant 0 : index
    %c0_361 = arith.constant 0 : index
    %445 = vector.load %arg2[%c5_358, %c4_359, %c0_360, %c0_361] : memref<8x9x4x4xf32, #tpu.memory_space<vmem>>, vector<1x1x4x4xf32>
    %446 = vector.shape_cast %445 : vector<1x1x4x4xf32> to vector<4x4xf32>
    %cst_362 = arith.constant dense<0.000000e+00> : vector<4x256xf32>
    %447 = tpu.matmul %446, %417, %cst_362 {dimension_numbers = #tpu.dot_dimension_numbers<[1], [0], [0], [1], [0, 0, 1, 1], [], []>} : vector<4x4xf32>, vector<4x256xf32>, vector<4x256xf32> -> vector<4x256xf32>
    %448 = arith.addf %444, %447 : vector<4x256xf32>
    %c252_i32_363 = arith.constant 252 : i32
    %449 = tpu.dynamic_rotate %417 by %c252_i32_363 dim 1 : vector<4x256xf32>, i32 -> vector<4x256xf32>
    %cst_364 = arith.constant 0.000000e+00 : f32
    %450 = vector.broadcast %cst_364 : f32 to vector<4x256xf32>
    %451 = arith.select %340, %449, %450 : vector<4x256xi1>, vector<4x256xf32>
    %c5_365 = arith.constant 5 : index
    %c5_366 = arith.constant 5 : index
    %c0_367 = arith.constant 0 : index
    %c0_368 = arith.constant 0 : index
    %452 = vector.load %arg2[%c5_365, %c5_366, %c0_367, %c0_368] : memref<8x9x4x4xf32, #tpu.memory_space<vmem>>, vector<1x1x4x4xf32>
    %453 = vector.shape_cast %452 : vector<1x1x4x4xf32> to vector<4x4xf32>
    %cst_369 = arith.constant dense<0.000000e+00> : vector<4x256xf32>
    %454 = tpu.matmul %453, %451, %cst_369 {dimension_numbers = #tpu.dot_dimension_numbers<[1], [0], [0], [1], [0, 0, 1, 1], [], []>} : vector<4x4xf32>, vector<4x256xf32>, vector<4x256xf32> -> vector<4x256xf32>
    %455 = arith.addf %448, %454 : vector<4x256xf32>
    %c196_i32_370 = arith.constant 196 : i32
    %456 = tpu.dynamic_rotate %417 by %c196_i32_370 dim 1 : vector<4x256xf32>, i32 -> vector<4x256xf32>
    %cst_371 = arith.constant 0.000000e+00 : f32
    %457 = vector.broadcast %cst_371 : f32 to vector<4x256xf32>
    %458 = arith.select %345, %456, %457 : vector<4x256xi1>, vector<4x256xf32>
    %c5_372 = arith.constant 5 : index
    %c6_373 = arith.constant 6 : index
    %c0_374 = arith.constant 0 : index
    %c0_375 = arith.constant 0 : index
    %459 = vector.load %arg2[%c5_372, %c6_373, %c0_374, %c0_375] : memref<8x9x4x4xf32, #tpu.memory_space<vmem>>, vector<1x1x4x4xf32>
    %460 = vector.shape_cast %459 : vector<1x1x4x4xf32> to vector<4x4xf32>
    %cst_376 = arith.constant dense<0.000000e+00> : vector<4x256xf32>
    %461 = tpu.matmul %460, %458, %cst_376 {dimension_numbers = #tpu.dot_dimension_numbers<[1], [0], [0], [1], [0, 0, 1, 1], [], []>} : vector<4x4xf32>, vector<4x256xf32>, vector<4x256xf32> -> vector<4x256xf32>
    %462 = arith.addf %455, %461 : vector<4x256xf32>
    %c192_i32_377 = arith.constant 192 : i32
    %463 = tpu.dynamic_rotate %417 by %c192_i32_377 dim 1 : vector<4x256xf32>, i32 -> vector<4x256xf32>
    %cst_378 = arith.constant 0.000000e+00 : f32
    %464 = vector.broadcast %cst_378 : f32 to vector<4x256xf32>
    %465 = arith.select %347, %463, %464 : vector<4x256xi1>, vector<4x256xf32>
    %c5_379 = arith.constant 5 : index
    %c7_380 = arith.constant 7 : index
    %c0_381 = arith.constant 0 : index
    %c0_382 = arith.constant 0 : index
    %466 = vector.load %arg2[%c5_379, %c7_380, %c0_381, %c0_382] : memref<8x9x4x4xf32, #tpu.memory_space<vmem>>, vector<1x1x4x4xf32>
    %467 = vector.shape_cast %466 : vector<1x1x4x4xf32> to vector<4x4xf32>
    %cst_383 = arith.constant dense<0.000000e+00> : vector<4x256xf32>
    %468 = tpu.matmul %467, %465, %cst_383 {dimension_numbers = #tpu.dot_dimension_numbers<[1], [0], [0], [1], [0, 0, 1, 1], [], []>} : vector<4x4xf32>, vector<4x256xf32>, vector<4x256xf32> -> vector<4x256xf32>
    %469 = arith.addf %462, %468 : vector<4x256xf32>
    %c188_i32_384 = arith.constant 188 : i32
    %470 = tpu.dynamic_rotate %417 by %c188_i32_384 dim 1 : vector<4x256xf32>, i32 -> vector<4x256xf32>
    %cst_385 = arith.constant 0.000000e+00 : f32
    %471 = vector.broadcast %cst_385 : f32 to vector<4x256xf32>
    %472 = arith.select %352, %470, %471 : vector<4x256xi1>, vector<4x256xf32>
    %c5_386 = arith.constant 5 : index
    %c8_387 = arith.constant 8 : index
    %c0_388 = arith.constant 0 : index
    %c0_389 = arith.constant 0 : index
    %473 = vector.load %arg2[%c5_386, %c8_387, %c0_388, %c0_389] : memref<8x9x4x4xf32, #tpu.memory_space<vmem>>, vector<1x1x4x4xf32>
    %474 = vector.shape_cast %473 : vector<1x1x4x4xf32> to vector<4x4xf32>
    %cst_390 = arith.constant dense<0.000000e+00> : vector<4x256xf32>
    %475 = tpu.matmul %474, %472, %cst_390 {dimension_numbers = #tpu.dot_dimension_numbers<[1], [0], [0], [1], [0, 0, 1, 1], [], []>} : vector<4x4xf32>, vector<4x256xf32>, vector<4x256xf32> -> vector<4x256xf32>
    %476 = arith.addf %469, %475 : vector<4x256xf32>
    %c5_391 = arith.constant 5 : index
    %c0_392 = arith.constant 0 : index
    %c0_393 = arith.constant 0 : index
    %477 = vector.load %arg3[%c5_391, %c0_392, %c0_393] : memref<8x4x1xf32, #tpu.memory_space<vmem>>, vector<1x4x1xf32>
    %478 = vector.shape_cast %477 : vector<1x4x1xf32> to vector<4x1xf32>
    %479 = vector.broadcast %478 : vector<4x1xf32> to vector<4x256xf32>
    %480 = arith.addf %476, %479 : vector<4x256xf32>
    %481 = arith.addf %480, %324 : vector<4x256xf32>
    %cst_394 = arith.constant 0.000000e+00 : f32
    %482 = vector.broadcast %cst_394 : f32 to vector<4x256xf32>
    %483 = arith.maximumf %481, %482 : vector<4x256xf32>
    %484 = tpu.concatenate %483, %165 in 0 : vector<4x256xf32>, vector<4x256xf32> -> vector<8x256xf32>
    %c0_395 = arith.constant 0 : index
    %c0_396 = arith.constant 0 : index
    %c0_397 = arith.constant 0 : index
    %485 = vector.load %arg4[%c0_395, %c0_396, %c0_397] : memref<2x4x8xf32, #tpu.memory_space<vmem>>, vector<1x4x8xf32>
    %486 = vector.shape_cast %485 : vector<1x4x8xf32> to vector<4x8xf32>
    %cst_398 = arith.constant dense<0.000000e+00> : vector<4x256xf32>
    %487 = tpu.matmul %486, %484, %cst_398 {dimension_numbers = #tpu.dot_dimension_numbers<[1], [0], [0], [1], [0, 0, 1, 1], [], []>} : vector<4x8xf32>, vector<8x256xf32>, vector<4x256xf32> -> vector<4x256xf32>
    %c0_399 = arith.constant 0 : index
    %c0_400 = arith.constant 0 : index
    %c0_401 = arith.constant 0 : index
    %488 = vector.load %arg5[%c0_399, %c0_400, %c0_401] : memref<2x4x1xf32, #tpu.memory_space<vmem>>, vector<1x4x1xf32>
    %489 = vector.shape_cast %488 : vector<1x4x1xf32> to vector<4x1xf32>
    %490 = vector.broadcast %489 : vector<4x1xf32> to vector<4x256xf32>
    %491 = arith.addf %487, %490 : vector<4x256xf32>
    %c8_i32 = arith.constant 8 : i32
    %492 = vector.broadcast %c8_i32 : i32 to vector<4x256xi32>
    %493 = arith.cmpi sge, %4, %492 : vector<4x256xi32>
    %c8_i32_402 = arith.constant 8 : i32
    %494 = vector.broadcast %c8_i32_402 : i32 to vector<4x256xi32>
    %495 = arith.cmpi sge, %2, %494 : vector<4x256xi32>
    %496 = arith.andi %493, %495 : vector<4x256xi1>
    %c8_i32_403 = arith.constant 8 : i32
    %497 = vector.broadcast %c8_i32_403 : i32 to vector<4x256xi32>
    %498 = arith.cmpi sge, %4, %497 : vector<4x256xi32>
    %c8_i32_404 = arith.constant 8 : i32
    %499 = vector.broadcast %c8_i32_404 : i32 to vector<4x256xi32>
    %500 = arith.cmpi sge, %4, %499 : vector<4x256xi32>
    %c8_i32_405 = arith.constant 8 : i32
    %501 = vector.broadcast %c8_i32_405 : i32 to vector<4x256xi32>
    %502 = arith.cmpi slt, %2, %501 : vector<4x256xi32>
    %503 = arith.andi %500, %502 : vector<4x256xi1>
    %c8_i32_406 = arith.constant 8 : i32
    %504 = vector.broadcast %c8_i32_406 : i32 to vector<4x256xi32>
    %505 = arith.cmpi sge, %2, %504 : vector<4x256xi32>
    %c8_i32_407 = arith.constant 8 : i32
    %506 = vector.broadcast %c8_i32_407 : i32 to vector<4x256xi32>
    %507 = arith.cmpi slt, %2, %506 : vector<4x256xi32>
    %c8_i32_408 = arith.constant 8 : i32
    %508 = vector.broadcast %c8_i32_408 : i32 to vector<4x256xi32>
    %509 = arith.cmpi slt, %4, %508 : vector<4x256xi32>
    %c8_i32_409 = arith.constant 8 : i32
    %510 = vector.broadcast %c8_i32_409 : i32 to vector<4x256xi32>
    %511 = arith.cmpi sge, %2, %510 : vector<4x256xi32>
    %512 = arith.andi %509, %511 : vector<4x256xi1>
    %c8_i32_410 = arith.constant 8 : i32
    %513 = vector.broadcast %c8_i32_410 : i32 to vector<4x256xi32>
    %514 = arith.cmpi slt, %4, %513 : vector<4x256xi32>
    %c8_i32_411 = arith.constant 8 : i32
    %515 = vector.broadcast %c8_i32_411 : i32 to vector<4x256xi32>
    %516 = arith.cmpi slt, %4, %515 : vector<4x256xi32>
    %c8_i32_412 = arith.constant 8 : i32
    %517 = vector.broadcast %c8_i32_412 : i32 to vector<4x256xi32>
    %518 = arith.cmpi slt, %2, %517 : vector<4x256xi32>
    %519 = arith.andi %516, %518 : vector<4x256xi1>
    %c136_i32 = arith.constant 136 : i32
    %520 = tpu.dynamic_rotate %491 by %c136_i32 dim 1 : vector<4x256xf32>, i32 -> vector<4x256xf32>
    %cst_413 = arith.constant 0.000000e+00 : f32
    %521 = vector.broadcast %cst_413 : f32 to vector<4x256xf32>
    %522 = arith.select %496, %520, %521 : vector<4x256xi1>, vector<4x256xf32>
    %c6_414 = arith.constant 6 : index
    %c0_415 = arith.constant 0 : index
    %c0_416 = arith.constant 0 : index
    %c0_417 = arith.constant 0 : index
    %523 = vector.load %arg2[%c6_414, %c0_415, %c0_416, %c0_417] : memref<8x9x4x4xf32, #tpu.memory_space<vmem>>, vector<1x1x4x4xf32>
    %524 = vector.shape_cast %523 : vector<1x1x4x4xf32> to vector<4x4xf32>
    %cst_418 = arith.constant dense<0.000000e+00> : vector<4x256xf32>
    %525 = tpu.matmul %524, %522, %cst_418 {dimension_numbers = #tpu.dot_dimension_numbers<[1], [0], [0], [1], [0, 0, 1, 1], [], []>} : vector<4x4xf32>, vector<4x256xf32>, vector<4x256xf32> -> vector<4x256xf32>
    %c128_i32 = arith.constant 128 : i32
    %526 = tpu.dynamic_rotate %491 by %c128_i32 dim 1 : vector<4x256xf32>, i32 -> vector<4x256xf32>
    %cst_419 = arith.constant 0.000000e+00 : f32
    %527 = vector.broadcast %cst_419 : f32 to vector<4x256xf32>
    %528 = arith.select %498, %526, %527 : vector<4x256xi1>, vector<4x256xf32>
    %c6_420 = arith.constant 6 : index
    %c1_421 = arith.constant 1 : index
    %c0_422 = arith.constant 0 : index
    %c0_423 = arith.constant 0 : index
    %529 = vector.load %arg2[%c6_420, %c1_421, %c0_422, %c0_423] : memref<8x9x4x4xf32, #tpu.memory_space<vmem>>, vector<1x1x4x4xf32>
    %530 = vector.shape_cast %529 : vector<1x1x4x4xf32> to vector<4x4xf32>
    %cst_424 = arith.constant dense<0.000000e+00> : vector<4x256xf32>
    %531 = tpu.matmul %530, %528, %cst_424 {dimension_numbers = #tpu.dot_dimension_numbers<[1], [0], [0], [1], [0, 0, 1, 1], [], []>} : vector<4x4xf32>, vector<4x256xf32>, vector<4x256xf32> -> vector<4x256xf32>
    %532 = arith.addf %525, %531 : vector<4x256xf32>
    %c120_i32 = arith.constant 120 : i32
    %533 = tpu.dynamic_rotate %491 by %c120_i32 dim 1 : vector<4x256xf32>, i32 -> vector<4x256xf32>
    %cst_425 = arith.constant 0.000000e+00 : f32
    %534 = vector.broadcast %cst_425 : f32 to vector<4x256xf32>
    %535 = arith.select %503, %533, %534 : vector<4x256xi1>, vector<4x256xf32>
    %c6_426 = arith.constant 6 : index
    %c2_427 = arith.constant 2 : index
    %c0_428 = arith.constant 0 : index
    %c0_429 = arith.constant 0 : index
    %536 = vector.load %arg2[%c6_426, %c2_427, %c0_428, %c0_429] : memref<8x9x4x4xf32, #tpu.memory_space<vmem>>, vector<1x1x4x4xf32>
    %537 = vector.shape_cast %536 : vector<1x1x4x4xf32> to vector<4x4xf32>
    %cst_430 = arith.constant dense<0.000000e+00> : vector<4x256xf32>
    %538 = tpu.matmul %537, %535, %cst_430 {dimension_numbers = #tpu.dot_dimension_numbers<[1], [0], [0], [1], [0, 0, 1, 1], [], []>} : vector<4x4xf32>, vector<4x256xf32>, vector<4x256xf32> -> vector<4x256xf32>
    %539 = arith.addf %532, %538 : vector<4x256xf32>
    %c8_i32_431 = arith.constant 8 : i32
    %540 = tpu.dynamic_rotate %491 by %c8_i32_431 dim 1 : vector<4x256xf32>, i32 -> vector<4x256xf32>
    %cst_432 = arith.constant 0.000000e+00 : f32
    %541 = vector.broadcast %cst_432 : f32 to vector<4x256xf32>
    %542 = arith.select %505, %540, %541 : vector<4x256xi1>, vector<4x256xf32>
    %c6_433 = arith.constant 6 : index
    %c3_434 = arith.constant 3 : index
    %c0_435 = arith.constant 0 : index
    %c0_436 = arith.constant 0 : index
    %543 = vector.load %arg2[%c6_433, %c3_434, %c0_435, %c0_436] : memref<8x9x4x4xf32, #tpu.memory_space<vmem>>, vector<1x1x4x4xf32>
    %544 = vector.shape_cast %543 : vector<1x1x4x4xf32> to vector<4x4xf32>
    %cst_437 = arith.constant dense<0.000000e+00> : vector<4x256xf32>
    %545 = tpu.matmul %544, %542, %cst_437 {dimension_numbers = #tpu.dot_dimension_numbers<[1], [0], [0], [1], [0, 0, 1, 1], [], []>} : vector<4x4xf32>, vector<4x256xf32>, vector<4x256xf32> -> vector<4x256xf32>
    %546 = arith.addf %539, %545 : vector<4x256xf32>
    %c6_438 = arith.constant 6 : index
    %c4_439 = arith.constant 4 : index
    %c0_440 = arith.constant 0 : index
    %c0_441 = arith.constant 0 : index
    %547 = vector.load %arg2[%c6_438, %c4_439, %c0_440, %c0_441] : memref<8x9x4x4xf32, #tpu.memory_space<vmem>>, vector<1x1x4x4xf32>
    %548 = vector.shape_cast %547 : vector<1x1x4x4xf32> to vector<4x4xf32>
    %cst_442 = arith.constant dense<0.000000e+00> : vector<4x256xf32>
    %549 = tpu.matmul %548, %491, %cst_442 {dimension_numbers = #tpu.dot_dimension_numbers<[1], [0], [0], [1], [0, 0, 1, 1], [], []>} : vector<4x4xf32>, vector<4x256xf32>, vector<4x256xf32> -> vector<4x256xf32>
    %550 = arith.addf %546, %549 : vector<4x256xf32>
    %c248_i32 = arith.constant 248 : i32
    %551 = tpu.dynamic_rotate %491 by %c248_i32 dim 1 : vector<4x256xf32>, i32 -> vector<4x256xf32>
    %cst_443 = arith.constant 0.000000e+00 : f32
    %552 = vector.broadcast %cst_443 : f32 to vector<4x256xf32>
    %553 = arith.select %507, %551, %552 : vector<4x256xi1>, vector<4x256xf32>
    %c6_444 = arith.constant 6 : index
    %c5_445 = arith.constant 5 : index
    %c0_446 = arith.constant 0 : index
    %c0_447 = arith.constant 0 : index
    %554 = vector.load %arg2[%c6_444, %c5_445, %c0_446, %c0_447] : memref<8x9x4x4xf32, #tpu.memory_space<vmem>>, vector<1x1x4x4xf32>
    %555 = vector.shape_cast %554 : vector<1x1x4x4xf32> to vector<4x4xf32>
    %cst_448 = arith.constant dense<0.000000e+00> : vector<4x256xf32>
    %556 = tpu.matmul %555, %553, %cst_448 {dimension_numbers = #tpu.dot_dimension_numbers<[1], [0], [0], [1], [0, 0, 1, 1], [], []>} : vector<4x4xf32>, vector<4x256xf32>, vector<4x256xf32> -> vector<4x256xf32>
    %557 = arith.addf %550, %556 : vector<4x256xf32>
    %c136_i32_449 = arith.constant 136 : i32
    %558 = tpu.dynamic_rotate %491 by %c136_i32_449 dim 1 : vector<4x256xf32>, i32 -> vector<4x256xf32>
    %cst_450 = arith.constant 0.000000e+00 : f32
    %559 = vector.broadcast %cst_450 : f32 to vector<4x256xf32>
    %560 = arith.select %512, %558, %559 : vector<4x256xi1>, vector<4x256xf32>
    %c6_451 = arith.constant 6 : index
    %c6_452 = arith.constant 6 : index
    %c0_453 = arith.constant 0 : index
    %c0_454 = arith.constant 0 : index
    %561 = vector.load %arg2[%c6_451, %c6_452, %c0_453, %c0_454] : memref<8x9x4x4xf32, #tpu.memory_space<vmem>>, vector<1x1x4x4xf32>
    %562 = vector.shape_cast %561 : vector<1x1x4x4xf32> to vector<4x4xf32>
    %cst_455 = arith.constant dense<0.000000e+00> : vector<4x256xf32>
    %563 = tpu.matmul %562, %560, %cst_455 {dimension_numbers = #tpu.dot_dimension_numbers<[1], [0], [0], [1], [0, 0, 1, 1], [], []>} : vector<4x4xf32>, vector<4x256xf32>, vector<4x256xf32> -> vector<4x256xf32>
    %564 = arith.addf %557, %563 : vector<4x256xf32>
    %c128_i32_456 = arith.constant 128 : i32
    %565 = tpu.dynamic_rotate %491 by %c128_i32_456 dim 1 : vector<4x256xf32>, i32 -> vector<4x256xf32>
    %cst_457 = arith.constant 0.000000e+00 : f32
    %566 = vector.broadcast %cst_457 : f32 to vector<4x256xf32>
    %567 = arith.select %514, %565, %566 : vector<4x256xi1>, vector<4x256xf32>
    %c6_458 = arith.constant 6 : index
    %c7_459 = arith.constant 7 : index
    %c0_460 = arith.constant 0 : index
    %c0_461 = arith.constant 0 : index
    %568 = vector.load %arg2[%c6_458, %c7_459, %c0_460, %c0_461] : memref<8x9x4x4xf32, #tpu.memory_space<vmem>>, vector<1x1x4x4xf32>
    %569 = vector.shape_cast %568 : vector<1x1x4x4xf32> to vector<4x4xf32>
    %cst_462 = arith.constant dense<0.000000e+00> : vector<4x256xf32>
    %570 = tpu.matmul %569, %567, %cst_462 {dimension_numbers = #tpu.dot_dimension_numbers<[1], [0], [0], [1], [0, 0, 1, 1], [], []>} : vector<4x4xf32>, vector<4x256xf32>, vector<4x256xf32> -> vector<4x256xf32>
    %571 = arith.addf %564, %570 : vector<4x256xf32>
    %c120_i32_463 = arith.constant 120 : i32
    %572 = tpu.dynamic_rotate %491 by %c120_i32_463 dim 1 : vector<4x256xf32>, i32 -> vector<4x256xf32>
    %cst_464 = arith.constant 0.000000e+00 : f32
    %573 = vector.broadcast %cst_464 : f32 to vector<4x256xf32>
    %574 = arith.select %519, %572, %573 : vector<4x256xi1>, vector<4x256xf32>
    %c6_465 = arith.constant 6 : index
    %c8_466 = arith.constant 8 : index
    %c0_467 = arith.constant 0 : index
    %c0_468 = arith.constant 0 : index
    %575 = vector.load %arg2[%c6_465, %c8_466, %c0_467, %c0_468] : memref<8x9x4x4xf32, #tpu.memory_space<vmem>>, vector<1x1x4x4xf32>
    %576 = vector.shape_cast %575 : vector<1x1x4x4xf32> to vector<4x4xf32>
    %cst_469 = arith.constant dense<0.000000e+00> : vector<4x256xf32>
    %577 = tpu.matmul %576, %574, %cst_469 {dimension_numbers = #tpu.dot_dimension_numbers<[1], [0], [0], [1], [0, 0, 1, 1], [], []>} : vector<4x4xf32>, vector<4x256xf32>, vector<4x256xf32> -> vector<4x256xf32>
    %578 = arith.addf %571, %577 : vector<4x256xf32>
    %c6_470 = arith.constant 6 : index
    %c0_471 = arith.constant 0 : index
    %c0_472 = arith.constant 0 : index
    %579 = vector.load %arg3[%c6_470, %c0_471, %c0_472] : memref<8x4x1xf32, #tpu.memory_space<vmem>>, vector<1x4x1xf32>
    %580 = vector.shape_cast %579 : vector<1x4x1xf32> to vector<4x1xf32>
    %581 = vector.broadcast %580 : vector<4x1xf32> to vector<4x256xf32>
    %582 = arith.addf %578, %581 : vector<4x256xf32>
    %cst_473 = arith.constant 0.000000e+00 : f32
    %583 = vector.broadcast %cst_473 : f32 to vector<4x256xf32>
    %584 = arith.maximumf %582, %583 : vector<4x256xf32>
    %c136_i32_474 = arith.constant 136 : i32
    %585 = tpu.dynamic_rotate %584 by %c136_i32_474 dim 1 : vector<4x256xf32>, i32 -> vector<4x256xf32>
    %cst_475 = arith.constant 0.000000e+00 : f32
    %586 = vector.broadcast %cst_475 : f32 to vector<4x256xf32>
    %587 = arith.select %496, %585, %586 : vector<4x256xi1>, vector<4x256xf32>
    %c7_476 = arith.constant 7 : index
    %c0_477 = arith.constant 0 : index
    %c0_478 = arith.constant 0 : index
    %c0_479 = arith.constant 0 : index
    %588 = vector.load %arg2[%c7_476, %c0_477, %c0_478, %c0_479] : memref<8x9x4x4xf32, #tpu.memory_space<vmem>>, vector<1x1x4x4xf32>
    %589 = vector.shape_cast %588 : vector<1x1x4x4xf32> to vector<4x4xf32>
    %cst_480 = arith.constant dense<0.000000e+00> : vector<4x256xf32>
    %590 = tpu.matmul %589, %587, %cst_480 {dimension_numbers = #tpu.dot_dimension_numbers<[1], [0], [0], [1], [0, 0, 1, 1], [], []>} : vector<4x4xf32>, vector<4x256xf32>, vector<4x256xf32> -> vector<4x256xf32>
    %c128_i32_481 = arith.constant 128 : i32
    %591 = tpu.dynamic_rotate %584 by %c128_i32_481 dim 1 : vector<4x256xf32>, i32 -> vector<4x256xf32>
    %cst_482 = arith.constant 0.000000e+00 : f32
    %592 = vector.broadcast %cst_482 : f32 to vector<4x256xf32>
    %593 = arith.select %498, %591, %592 : vector<4x256xi1>, vector<4x256xf32>
    %c7_483 = arith.constant 7 : index
    %c1_484 = arith.constant 1 : index
    %c0_485 = arith.constant 0 : index
    %c0_486 = arith.constant 0 : index
    %594 = vector.load %arg2[%c7_483, %c1_484, %c0_485, %c0_486] : memref<8x9x4x4xf32, #tpu.memory_space<vmem>>, vector<1x1x4x4xf32>
    %595 = vector.shape_cast %594 : vector<1x1x4x4xf32> to vector<4x4xf32>
    %cst_487 = arith.constant dense<0.000000e+00> : vector<4x256xf32>
    %596 = tpu.matmul %595, %593, %cst_487 {dimension_numbers = #tpu.dot_dimension_numbers<[1], [0], [0], [1], [0, 0, 1, 1], [], []>} : vector<4x4xf32>, vector<4x256xf32>, vector<4x256xf32> -> vector<4x256xf32>
    %597 = arith.addf %590, %596 : vector<4x256xf32>
    %c120_i32_488 = arith.constant 120 : i32
    %598 = tpu.dynamic_rotate %584 by %c120_i32_488 dim 1 : vector<4x256xf32>, i32 -> vector<4x256xf32>
    %cst_489 = arith.constant 0.000000e+00 : f32
    %599 = vector.broadcast %cst_489 : f32 to vector<4x256xf32>
    %600 = arith.select %503, %598, %599 : vector<4x256xi1>, vector<4x256xf32>
    %c7_490 = arith.constant 7 : index
    %c2_491 = arith.constant 2 : index
    %c0_492 = arith.constant 0 : index
    %c0_493 = arith.constant 0 : index
    %601 = vector.load %arg2[%c7_490, %c2_491, %c0_492, %c0_493] : memref<8x9x4x4xf32, #tpu.memory_space<vmem>>, vector<1x1x4x4xf32>
    %602 = vector.shape_cast %601 : vector<1x1x4x4xf32> to vector<4x4xf32>
    %cst_494 = arith.constant dense<0.000000e+00> : vector<4x256xf32>
    %603 = tpu.matmul %602, %600, %cst_494 {dimension_numbers = #tpu.dot_dimension_numbers<[1], [0], [0], [1], [0, 0, 1, 1], [], []>} : vector<4x4xf32>, vector<4x256xf32>, vector<4x256xf32> -> vector<4x256xf32>
    %604 = arith.addf %597, %603 : vector<4x256xf32>
    %c8_i32_495 = arith.constant 8 : i32
    %605 = tpu.dynamic_rotate %584 by %c8_i32_495 dim 1 : vector<4x256xf32>, i32 -> vector<4x256xf32>
    %cst_496 = arith.constant 0.000000e+00 : f32
    %606 = vector.broadcast %cst_496 : f32 to vector<4x256xf32>
    %607 = arith.select %505, %605, %606 : vector<4x256xi1>, vector<4x256xf32>
    %c7_497 = arith.constant 7 : index
    %c3_498 = arith.constant 3 : index
    %c0_499 = arith.constant 0 : index
    %c0_500 = arith.constant 0 : index
    %608 = vector.load %arg2[%c7_497, %c3_498, %c0_499, %c0_500] : memref<8x9x4x4xf32, #tpu.memory_space<vmem>>, vector<1x1x4x4xf32>
    %609 = vector.shape_cast %608 : vector<1x1x4x4xf32> to vector<4x4xf32>
    %cst_501 = arith.constant dense<0.000000e+00> : vector<4x256xf32>
    %610 = tpu.matmul %609, %607, %cst_501 {dimension_numbers = #tpu.dot_dimension_numbers<[1], [0], [0], [1], [0, 0, 1, 1], [], []>} : vector<4x4xf32>, vector<4x256xf32>, vector<4x256xf32> -> vector<4x256xf32>
    %611 = arith.addf %604, %610 : vector<4x256xf32>
    %c7_502 = arith.constant 7 : index
    %c4_503 = arith.constant 4 : index
    %c0_504 = arith.constant 0 : index
    %c0_505 = arith.constant 0 : index
    %612 = vector.load %arg2[%c7_502, %c4_503, %c0_504, %c0_505] : memref<8x9x4x4xf32, #tpu.memory_space<vmem>>, vector<1x1x4x4xf32>
    %613 = vector.shape_cast %612 : vector<1x1x4x4xf32> to vector<4x4xf32>
    %cst_506 = arith.constant dense<0.000000e+00> : vector<4x256xf32>
    %614 = tpu.matmul %613, %584, %cst_506 {dimension_numbers = #tpu.dot_dimension_numbers<[1], [0], [0], [1], [0, 0, 1, 1], [], []>} : vector<4x4xf32>, vector<4x256xf32>, vector<4x256xf32> -> vector<4x256xf32>
    %615 = arith.addf %611, %614 : vector<4x256xf32>
    %c248_i32_507 = arith.constant 248 : i32
    %616 = tpu.dynamic_rotate %584 by %c248_i32_507 dim 1 : vector<4x256xf32>, i32 -> vector<4x256xf32>
    %cst_508 = arith.constant 0.000000e+00 : f32
    %617 = vector.broadcast %cst_508 : f32 to vector<4x256xf32>
    %618 = arith.select %507, %616, %617 : vector<4x256xi1>, vector<4x256xf32>
    %c7_509 = arith.constant 7 : index
    %c5_510 = arith.constant 5 : index
    %c0_511 = arith.constant 0 : index
    %c0_512 = arith.constant 0 : index
    %619 = vector.load %arg2[%c7_509, %c5_510, %c0_511, %c0_512] : memref<8x9x4x4xf32, #tpu.memory_space<vmem>>, vector<1x1x4x4xf32>
    %620 = vector.shape_cast %619 : vector<1x1x4x4xf32> to vector<4x4xf32>
    %cst_513 = arith.constant dense<0.000000e+00> : vector<4x256xf32>
    %621 = tpu.matmul %620, %618, %cst_513 {dimension_numbers = #tpu.dot_dimension_numbers<[1], [0], [0], [1], [0, 0, 1, 1], [], []>} : vector<4x4xf32>, vector<4x256xf32>, vector<4x256xf32> -> vector<4x256xf32>
    %622 = arith.addf %615, %621 : vector<4x256xf32>
    %c136_i32_514 = arith.constant 136 : i32
    %623 = tpu.dynamic_rotate %584 by %c136_i32_514 dim 1 : vector<4x256xf32>, i32 -> vector<4x256xf32>
    %cst_515 = arith.constant 0.000000e+00 : f32
    %624 = vector.broadcast %cst_515 : f32 to vector<4x256xf32>
    %625 = arith.select %512, %623, %624 : vector<4x256xi1>, vector<4x256xf32>
    %c7_516 = arith.constant 7 : index
    %c6_517 = arith.constant 6 : index
    %c0_518 = arith.constant 0 : index
    %c0_519 = arith.constant 0 : index
    %626 = vector.load %arg2[%c7_516, %c6_517, %c0_518, %c0_519] : memref<8x9x4x4xf32, #tpu.memory_space<vmem>>, vector<1x1x4x4xf32>
    %627 = vector.shape_cast %626 : vector<1x1x4x4xf32> to vector<4x4xf32>
    %cst_520 = arith.constant dense<0.000000e+00> : vector<4x256xf32>
    %628 = tpu.matmul %627, %625, %cst_520 {dimension_numbers = #tpu.dot_dimension_numbers<[1], [0], [0], [1], [0, 0, 1, 1], [], []>} : vector<4x4xf32>, vector<4x256xf32>, vector<4x256xf32> -> vector<4x256xf32>
    %629 = arith.addf %622, %628 : vector<4x256xf32>
    %c128_i32_521 = arith.constant 128 : i32
    %630 = tpu.dynamic_rotate %584 by %c128_i32_521 dim 1 : vector<4x256xf32>, i32 -> vector<4x256xf32>
    %cst_522 = arith.constant 0.000000e+00 : f32
    %631 = vector.broadcast %cst_522 : f32 to vector<4x256xf32>
    %632 = arith.select %514, %630, %631 : vector<4x256xi1>, vector<4x256xf32>
    %c7_523 = arith.constant 7 : index
    %c7_524 = arith.constant 7 : index
    %c0_525 = arith.constant 0 : index
    %c0_526 = arith.constant 0 : index
    %633 = vector.load %arg2[%c7_523, %c7_524, %c0_525, %c0_526] : memref<8x9x4x4xf32, #tpu.memory_space<vmem>>, vector<1x1x4x4xf32>
    %634 = vector.shape_cast %633 : vector<1x1x4x4xf32> to vector<4x4xf32>
    %cst_527 = arith.constant dense<0.000000e+00> : vector<4x256xf32>
    %635 = tpu.matmul %634, %632, %cst_527 {dimension_numbers = #tpu.dot_dimension_numbers<[1], [0], [0], [1], [0, 0, 1, 1], [], []>} : vector<4x4xf32>, vector<4x256xf32>, vector<4x256xf32> -> vector<4x256xf32>
    %636 = arith.addf %629, %635 : vector<4x256xf32>
    %c120_i32_528 = arith.constant 120 : i32
    %637 = tpu.dynamic_rotate %584 by %c120_i32_528 dim 1 : vector<4x256xf32>, i32 -> vector<4x256xf32>
    %cst_529 = arith.constant 0.000000e+00 : f32
    %638 = vector.broadcast %cst_529 : f32 to vector<4x256xf32>
    %639 = arith.select %519, %637, %638 : vector<4x256xi1>, vector<4x256xf32>
    %c7_530 = arith.constant 7 : index
    %c8_531 = arith.constant 8 : index
    %c0_532 = arith.constant 0 : index
    %c0_533 = arith.constant 0 : index
    %640 = vector.load %arg2[%c7_530, %c8_531, %c0_532, %c0_533] : memref<8x9x4x4xf32, #tpu.memory_space<vmem>>, vector<1x1x4x4xf32>
    %641 = vector.shape_cast %640 : vector<1x1x4x4xf32> to vector<4x4xf32>
    %cst_534 = arith.constant dense<0.000000e+00> : vector<4x256xf32>
    %642 = tpu.matmul %641, %639, %cst_534 {dimension_numbers = #tpu.dot_dimension_numbers<[1], [0], [0], [1], [0, 0, 1, 1], [], []>} : vector<4x4xf32>, vector<4x256xf32>, vector<4x256xf32> -> vector<4x256xf32>
    %643 = arith.addf %636, %642 : vector<4x256xf32>
    %c7_535 = arith.constant 7 : index
    %c0_536 = arith.constant 0 : index
    %c0_537 = arith.constant 0 : index
    %644 = vector.load %arg3[%c7_535, %c0_536, %c0_537] : memref<8x4x1xf32, #tpu.memory_space<vmem>>, vector<1x4x1xf32>
    %645 = vector.shape_cast %644 : vector<1x4x1xf32> to vector<4x1xf32>
    %646 = vector.broadcast %645 : vector<4x1xf32> to vector<4x256xf32>
    %647 = arith.addf %643, %646 : vector<4x256xf32>
    %648 = arith.addf %647, %491 : vector<4x256xf32>
    %cst_538 = arith.constant 0.000000e+00 : f32
    %649 = vector.broadcast %cst_538 : f32 to vector<4x256xf32>
    %650 = arith.maximumf %648, %649 : vector<4x256xf32>
    %651 = tpu.concatenate %650, %6 in 0 : vector<4x256xf32>, vector<4x256xf32> -> vector<8x256xf32>
    %c1_539 = arith.constant 1 : index
    %c0_540 = arith.constant 0 : index
    %c0_541 = arith.constant 0 : index
    %652 = vector.load %arg4[%c1_539, %c0_540, %c0_541] : memref<2x4x8xf32, #tpu.memory_space<vmem>>, vector<1x4x8xf32>
    %653 = vector.shape_cast %652 : vector<1x4x8xf32> to vector<4x8xf32>
    %cst_542 = arith.constant dense<0.000000e+00> : vector<4x256xf32>
    %654 = tpu.matmul %653, %651, %cst_542 {dimension_numbers = #tpu.dot_dimension_numbers<[1], [0], [0], [1], [0, 0, 1, 1], [], []>} : vector<4x8xf32>, vector<8x256xf32>, vector<4x256xf32> -> vector<4x256xf32>
    %c1_543 = arith.constant 1 : index
    %c0_544 = arith.constant 0 : index
    %c0_545 = arith.constant 0 : index
    %655 = vector.load %arg5[%c1_543, %c0_544, %c0_545] : memref<2x4x1xf32, #tpu.memory_space<vmem>>, vector<1x4x1xf32>
    %656 = vector.shape_cast %655 : vector<1x4x1xf32> to vector<4x1xf32>
    %657 = vector.broadcast %656 : vector<4x1xf32> to vector<4x256xf32>
    %658 = arith.addf %654, %657 : vector<4x256xf32>
    %c0_546 = arith.constant 0 : index
    %c0_547 = arith.constant 0 : index
    %c0_548 = arith.constant 0 : index
    %659 = vector.load %arg6[%c0_546, %c0_547, %c0_548] : memref<1x4x256xf32, #tpu.memory_space<vmem>>, vector<1x4x256xf32>
    %660 = vector.shape_cast %659 : vector<1x4x256xf32> to vector<4x256xf32>
    %661 = vector.shape_cast %658 : vector<4x256xf32> to vector<1x4x256xf32>
    tpu.vector_store %arg6[%c0_546, %c0_547, %c0_548], %661 {strides = array<i32>} : memref<1x4x256xf32, #tpu.memory_space<vmem>>, vector<1x4x256xf32>,
    return
  }
  func.func @transform_0(%arg0: i32) -> (i32, i32, i32) {
    %c0_i32 = arith.constant 0 : i32
    %c0_i32_0 = arith.constant 0 : i32
    %c0_i32_1 = arith.constant 0 : i32
    return %arg0, %c0_i32, %c0_i32_0 : i32, i32, i32
  }
  func.func @transform_1(%arg0: i32) -> (i32, i32, i32, i32) {
    %c0_i32 = arith.constant 0 : i32
    %c0_i32_0 = arith.constant 0 : i32
    %c0_i32_1 = arith.constant 0 : i32
    %c0_i32_2 = arith.constant 0 : i32
    %c0_i32_3 = arith.constant 0 : i32
    return %c0_i32, %c0_i32_0, %c0_i32_1, %c0_i32_2 : i32, i32, i32, i32
  }
  func.func @transform_2(%arg0: i32) -> (i32, i32, i32) {
    %c0_i32 = arith.constant 0 : i32
    %c0_i32_0 = arith.constant 0 : i32
    %c0_i32_1 = arith.constant 0 : i32
    %c0_i32_2 = arith.constant 0 : i32
    return %c0_i32, %c0_i32_0, %c0_i32_1 : i32, i32, i32
  }
  func.func @transform_3(%arg0: i32) -> (i32, i32, i32) {
    %c0_i32 = arith.constant 0 : i32
    %c0_i32_0 = arith.constant 0 : i32
    %c0_i32_1 = arith.constant 0 : i32
    %c0_i32_2 = arith.constant 0 : i32
    return %c0_i32, %c0_i32_0, %c0_i32_1 : i32, i32, i32
  }
  func.func @transform_4(%arg0: i32) -> (i32, i32, i32) {
    %c0_i32 = arith.constant 0 : i32
    %c0_i32_0 = arith.constant 0 : i32
    %c0_i32_1 = arith.constant 0 : i32
    %c0_i32_2 = arith.constant 0 : i32
    return %c0_i32, %c0_i32_0, %c0_i32_1 : i32, i32, i32
  }
  func.func @transform_5(%arg0: i32) -> (i32, i32, i32) {
    %c0_i32 = arith.constant 0 : i32
    %c0_i32_0 = arith.constant 0 : i32
    %c0_i32_1 = arith.constant 0 : i32
    return %arg0, %c0_i32, %c0_i32_0 : i32, i32, i32
  }
}

</mosaic_0001>

<bundles_post_ra>
// kernel: a_call__.1
= control target key start
LH: loop header
LB: loop body
LE: loop exit
PB: predicated region body
PF: predicated region fallthrough
CT: control target
= control target key end

     0   :  { %10 = vsyncpa [#allocation3], 0  ;;  %s5311_s18 = smov 0   ;;  %s6390_s0 = inlined_call_operand.vmem [shape: f32[2,4,256], index: 0, kind: input, shape index: {}]   ;;  %s6391_s1 = inlined_call_operand.hbm [shape: f32[8,9,4,4], index: 1, kind: input, shape index: {}]   ;;  %s6392_s2 = inlined_call_operand.vmem [shape: f32[8,4,1], index: 2, kind: input, shape index: {}]   ;;  %s6393_s3 = inlined_call_operand.vmem [shape: f32[2,4,8], index: 3, kind: input, shape index: {}]   ;;  %s6394_s4 = inlined_call_operand.vmem [shape: f32[2,4,1], index: 4, kind: input, shape index: {}]   ;;  %s6395_s5 = inlined_call_operand.vmem [shape: f32[2,4,256], index: 5, kind: output, shape index: {}]  }
   0x1 LB: > { %s168_s21 = sshll.u32 %s6391_s1, 4  ;;  %s4858_s22 = sadd.s32 4294967295, %s5251_s18   ;;  %s5251_s18 = sphi %s5311_s18, %s16_s18   ;;  %s169_s21 = int_to_ptr.hbm [resolvable:$true] %s168_s21 }
   0x2   : > { %p4860_p0 = scmp.ge.s32.totalorder %s5251_s18, 1  ;;  %p157_p1 = scmp.lt.s32.totalorder %s5251_s18, 3 }
   0x3   : > { %p5170_p2 = scmp.eq.s32.totalorder %s4858_s22, 0  ;;  %s5253_s23 = smov [#allocation2]  }
   0x4   : > { %p158_p3 = pnand %p4860_p0, %p157_p1  ;;  %s170_s24 = sshll.u32 %s5253_s23, 4  ;;  %s171_s24 = int_to_ptr.vmem [resolvable:$true] %s170_s24 }
   0x5   : > { %s5254_s25 = smov 64   ;;  %s5255_s26 = smov 4  }
   0x6   : > { %p5166_p4 = pneg %p158_p3  ;;  %203 = sbr.rel (%p158_p3) target bundleno = 2627 (0xa43), region = 40 }
   0x8   : > { %p5167_p5 = pnand %p5170_p2, %p5166_p4 }
   0xa   : > { %5169 = dma.hbm_to_vmem [thread:$0]  (!%p5167_p5), %s169_s21, 4608, %s171_s24, [#allocation3], %s5254_s25, %s5254_s25, %s5255_s26  }
   0xb   : > { %5246 = dma.done.wait (%p5170_p2), [#allocation3], 4608  }
   0xc   : > { %5248 = vsyncadd (%p5170_p2), [#allocation3], 4294962688  ;;  %p232_p6 = scmp.lt.s32.totalorder %s4858_s22, 1  ;;  %s5256_s6 = smov 17   ;;  %v242_v19 = vlaneseq  ;;  %vm302_vm5 = vcmask 1043456   ;;  %vm298_vm6 = vcmask 31744  }
   0xd   : > { %s5257_s7 = smov 16   ;;  %s5258_s8 = smov 15   ;;  %v281_v31 = vld [vmem:[#allocation2] sm:$0xf]  ;;  %v297_v40 = vld [vmem:[#allocation2 + $0x4] sm:$0xf] }
   0xe   : > { %s6448_s22 = smov (!%p232_p6, %s4858_s22), 1  ;;  %s5259_s9 = smov 1   ;;  %v5362_v20 = vand.u32 127, %v242_v19  ;;  %v413_v48 = vld [vmem:[#allocation2 + $0x8] sm:$0xf]  ;;  %v5264_v57 = vmov 0  }
   0xf   : > { %s5160_s27 = sshll.u32 %s6448_s22, 3  ;;  %s5260_s10 = smov 127   ;;  %v480_v51 = vld [vmem:[#allocation2 + $0xc] sm:$0xf]  ;;  %v533_v54 = vld [vmem:[#allocation2 + $0x10] sm:$0xf]  ;;  %5208 = vset.pattern.permute.xlu1 %v5264_v57  ;;  %5209 = vset.pattern.permute.xlu0 %v5264_v57 }
  0x10   : > { %s236_s30 = scalar_lea.vmem %s6390_s0, %s5160_s27  ;;  %s5261_s11 = smov 113   ;;  %v5365_v21 = vadd.s32 128, %v5362_v20  ;;  %v5368_v23 = vshrl.u32 %v5362_v20, 4  ;;  %v5371_v24 = vand.u32 15, %v5362_v20  ;;  %vm276_vm2 = vcmp.lt.s32.totalorder %v5362_v20, 17  ;;  %5210 = vset.pattern.permute.xlu2 %v5264_v57 }
  0x11   : > { %v5330_v0 = vld [vmem:[%s236_s30] sm:$0xff]  ;;  %s5262_s12 = smov 112   ;;  %s5263_s13 = smov 111   ;;  %vm407_vm7 = vcmp.lt.s32.totalorder %v5362_v20, 15  ;;  %vm291_vm9 = vcmp.lt.s32.totalorder %v5362_v20, 16  ;;  %vm6397_vm12 = vcmp.lt.s32.totalorder %v5362_v20, 1 }
  0x12   : > { %267 = vst [vmem:[#allocation1] ss:$2 sm:$0xff] %v5330_v0  ;;  %v5374_v26 = vand.u32 15, %v5365_v21  ;;  %vm250_vm0 = vcmp.ge.s32.totalorder %v5368_v23, 1  ;;  %vm6398_vm1 = vcmp.ge.s32.totalorder %v5371_v24, 1  ;;  %vm256_vm8 = vcmp.lt.s32.totalorder %v5371_v24, 15 }
  0x13   : > { %vm5384_vm4 = vmand %vm250_vm0, %vm6398_vm1  ;;  %v854_v56 = vld [vmem:[%s6392_s2] sm:$0xf]  ;;  %vm6396_vm13 = vcmp.lt.s32.totalorder %v5362_v20, 127  ;;  %v5458_v59 = vshrl.u32 %v5365_v21, 4  ;;  %v601_v62 = vld [vmem:[#allocation2 + $0x14] sm:$0xf] }
  0x14   : > { %vm253_vm3 = vcmp.ge.s32.totalorder %v5374_v26, 1  ;;  %vm257_vm10 = vcmp.lt.s32.totalorder %v5374_v26, 15  ;;  %vm5412_vm11 = vmand %vm250_vm0, %vm256_vm8  ;;  %vm6399_vm15 = vcmp.lt.s32.totalorder %v5362_v20, 113  ;;  %v4941_v38 = vld [vmem:[%s6392_s2 + $0x4] sm:$0xf]  ;;  %s5265_s19 = smov 2  }
  0x15   : > { %vm261_vm14 = vcmp.lt.s32.totalorder %v5458_v59, 15  ;;  %s5266_s20 = smov 34   ;;  %s5267_s21 = smov 32  }
  0x16   : > { %s5268_s23 = smov 30   ;;  %s5269_s24 = smov 98  }
  0x17   : > { %s5270_s25 = smov 126   ;;  %s5271_s26 = smov 96  }
  0x18   : > { %s5272_s30 = smov 94  }
  0x19   : > { %v268_v1 = vld.sshfl [vmem:[#allocation1] sm:$0xff pattern:$0x75316420]  ;;  %v269_v2 = vld.sshfl [vmem:[#allocation1 + $0x8] sm:$0xff pattern:$0x75316420] }
  0x1a   : > { %272 = vrot.lane.b32.xlu0 %v268_v1, %s5256_s6  ;;  %282 = vst [vmem:[#allocation1] ss:$2 sm:$0xff] %v5330_v0 }
  0x21   : > { %v283_v3 = vld.sshfl [vmem:[#allocation1] sm:$0xff pattern:$0x75316420]  ;;  %v284_v4 = vld.sshfl [vmem:[#allocation1 + $0x8] sm:$0xff pattern:$0x75316420] }
  0x22   : > { %287 = vrot.lane.b32.xlu1 %v283_v3, %s5257_s7  ;;  %274 = vrot.lane.b32.xlu0 %v269_v2, %s5256_s6  ;;  %398 = vst [vmem:[#allocation1] ss:$2 sm:$0xff] %v5330_v0 }
  0x29   : > { %v399_v5 = vld.sshfl [vmem:[#allocation1] sm:$0xff pattern:$0x75316420]  ;;  %v400_v6 = vld.sshfl [vmem:[#allocation1 + $0x8] sm:$0xff pattern:$0x75316420] }
  0x2a   : > { %289 = vrot.lane.b32.xlu1 %v284_v4, %s5257_s7  ;;  %465 = vst [vmem:[#allocation1] ss:$2 sm:$0xff] %v5330_v0  ;;  %403 = vrot.lane.b32.xlu2 %v399_v5, %s5258_s8 }
  0x31   : > { %v467_v7 = vld.sshfl [vmem:[#allocation1 + $0x8] sm:$0xff pattern:$0x75316420]  ;;  %v466_v8 = vld.sshfl [vmem:[#allocation1] sm:$0xff pattern:$0x75316420] }
  0x32   : > { %472 = vrot.lane.b32.xlu1 %v467_v7, %s5259_s9  ;;  %470 = vrot.lane.b32.xlu0 %v466_v8, %s5259_s9  ;;  %534 = vst [vmem:[#allocation1] ss:$2 sm:$0xff] %v5330_v0  ;;  %v668_v7 = vld [vmem:[#allocation2 + $0x18] sm:$0xf] }
  0x33   : > { %405 = vrot.lane.b32.xlu2 %v400_v6, %s5258_s8 }
  0x39   : > { %v5345_v9 = vld.sshfl [vmem:[#allocation1] sm:$0xff pattern:$0x75316420]  ;;  %v5347_v10 = vld.sshfl [vmem:[#allocation1 + $0x8] sm:$0xff pattern:$0x75316420] }
  0x3a   : > { %586 = vst [vmem:[#allocation1] ss:$2 sm:$0xff] %v5330_v0 }
  0x41   : > { %v588_v11 = vld.sshfl [vmem:[#allocation1 + $0x8] sm:$0xff pattern:$0x75316420]  ;;  %v587_v12 = vld.sshfl [vmem:[#allocation1] sm:$0xff pattern:$0x75316420] }
  0x42   : > { %593 = vrot.lane.b32.xlu0 %v588_v11, %s5260_s10  ;;  %653 = vst [vmem:[#allocation1] ss:$2 sm:$0xff] %v5330_v0  ;;  %591 = vrot.lane.b32.xlu2 %v587_v12, %s5260_s10  ;;  %v735_v12 = vld [vmem:[#allocation2 + $0x1c] sm:$0xf] }
  0x49   : > { %v655_v13 = vld.sshfl [vmem:[#allocation1 + $0x8] sm:$0xff pattern:$0x75316420]  ;;  %v654_v14 = vld.sshfl [vmem:[#allocation1] sm:$0xff pattern:$0x75316420] }
  0x4a   : > { %658 = vrot.lane.b32.xlu1 %v654_v14, %s5261_s11  ;;  %720 = vst [vmem:[#allocation1] ss:$2 sm:$0xff] %v5330_v0  ;;  %660 = vrot.lane.b32.xlu2 %v655_v13, %s5261_s11 }
  0x51   : > { %v722_v15 = vld.sshfl [vmem:[#allocation1 + $0x8] sm:$0xff pattern:$0x75316420]  ;;  %v721_v16 = vld.sshfl [vmem:[#allocation1] sm:$0xff pattern:$0x75316420] }
  0x52   : > { %727 = vrot.lane.b32.xlu1 %v722_v15, %s5262_s12  ;;  %725 = vrot.lane.b32.xlu0 %v721_v16, %s5262_s12  ;;  %787 = vst [vmem:[#allocation1] ss:$2 sm:$0xff] %v5330_v0 }
  0x59   : > { %v789_v17 = vld.sshfl [vmem:[#allocation1 + $0x8] sm:$0xff pattern:$0x75316420]  ;;  %v788_v18 = vld.sshfl [vmem:[#allocation1] sm:$0xff pattern:$0x75316420] }
  0x5a   : > { %794 = vrot.lane.b32.xlu0 %v789_v17, %s5263_s13  ;;  %792 = vrot.lane.b32.xlu2 %v788_v18, %s5263_s13  ;;  %1410 = vst [vmem:[#allocation1] ss:$2 sm:$0xff] %v5330_v0 }
  0x5b   : > { %857 = vperm.xlu1 %5208, %v854_v56  }
  0x84   : > { %v404_v25 = vpop.permute.xlu2 %403 }
  0x8c   : > { %v273_v22 = vpop.permute.xlu0 %272 }
  0x8d   : > { %v406_v35 = vpop.permute.xlu2 %405 }
  0x8e   : > { %v408_v36 = vsel %vm407_vm7, %v404_v25, %v406_v35  ;;  %v409_v37 = vsel %vm407_vm7, %v406_v35, %v404_v25 }
  0x8f   : > { %v411_v43 = vsel %vm257_vm10, %v408_v36, 0.0  ;;  %v410_v45 = vsel %vm5412_vm11, %v409_v37, 0.0 }
  0x94   : > { %v288_v28 = vpop.permute.xlu1 %287  ;;  %v275_v29 = vpop.permute.xlu0 %274 }
  0x95   : > { %v277_v30 = vsel %vm276_vm2, %v273_v22, %v275_v29  ;;  %v278_v32 = vsel %vm276_vm2, %v275_v29, %v273_v22  ;;  %v802_v22 = vld [vmem:[#allocation2 + $0x20] sm:$0xf] }
  0x96   : > { %v280_v33 = vsel %vm253_vm3, %v277_v30, 0.0  ;;  %v279_v34 = vsel %vm5384_vm4, %v278_v32, 0.0 }
  0x97   : > { %4875 = vmatpush.msk.msra.mxu3 %vm302_vm5, %v280_v33  ;;  %4873 = vmatpush.msk.msra.mxu2 %vm302_vm5, %v279_v34 }
  0x98   : > { %4876 = vmatmul.msk.f32.vlgmr.msra.gmra.mxu3 %vm298_vm6, %v281_v31  ;;  %4874 = vmatmul.msk.f32.vlgmr.msra.gmra.mxu2 %vm298_vm6, %v281_v31 }
  0x9c   : > { %v290_v39 = vpop.permute.xlu1 %289  ;;  %v592_v55 = vpop.permute.xlu2 %591 }
  0x9d   : > { %v292_v41 = vsel %vm291_vm9, %v288_v28, %v290_v39  ;;  %v293_v42 = vsel %vm291_vm9, %v290_v39, %v288_v28 }
  0x9e   : > { %4871 = vmatpush.msk.msra.mxu1 %vm302_vm5, %v292_v41  ;;  %v294_v44 = vsel %vm250_vm0, %v293_v42, 0.0 }
  0x9f   : > { %4872 = vmatmul.msk.f32.vlgmr.msra.gmra.mxu1 %vm298_vm6, %v297_v40  ;;  %4869 = vmatpush.msk.msra.mxu0 %vm302_vm5, %v294_v44 }
  0xa0   : > { %4870 = vmatmul.msk.f32.vlgmr.msra.gmra.mxu0 %vm298_vm6, %v297_v40  ;;  %4879 = vmatpush.msk.msrb.mxu1 %vm302_vm5, %v411_v43 }
  0xa1   : > { %4877 = vmatpush.msk.msrb.mxu0 %vm302_vm5, %v410_v45 }
  0xa2   : > { %4887 = vmatpush.msk.msra.mxu1 %vm302_vm5, %v5347_v10 }
  0xa3   : > { %4885 = vmatpush.msk.msra.mxu0 %vm302_vm5, %v5345_v9 }
  0xa4   : > { %v473_v46 = vpop.permute.xlu1 %472  ;;  %v471_v47 = vpop.permute.xlu0 %470 }
  0xa5   : > { %v475_v49 = vsel %vm6397_vm12, %v471_v47, %v473_v46  ;;  %v476_v50 = vsel %vm6397_vm12, %v473_v46, %v471_v47  ;;  %v661_v2 = vpop.permute.xlu2 %660  ;;  %vm729_vm12 = vcmp.lt.s32.totalorder %v5362_v20, 112 }
  0xa6   : > { %v478_v52 = vsel %vm253_vm3, %v475_v49, 0.0  ;;  %v477_v53 = vsel %vm6398_vm1, %v476_v50, 0.0 }
  0xa7   : > { %4883 = vmatpush.msk.msrb.mxu3 %vm302_vm5, %v478_v52  ;;  %4880 = vmatmul.msk.f32.vlgmr.msrb.gmra.mxu1 %vm298_vm6, %v413_v48 }
  0xa8   : > { %4884 = vmatmul.msk.f32.vlgmr.msrb.gmra.mxu3 %vm298_vm6, %v480_v51  ;;  %4881 = vmatpush.msk.msrb.mxu2 %vm302_vm5, %v477_v53 }
  0xa9   : > { %4878 = vmatmul.msk.f32.vlgmr.msrb.gmra.mxu0 %vm298_vm6, %v413_v48  ;;  %4882 = vmatmul.msk.f32.vlgmr.msrb.gmra.mxu2 %vm298_vm6, %v480_v51 }
  0xaf   : > { %4888 = vmatmul.msk.f32.vlgmr.msra.gmra.mxu1 %vm298_vm6, %v533_v54 }
  0xb1   : > { %4886 = vmatmul.msk.f32.vlgmr.msra.gmra.mxu0 %vm298_vm6, %v533_v54 }
  0xb4   : > { %v594_v58 = vpop.permute.xlu0 %593  ;;  %v793_v16 = vpop.permute.xlu2 %792 }
  0xb5   : > { %v596_v60 = vsel %vm6396_vm13, %v592_v55, %v594_v58  ;;  %v597_v61 = vsel %vm6396_vm13, %v594_v58, %v592_v55  ;;  %vm5478_vm13 = vmand %vm261_vm14, %vm253_vm3 }
  0xb6   : > { %v598_v63 = vsel %vm256_vm8, %v596_v60, 0.0  ;;  %v599_v1 = vsel %vm257_vm10, %v597_v61, 0.0 }
  0xb7   : > { %4889 = vmatpush.msk.msra.mxu2 %vm302_vm5, %v598_v63  ;;  %4891 = vmatpush.msk.msra.mxu3 %vm302_vm5, %v599_v1 }
  0xb8   : > { %4890 = vmatmul.msk.f32.vlgmr.msra.gmra.mxu2 %vm298_vm6, %v601_v62  ;;  %4892 = vmatmul.msk.f32.vlgmr.msra.gmra.mxu3 %vm298_vm6, %v601_v62 }
  0xbc   : > { %v659_v4 = vpop.permute.xlu1 %658 }
  0xbd   : > { %v663_v5 = vsel %vm6399_vm15, %v659_v4, %v661_v2  ;;  %v664_v6 = vsel %vm6399_vm15, %v661_v2, %v659_v4  ;;  %vm5510_vm15 = vmand %vm261_vm14, %vm257_vm10 }
  0xbe   : > { %v665_v8 = vsel %vm6398_vm1, %v663_v5, 0.0  ;;  %v666_v9 = vsel %vm5478_vm13, %v664_v6, 0.0  ;;  %vm796_vm1 = vcmp.lt.s32.totalorder %v5362_v20, 111 }
  0xbf   : > { %4893 = vmatpush.msk.msrb.mxu0 %vm302_vm5, %v665_v8  ;;  %4895 = vmatpush.msk.msrb.mxu1 %vm302_vm5, %v666_v9 }
  0xc0   : > { %4894 = vmatmul.msk.f32.vlgmr.msrb.gmra.mxu0 %vm298_vm6, %v668_v7  ;;  %4896 = vmatmul.msk.f32.vlgmr.msrb.gmra.mxu1 %vm298_vm6, %v668_v7 }
  0xc4   : > { %v728_v10 = vpop.permute.xlu1 %727  ;;  %v726_v11 = vpop.permute.xlu0 %725 }
  0xc5   : > { %v730_v13 = vsel %vm729_vm12, %v726_v11, %v728_v10  ;;  %v731_v14 = vsel %vm729_vm12, %v728_v10, %v726_v11 }
  0xc6   : > { %v733_v15 = vsel %vm261_vm14, %v731_v14, 0.0  ;;  %4897 = vmatpush.msk.msrb.mxu2 %vm302_vm5, %v730_v13 }
  0xc7   : > { %4898 = vmatmul.msk.f32.vlgmr.msrb.gmra.mxu2 %vm298_vm6, %v735_v12  ;;  %4899 = vmatpush.msk.msrb.mxu3 %vm302_vm5, %v733_v15 }
  0xc8   : > { %4900 = vmatmul.msk.f32.vlgmr.msrb.gmra.mxu3 %vm298_vm6, %v735_v12  ;;  %v883_v12 = vld [vmem:[#allocation2 + $0x28] sm:$0xf] }
  0xcc   : > { %v795_v18 = vpop.permute.xlu0 %794 }
  0xcd   : > { %v797_v19 = vsel %vm796_vm1, %v793_v16, %v795_v18  ;;  %v798_v21 = vsel %vm796_vm1, %v795_v18, %v793_v16  ;;  %v858_v61 = vpop.permute.xlu1 %857 }
  0xce   : > { %v799_v25 = vsel %vm256_vm8, %v797_v19, 0.0  ;;  %v800_v28 = vsel %vm5510_vm15, %v798_v21, 0.0 }
  0xcf   : > { %4901 = vmatpush.msk.msra.mxu0 %vm302_vm5, %v799_v25  ;;  %4903 = vmatpush.msk.msra.mxu1 %vm302_vm5, %v800_v28 }
  0xd0   : > { %4902 = vmatmul.msk.f32.vlgmr.msra.gmra.mxu0 %vm298_vm6, %v802_v22  ;;  %4904 = vmatmul.msk.f32.vlgmr.msra.gmra.mxu1 %vm298_vm6, %v802_v22 }
 0x11b   : > { %v375_v31 = vpop.f32.mrf.mxu2  ;;  %v395_v32 = vpop.f32.mrf.mxu3 }
 0x11c   : > { %v346_v30 = vpop.f32.mrf.mxu1 }
 0x11d   : > { %v326_v29 = vpop.f32.mrf.mxu0  ;;  %v396_v36 = vadd.f32 %v395_v32, %v346_v30  ;;  %v873_v32 = vld [vmem:[#allocation2 + $0x24] sm:$0xf] }
 0x11e   : > { %v376_v35 = vadd.f32 %v375_v31, %v326_v29  ;;  %v991_v31 = vld [vmem:[#allocation2 + $0x2c] sm:$0xf] }
 0x124   : > { %v460_v34 = vpop.f32.mrf.mxu1 }
 0x125   : > { %v464_v42 = vadd.f32 %v460_v34, %v396_v36 }
 0x126   : > { %v440_v33 = vpop.f32.mrf.mxu0 }
 0x127   : > { %v463_v39 = vadd.f32 %v440_v33, %v376_v35 }
 0x12b   : > { %v527_v40 = vpop.f32.mrf.mxu3 }
 0x12c   : > { %v507_v37 = vpop.f32.mrf.mxu2  ;;  %v581_v43 = vpop.f32.mrf.mxu1  ;;  %v531_v45 = vadd.f32 %v527_v40, %v464_v42  ;;  %v1105_v42 = vld [vmem:[#allocation2 + $0x34] sm:$0xf] }
 0x12d   : > { %v530_v44 = vadd.f32 %v507_v37, %v463_v39 }
 0x12e   : > { %v561_v41 = vpop.f32.mrf.mxu0  ;;  %v585_v49 = vadd.f32 %v581_v43, %v531_v45 }
 0x12f   : > { %v584_v47 = vadd.f32 %v561_v41, %v530_v44 }
 0x13b   : > { %v628_v46 = vpop.f32.mrf.mxu2  ;;  %v648_v48 = vpop.f32.mrf.mxu3 }
 0x13c   : > { %v651_v50 = vadd.f32 %v628_v46, %v584_v47  ;;  %v652_v53 = vadd.f32 %v648_v48, %v585_v49  ;;  %v1052_v47 = vld [vmem:[#allocation2 + $0x30] sm:$0xf] }
 0x13d   : > { %v695_v51 = vpop.f32.mrf.mxu0  ;;  %v715_v52 = vpop.f32.mrf.mxu1 }
 0x13e   : > { %v718_v54 = vadd.f32 %v695_v51, %v651_v50  ;;  %v719_v55 = vadd.f32 %v715_v52, %v652_v53  ;;  %v1227_v52 = vld [vmem:[#allocation2 + $0x3c] sm:$0xf] }
 0x14a   : > { %v762_v56 = vpop.f32.mrf.mxu2 }
 0x14b   : > { %v785_v57 = vadd.f32 %v762_v56, %v718_v54  ;;  %v782_v58 = vpop.f32.mrf.mxu3 }
 0x14c   : > { %v786_v60 = vadd.f32 %v782_v58, %v719_v55  ;;  %v1166_v55 = vld [vmem:[#allocation2 + $0x38] sm:$0xf] }
 0x14d   : > { %v829_v62 = vpop.f32.mrf.mxu0  ;;  %v849_v63 = vpop.f32.mrf.mxu1 }
 0x14e   : > { %v852_v1 = vadd.f32 %v829_v62, %v785_v57  ;;  %v853_v2 = vadd.f32 %v849_v63, %v786_v60 }
 0x150   : > { %v860_v4 = vadd.f32 %v858_v61, %v852_v1  ;;  %v861_v5 = vadd.f32 %v858_v61, %v853_v2  ;;  %v1288_v1 = vld [vmem:[#allocation2 + $0x40] sm:$0xf] }
 0x152   : > { %v862_v6 = vmax.f32 %v860_v4, 0.0  ;;  %v863_v7 = vmax.f32 %v861_v5, 0.0 }
 0x154   : > { %876 = vrot.lane.b32.xlu0 %v863_v7, %s5257_s7  ;;  %982 = vrot.lane.b32.xlu1 %v862_v6, %s5258_s8 }
 0x155   : > { %874 = vrot.lane.b32.xlu2 %v862_v6, %s5257_s7 }
 0x15c   : > { %864 = vrot.lane.b32.xlu0 %v862_v6, %s5256_s6  ;;  %866 = vrot.lane.b32.xlu1 %v863_v7, %s5256_s6 }
 0x15d   : > { %984 = vrot.lane.b32.xlu2 %v863_v7, %s5258_s8  ;;  %s5273_s8 = smov 64  }
 0x164   : > { %1045 = vrot.lane.b32.xlu0 %v863_v7, %s5259_s9  ;;  %1218 = vrot.lane.b32.xlu1 %v862_v6, %s5261_s11 }
 0x165   : > { %1043 = vrot.lane.b32.xlu2 %v862_v6, %s5259_s9  ;;  %s5274_s9 = smov 68  }
 0x16c   : > { %1157 = vrot.lane.b32.xlu0 %v862_v6, %s5260_s10  ;;  %1159 = vrot.lane.b32.xlu1 %v863_v7, %s5260_s10  ;;  %s5275_s10 = smov 60  }
 0x16d   : > { %1220 = vrot.lane.b32.xlu2 %v863_v7, %s5261_s11  ;;  %s5276_s11 = smov 124  }
 0x174   : > { %1342 = vrot.lane.b32.xlu0 %v863_v7, %s5263_s13  ;;  %1279 = vrot.lane.b32.xlu1 %v862_v6, %s5262_s12 }
 0x175   : > { %1340 = vrot.lane.b32.xlu2 %v862_v6, %s5263_s13 }
 0x17c   : > { %1405 = vperm.xlu0 %5209, %v4941_v38  }
 0x17d   : > { %1281 = vrot.lane.b32.xlu2 %v863_v7, %s5262_s12  ;;  %s5277_s12 = smov 4  }
 0x1af   : > { %v875_v8 = vpop.permute.xlu2 %874 }
 0x1b7   : > { %v985_v9 = vpop.permute.xlu2 %984 }
 0x1bf   : > { %v1044_v13 = vpop.permute.xlu2 %1043 }
 0x1c6   : > { %v877_v10 = vpop.permute.xlu0 %876  ;;  %v983_v11 = vpop.permute.xlu1 %982 }
 0x1c7   : > { %v878_v14 = vsel %vm291_vm9, %v875_v8, %v877_v10  ;;  %v879_v15 = vsel %vm291_vm9, %v877_v10, %v875_v8  ;;  %v986_v16 = vsel %vm407_vm7, %v983_v11, %v985_v9  ;;  %v987_v18 = vsel %vm407_vm7, %v985_v9, %v983_v11  ;;  %v1221_v35 = vpop.permute.xlu2 %1220  ;;  %v1411_v10 = vld.sshfl [vmem:[#allocation1] sm:$0xff pattern:$0x75316420]  ;;  %v1412_v11 = vld.sshfl [vmem:[#allocation1 + $0x8] sm:$0xff pattern:$0x75316420] }
 0x1c8   : > { %v880_v19 = vsel %vm250_vm0, %v879_v15, 0.0  ;;  %v988_v21 = vsel %vm5412_vm11, %v987_v18, 0.0  ;;  %v989_v22 = vsel %vm257_vm10, %v986_v16, 0.0  ;;  %4907 = vmatpush.msk.msra.mxu3 %vm302_vm5, %v878_v14  ;;  %vm6413_vm0 = vcmp.lt.s32.totalorder %v5362_v20, 1  ;;  %4726 = vst [vmem:[#allocation1 + $0x1] ss:$2 sm:$0xff] %v5330_v0 }
 0x1c9   : > { %4905 = vmatpush.msk.msra.mxu2 %vm302_vm5, %v880_v19  ;;  %4908 = vmatmul.msk.f32.vlgmr.msra.gmra.mxu3 %vm298_vm6, %v883_v12  ;;  %vm6417_vm9 = vcmp.ge.s32.totalorder %v5371_v24, 1 }
 0x1ca   : > { %4915 = vmatpush.msk.msrb.mxu3 %vm302_vm5, %v989_v22  ;;  %4906 = vmatmul.msk.f32.vlgmr.msra.gmra.mxu2 %vm298_vm6, %v883_v12  ;;  %vm6418_vm11 = vmmov %vm6417_vm9 }
 0x1cb   : > { %4913 = vmatpush.msk.msrb.mxu2 %vm302_vm5, %v988_v21 }
 0x1cc   : > { %4923 = vmatpush.msk.msra.mxu3 %vm302_vm5, %v863_v7 }
 0x1cd   : > { %4921 = vmatpush.msk.msra.mxu2 %vm302_vm5, %v862_v6  ;;  %v1349_v6 = vld [vmem:[#allocation2 + $0x44] sm:$0xf] }
 0x1ce   : > { %v865_v25 = vpop.permute.xlu0 %864  ;;  %v867_v28 = vpop.permute.xlu1 %866 }
 0x1cf   : > { %v868_v29 = vsel %vm276_vm2, %v865_v25, %v867_v28  ;;  %v869_v30 = vsel %vm276_vm2, %v867_v28, %v865_v25  ;;  %vm6414_vm2 = vmmov %vm6413_vm0  ;;  %v1341_v48 = vpop.permute.xlu2 %1340 }
 0x1d0   : > { %v870_v33 = vsel %vm5384_vm4, %v869_v30, 0.0  ;;  %v871_v34 = vsel %vm253_vm3, %v868_v29, 0.0  ;;  %vm6415_vm4 = vcmp.lt.s32.totalorder %v5362_v20, 113 }
 0x1d1   : > { %4909 = vmatpush.msk.msrb.mxu0 %vm302_vm5, %v870_v33  ;;  %4911 = vmatpush.msk.msrb.mxu1 %vm302_vm5, %v871_v34  ;;  %vm6416_vm7 = vmmov %vm6415_vm4 }
 0x1d2   : > { %4916 = vmatmul.msk.f32.vlgmr.msrb.gmra.mxu3 %vm298_vm6, %v991_v31  ;;  %4910 = vmatmul.msk.f32.vlgmr.msrb.gmra.mxu0 %vm298_vm6, %v873_v32 }
 0x1d3   : > { %4912 = vmatmul.msk.f32.vlgmr.msrb.gmra.mxu1 %vm298_vm6, %v873_v32  ;;  %4914 = vmatmul.msk.f32.vlgmr.msrb.gmra.mxu2 %vm298_vm6, %v991_v31 }
 0x1d6   : > { %v1046_v36 = vpop.permute.xlu0 %1045  ;;  %v1219_v37 = vpop.permute.xlu1 %1218 }
 0x1d7   : > { %v1047_v27 = vsel %vm6413_vm0, %v1044_v13, %v1046_v36  ;;  %v1048_v39 = vsel %vm6414_vm2, %v1046_v36, %v1044_v13  ;;  %v1222_v40 = vsel %vm6415_vm4, %v1219_v37, %v1221_v35  ;;  %v1223_v41 = vsel %vm6416_vm7, %v1221_v35, %v1219_v37  ;;  %v1282_v56 = vpop.permute.xlu2 %1281 }
 0x1d8   : > { %v1049_v43 = vsel %vm6417_vm9, %v1048_v39, 0.0  ;;  %v1050_v44 = vsel %vm253_vm3, %v1047_v27, 0.0  ;;  %v1224_v45 = vsel %vm6418_vm11, %v1222_v40, 0.0  ;;  %v1225_v46 = vsel %vm5478_vm13, %v1223_v41, 0.0 }
 0x1d9   : > { %4917 = vmatpush.msk.msra.mxu0 %vm302_vm5, %v1049_v43  ;;  %4919 = vmatpush.msk.msra.mxu1 %vm302_vm5, %v1050_v44  ;;  %vm6419_vm3 = vcmp.lt.s32.totalorder %v5362_v20, 127  ;;  %vm1450_vm0 = vcmp.lt.s32.totalorder %v5362_v20, 32  ;;  %vm1425_vm2 = vcmp.lt.s32.totalorder %v5371_v24, 14  ;;  %vm1559_vm4 = vcmp.lt.s32.totalorder %v5362_v20, 30 }
 0x1da   : > { %4924 = vmatmul.msk.f32.vlgmr.msra.gmra.mxu3 %vm298_vm6, %v1105_v42  ;;  %4929 = vmatpush.msk.msrb.mxu2 %vm302_vm5, %v1224_v45  ;;  %vm6420_vm13 = vmmov %vm6419_vm3  ;;  %vm1426_vm7 = vcmp.lt.s32.totalorder %v5374_v26, 14  ;;  %vm6402_vm11 = vcmp.lt.s32.totalorder %v5362_v20, 96 }
 0x1db   : > { %4931 = vmatpush.msk.msrb.mxu3 %vm302_vm5, %v1225_v46  ;;  %4918 = vmatmul.msk.f32.vlgmr.msra.gmra.mxu0 %vm298_vm6, %v1052_v47 }
 0x1dc   : > { %4920 = vmatmul.msk.f32.vlgmr.msra.gmra.mxu1 %vm298_vm6, %v1052_v47  ;;  %4922 = vmatmul.msk.f32.vlgmr.msra.gmra.mxu2 %vm298_vm6, %v1105_v42 }
 0x1de   : > { %v1158_v3 = vpop.permute.xlu0 %1157  ;;  %v1160_v49 = vpop.permute.xlu1 %1159 }
 0x1df   : > { %v1161_v50 = vsel %vm6419_vm3, %v1158_v3, %v1160_v49  ;;  %v1162_v51 = vsel %vm6420_vm13, %v1160_v49, %v1158_v3  ;;  %vm6400_vm3 = vcmp.lt.s32.totalorder %v5362_v20, 126  ;;  %vm1430_vm13 = vcmp.lt.s32.totalorder %v5458_v59, 14 }
 0x1e0   : > { %v1163_v53 = vsel %vm256_vm8, %v1161_v50, 0.0  ;;  %v1164_v54 = vsel %vm257_vm10, %v1162_v51, 0.0  ;;  %vm6401_vm10 = vcmp.lt.s32.totalorder %v5362_v20, 2 }
 0x1e1   : > { %4925 = vmatpush.msk.msrb.mxu0 %vm302_vm5, %v1163_v53  ;;  %4927 = vmatpush.msk.msrb.mxu1 %vm302_vm5, %v1164_v54 }
 0x1e2   : > { %4932 = vmatmul.msk.f32.vlgmr.msrb.gmra.mxu3 %vm298_vm6, %v1227_v52 }
 0x1e3   : > { %4926 = vmatmul.msk.f32.vlgmr.msrb.gmra.mxu0 %vm298_vm6, %v1166_v55 }
 0x1e4   : > { %4928 = vmatmul.msk.f32.vlgmr.msrb.gmra.mxu1 %vm298_vm6, %v1166_v55  ;;  %4930 = vmatmul.msk.f32.vlgmr.msrb.gmra.mxu2 %vm298_vm6, %v1227_v52  ;;  %v4978_v52 = vld [vmem:[%s6392_s2 + $0x8] sm:$0xf] }
 0x1e6   : > { %v1343_v57 = vpop.permute.xlu0 %1342  ;;  %v1280_v58 = vpop.permute.xlu1 %1279 }
 0x1e7   : > { %v1344_v60 = vsel %vm796_vm1, %v1341_v48, %v1343_v57  ;;  %v1345_v61 = vsel %vm796_vm1, %v1343_v57, %v1341_v48  ;;  %v1283_v62 = vsel %vm729_vm12, %v1280_v58, %v1282_v56  ;;  %v1284_v63 = vsel %vm729_vm12, %v1282_v56, %v1280_v58 }
 0x1e8   : > { %v1346_v2 = vsel %vm256_vm8, %v1344_v60, 0.0  ;;  %v1347_v4 = vsel %vm5510_vm15, %v1345_v61, 0.0  ;;  %v1286_v5 = vsel %vm261_vm14, %v1284_v63, 0.0  ;;  %4933 = vmatpush.msk.msra.mxu0 %vm302_vm5, %v1283_v62  ;;  %vm1421_vm1 = vcmp.ge.s32.totalorder %v5371_v24, 2 }
 0x1e9   : > { %4935 = vmatpush.msk.msra.mxu1 %vm302_vm5, %v1286_v5  ;;  %4937 = vmatpush.msk.msra.mxu2 %vm302_vm5, %v1346_v2  ;;  %vm1419_vm8 = vcmp.ge.s32.totalorder %v5368_v23, 2  ;;  %vm1422_vm12 = vcmp.ge.s32.totalorder %v5374_v26, 2  ;;  %vm1439_vm14 = vcmp.lt.s32.totalorder %v5362_v20, 34 }
 0x1ea   : > { %4939 = vmatpush.msk.msra.mxu3 %vm302_vm5, %v1347_v4  ;;  %vm5690_vm15 = vmand %vm1419_vm8, %vm1421_vm1 }
 0x1eb   : > { %4934 = vmatmul.msk.f32.vlgmr.msra.gmra.mxu0 %vm298_vm6, %v1288_v1  ;;  %4940 = vmatmul.msk.f32.vlgmr.msra.gmra.mxu3 %vm298_vm6, %v1349_v6  ;;  %vm5736_vm9 = vmand %vm1419_vm8, %vm1425_vm2 }
 0x1ec   : > { %4936 = vmatmul.msk.f32.vlgmr.msra.gmra.mxu1 %vm298_vm6, %v1288_v1  ;;  %4938 = vmatmul.msk.f32.vlgmr.msra.gmra.mxu2 %vm298_vm6, %v1349_v6  ;;  %v1445_v6 = vld [vmem:[#allocation2 + $0x48] sm:$0xf] }
 0x1ee   : > { %v1406_v43 = vpop.permute.xlu0 %1405 }
 0x24c   : > { %v930_v17 = vpop.f32.mrf.mxu3 }
 0x24d   : > { %v910_v7 = vpop.f32.mrf.mxu2 }
 0x24f   : > { %v959_v8 = vpop.f32.mrf.mxu0 }
 0x250   : > { %v979_v9 = vpop.f32.mrf.mxu1  ;;  %v960_v19 = vadd.f32 %v959_v8, %v910_v7  ;;  %v1456_v8 = vld [vmem:[#allocation2 + $0x4c] sm:$0xf] }
 0x251   : > { %v980_v14 = vadd.f32 %v979_v9, %v930_v17 }
 0x255   : > { %v1038_v12 = vpop.f32.mrf.mxu3 }
 0x256   : > { %v1018_v13 = vpop.f32.mrf.mxu2  ;;  %v1042_v18 = vadd.f32 %v1038_v12, %v980_v14  ;;  %v1627_v12 = vld [vmem:[#allocation2 + $0x54] sm:$0xf] }
 0x257   : > { %v1041_v22 = vadd.f32 %v1018_v13, %v960_v19 }
 0x258   : > { %v1079_v15 = vpop.f32.mrf.mxu0 }
 0x259   : > { %v1099_v16 = vpop.f32.mrf.mxu1  ;;  %v1102_v30 = vadd.f32 %v1079_v15, %v1041_v22  ;;  %v5015_v15 = vld [vmem:[%s6392_s2 + $0xc] sm:$0xf] }
 0x25a   : > { %v1103_v38 = vadd.f32 %v1099_v16, %v1042_v18 }
 0x25d   : > { %v1152_v21 = vpop.f32.mrf.mxu3 }
 0x25e   : > { %v1156_v31 = vadd.f32 %v1152_v21, %v1103_v38  ;;  %v1565_v21 = vld [vmem:[#allocation2 + $0x50] sm:$0xf] }
 0x25f   : > { %v1132_v25 = vpop.f32.mrf.mxu2 }
 0x260   : > { %v1193_v28 = vpop.f32.mrf.mxu0  ;;  %v1155_v32 = vadd.f32 %v1132_v25, %v1102_v30 }
 0x261   : > { %v1213_v29 = vpop.f32.mrf.mxu1 }
 0x262   : > { %v1217_v34 = vadd.f32 %v1213_v29, %v1156_v31  ;;  %v1216_v0 = vadd.f32 %v1193_v28, %v1155_v32 }
 0x265   : > { %v1274_v33 = vpop.f32.mrf.mxu3 }
 0x266   : > { %v1278_v36 = vadd.f32 %v1274_v33, %v1217_v34  ;;  %v1680_v33 = vld [vmem:[#allocation2 + $0x58] sm:$0xf] }
 0x267   : > { %v1254_v35 = vpop.f32.mrf.mxu2 }
 0x268   : > { %v1277_v37 = vadd.f32 %v1254_v35, %v1216_v0  ;;  %v1315_v39 = vpop.f32.mrf.mxu0  ;;  %v1742_v0 = vld [vmem:[#allocation2 + $0x5c] sm:$0xf] }
 0x269   : > { %v1335_v27 = vpop.f32.mrf.mxu1 }
 0x26a   : > { %v1339_v40 = vadd.f32 %v1335_v27, %v1278_v36  ;;  %v1338_v41 = vadd.f32 %v1315_v39, %v1277_v37 }
 0x26e   : > { %v1396_v42 = vpop.f32.mrf.mxu3 }
 0x26f   : > { %v1376_v44 = vpop.f32.mrf.mxu2  ;;  %v1400_v45 = vadd.f32 %v1396_v42, %v1339_v40  ;;  %v1804_v42 = vld [vmem:[#allocation2 + $0x60] sm:$0xf] }
 0x270   : > { %v1399_v46 = vadd.f32 %v1376_v44, %v1338_v41 }
 0x271   : > { %v1409_v47 = vadd.f32 %v1406_v43, %v1400_v45  ;;  %v1866_v45 = vld [vmem:[#allocation2 + $0x64] sm:$0xf] }
 0x272   : > { %v1408_v48 = vadd.f32 %v1406_v43, %v1399_v46 }
 0x273   : > { %v1416_v3 = vadd.f32 %v1412_v11, %v1409_v47 }
 0x274   : > { %v1415_v49 = vadd.f32 %v1411_v10, %v1408_v48 }
 0x275   : > { %v5642_v50 = vmax.f32 %v1416_v3, 0.0 }
 0x276   : > { %v5644_v51 = vmax.f32 %v1415_v49, 0.0 }
 0x277   : > { %1619 = vrot.lane.b32.xlu0 %v5642_v50, %s5265_s19  ;;  %1437 = vrot.lane.b32.xlu2 %v5642_v50, %s5266_s20 }
 0x278   : > { %1435 = vrot.lane.b32.xlu1 %v5644_v51, %s5266_s20 }
 0x27f   : > { %1448 = vrot.lane.b32.xlu2 %v5642_v50, %s5267_s21  ;;  %1555 = vrot.lane.b32.xlu0 %v5644_v51, %s5268_s23 }
 0x280   : > { %1446 = vrot.lane.b32.xlu1 %v5644_v51, %s5267_s21 }
 0x287   : > { %1617 = vrot.lane.b32.xlu2 %v5644_v51, %s5265_s19  ;;  %1794 = vrot.lane.b32.xlu0 %v5644_v51, %s5269_s24 }
 0x288   : > { %1557 = vrot.lane.b32.xlu1 %v5642_v50, %s5268_s23 }
 0x28f   : > { %1734 = vrot.lane.b32.xlu2 %v5642_v50, %s5270_s25  ;;  %1858 = vrot.lane.b32.xlu0 %v5642_v50, %s5271_s26 }
 0x290   : > { %1732 = vrot.lane.b32.xlu1 %v5644_v51, %s5270_s25 }
 0x297   : > { %1856 = vrot.lane.b32.xlu2 %v5644_v51, %s5271_s26  ;;  %1984 = vperm.xlu0 %5209, %v4978_v52   ;;  %v1928_v52 = vld [vmem:[#allocation2 + $0x68] sm:$0xf] }
 0x298   : > { %1796 = vrot.lane.b32.xlu1 %v5642_v50, %s5269_s24 }
 0x29f   : > { %1920 = vrot.lane.b32.xlu2 %v5642_v50, %s5272_s30 }
 0x2a0   : > { %1918 = vrot.lane.b32.xlu1 %v5644_v51, %s5272_s30 }
 0x2d1   : > { %v1438_v53 = vpop.permute.xlu2 %1437 }
 0x2d9   : > { %v1449_v54 = vpop.permute.xlu2 %1448 }
 0x2e1   : > { %v1618_v55 = vpop.permute.xlu2 %1617 }
 0x2e9   : > { %v1620_v56 = vpop.permute.xlu0 %1619  ;;  %v1735_v13 = vpop.permute.xlu2 %1734 }
 0x2ea   : > { %v1622_v58 = vsel %vm6401_vm10, %v1618_v55, %v1620_v56  ;;  %v1623_v60 = vsel %vm6401_vm10, %v1620_v56, %v1618_v55  ;;  %v1436_v61 = vpop.permute.xlu1 %1435  ;;  %vm5786_vm10 = vmand %vm1430_vm13, %vm1422_vm12 }
 0x2eb   : > { %v1624_v62 = vsel %vm1421_vm1, %v1623_v60, 0.0  ;;  %v1625_v63 = vsel %vm1422_vm12, %v1622_v58, 0.0  ;;  %v1440_v1 = vsel %vm1439_vm14, %v1436_v61, %v1438_v53  ;;  %v1441_v2 = vsel %vm1439_vm14, %v1438_v53, %v1436_v61 }
 0x2ec   : > { %v1442_v4 = vsel %vm5690_vm15, %v1441_v2, 0.0  ;;  %v1443_v5 = vsel %vm1422_vm12, %v1440_v1, 0.0 }
 0x2ed   : > { %4946 = vmatpush.msk.msrb.mxu2 %vm302_vm5, %v1442_v4  ;;  %4948 = vmatpush.msk.msrb.mxu3 %vm302_vm5, %v1443_v5 }
 0x2ee   : > { %4947 = vmatmul.msk.f32.vlgmr.msrb.gmra.mxu2 %vm298_vm6, %v1445_v6  ;;  %4949 = vmatmul.msk.f32.vlgmr.msrb.gmra.mxu3 %vm298_vm6, %v1445_v6 }
 0x2ef   : > { %4954 = vmatpush.msk.msra.mxu2 %vm302_vm5, %v1624_v62  ;;  %4956 = vmatpush.msk.msra.mxu3 %vm302_vm5, %v1625_v63 }
 0x2f1   : > { %v1556_v17 = vpop.permute.xlu0 %1555  ;;  %v1857_v25 = vpop.permute.xlu2 %1856 }
 0x2f2   : > { %v1447_v7 = vpop.permute.xlu1 %1446 }
 0x2f3   : > { %v1451_v9 = vsel %vm1450_vm0, %v1447_v7, %v1449_v54  ;;  %v1452_v10 = vsel %vm1450_vm0, %v1449_v54, %v1447_v7 }
 0x2f4   : > { %v1453_v11 = vsel %vm1419_vm8, %v1452_v10, 0.0  ;;  %4944 = vmatpush.msk.msrb.mxu1 %vm302_vm5, %v1451_v9 }
 0x2f5   : > { %4942 = vmatpush.msk.msrb.mxu0 %vm302_vm5, %v1453_v11  ;;  %4945 = vmatmul.msk.f32.vlgmr.msrb.gmra.mxu1 %vm298_vm6, %v1456_v8 }
 0x2f6   : > { %4943 = vmatmul.msk.f32.vlgmr.msrb.gmra.mxu0 %vm298_vm6, %v1456_v8  ;;  %4955 = vmatmul.msk.f32.vlgmr.msra.gmra.mxu2 %vm298_vm6, %v1627_v12 }
 0x2f7   : > { %4957 = vmatmul.msk.f32.vlgmr.msra.gmra.mxu3 %vm298_vm6, %v1627_v12 }
 0x2f9   : > { %v1795_v14 = vpop.permute.xlu0 %1794  ;;  %v1921_v47 = vpop.permute.xlu2 %1920 }
 0x2fa   : > { %v1558_v16 = vpop.permute.xlu1 %1557 }
 0x2fb   : > { %v1560_v18 = vsel %vm1559_vm4, %v1556_v17, %v1558_v16  ;;  %v1561_v19 = vsel %vm1559_vm4, %v1558_v16, %v1556_v17 }
 0x2fc   : > { %v1562_v22 = vsel %vm5736_vm9, %v1561_v19, 0.0  ;;  %v1563_v38 = vsel %vm1426_vm7, %v1560_v18, 0.0 }
 0x2fd   : > { %4950 = vmatpush.msk.msra.mxu0 %vm302_vm5, %v1562_v22  ;;  %4952 = vmatpush.msk.msra.mxu1 %vm302_vm5, %v1563_v38 }
 0x2fe   : > { %4951 = vmatmul.msk.f32.vlgmr.msra.gmra.mxu0 %vm298_vm6, %v1565_v21  ;;  %4953 = vmatmul.msk.f32.vlgmr.msra.gmra.mxu1 %vm298_vm6, %v1565_v21 }
 0x2ff   : > { %4958 = vmatpush.msk.msrb.mxu0 %vm302_vm5, %v5644_v51  ;;  %4960 = vmatpush.msk.msrb.mxu1 %vm302_vm5, %v5642_v50 }
 0x301   : > { %v1859_v28 = vpop.permute.xlu0 %1858 }
 0x302   : > { %v1862_v29 = vsel %vm6402_vm11, %v1859_v28, %v1857_v25  ;;  %v1733_v30 = vpop.permute.xlu1 %1732  ;;  %v1861_v37 = vsel %vm6402_vm11, %v1857_v25, %v1859_v28  ;;  %vm1922_vm11 = vcmp.lt.s32.totalorder %v5362_v20, 94 }
 0x303   : > { %v1737_v31 = vsel %vm6400_vm3, %v1733_v30, %v1735_v13  ;;  %v1738_v32 = vsel %vm6400_vm3, %v1735_v13, %v1733_v30  ;;  %v1864_v36 = vsel %vm1430_vm13, %v1862_v29, 0.0  ;;  %vm6403_vm3 = vcmp.lt.s32.totalorder %v5362_v20, 98 }
 0x304   : > { %v1739_v34 = vsel %vm1425_vm2, %v1737_v31, 0.0  ;;  %v1740_v35 = vsel %vm1426_vm7, %v1738_v32, 0.0 }
 0x305   : > { %4962 = vmatpush.msk.msrb.mxu2 %vm302_vm5, %v1739_v34  ;;  %4964 = vmatpush.msk.msrb.mxu3 %vm302_vm5, %v1740_v35 }
 0x306   : > { %4959 = vmatmul.msk.f32.vlgmr.msrb.gmra.mxu0 %vm298_vm6, %v1680_v33  ;;  %4961 = vmatmul.msk.f32.vlgmr.msrb.gmra.mxu1 %vm298_vm6, %v1680_v33 }
 0x307   : > { %4963 = vmatmul.msk.f32.vlgmr.msrb.gmra.mxu2 %vm298_vm6, %v1742_v0  ;;  %4965 = vmatmul.msk.f32.vlgmr.msrb.gmra.mxu3 %vm298_vm6, %v1742_v0 }
 0x308   : > { %4970 = vmatpush.msk.msra.mxu2 %vm302_vm5, %v1861_v37  ;;  %4972 = vmatpush.msk.msra.mxu3 %vm302_vm5, %v1864_v36 }
 0x309   : > { %v1985_v34 = vpop.permute.xlu0 %1984 }
 0x30a   : > { %v1797_v39 = vpop.permute.xlu1 %1796 }
 0x30b   : > { %v1799_v40 = vsel %vm6403_vm3, %v1795_v14, %v1797_v39  ;;  %v1800_v41 = vsel %vm6403_vm3, %v1797_v39, %v1795_v14  ;;  %vm5809_vm3 = vmand %vm1430_vm13, %vm1426_vm7 }
 0x30c   : > { %v1801_v43 = vsel %vm1421_vm1, %v1799_v40, 0.0  ;;  %v1802_v44 = vsel %vm5786_vm10, %v1800_v41, 0.0 }
 0x30d   : > { %4966 = vmatpush.msk.msra.mxu0 %vm302_vm5, %v1801_v43  ;;  %4968 = vmatpush.msk.msra.mxu1 %vm302_vm5, %v1802_v44 }
 0x30e   : > { %4967 = vmatmul.msk.f32.vlgmr.msra.gmra.mxu0 %vm298_vm6, %v1804_v42  ;;  %4969 = vmatmul.msk.f32.vlgmr.msra.gmra.mxu1 %vm298_vm6, %v1804_v42  ;;  %v2010_v42 = vld [vmem:[#allocation2 + $0x70] sm:$0xf] }
 0x30f   : > { %4971 = vmatmul.msk.f32.vlgmr.msra.gmra.mxu2 %vm298_vm6, %v1866_v45  ;;  %4973 = vmatmul.msk.f32.vlgmr.msra.gmra.mxu3 %vm298_vm6, %v1866_v45 }
 0x312   : > { %v1919_v48 = vpop.permute.xlu1 %1918 }
 0x313   : > { %v1923_v3 = vsel %vm1922_vm11, %v1919_v48, %v1921_v47  ;;  %v1924_v49 = vsel %vm1922_vm11, %v1921_v47, %v1919_v48 }
 0x314   : > { %v1925_v53 = vsel %vm1425_vm2, %v1923_v3, 0.0  ;;  %v1926_v54 = vsel %vm5809_vm3, %v1924_v49, 0.0 }
 0x315   : > { %4974 = vmatpush.msk.msrb.mxu0 %vm302_vm5, %v1925_v53  ;;  %4976 = vmatpush.msk.msrb.mxu1 %vm302_vm5, %v1926_v54 }
 0x316   : > { %4975 = vmatmul.msk.f32.vlgmr.msrb.gmra.mxu0 %vm298_vm6, %v1928_v52  ;;  %4977 = vmatmul.msk.f32.vlgmr.msrb.gmra.mxu1 %vm298_vm6, %v1928_v52 }
 0x371   : > { %v1552_v58 = vpop.f32.mrf.mxu3  ;;  %v1532_v60 = vpop.f32.mrf.mxu2 }
 0x372   : > { %v1503_v55 = vpop.f32.mrf.mxu1 }
 0x373   : > { %v1483_v56 = vpop.f32.mrf.mxu0  ;;  %v1553_v63 = vadd.f32 %v1552_v58, %v1503_v55  ;;  %v2000_v58 = vld [vmem:[#allocation2 + $0x6c] sm:$0xf] }
 0x374   : > { %v1533_v4 = vadd.f32 %v1532_v60, %v1483_v56  ;;  %v2118_v60 = vld [vmem:[#allocation2 + $0x74] sm:$0xf] }
 0x379   : > { %v1654_v1 = vpop.f32.mrf.mxu2 }
 0x37a   : > { %v1674_v2 = vpop.f32.mrf.mxu3 }
 0x37b   : > { %v1592_v61 = vpop.f32.mrf.mxu0  ;;  %v1612_v62 = vpop.f32.mrf.mxu1 }
 0x37c   : > { %v1615_v17 = vadd.f32 %v1592_v61, %v1533_v4  ;;  %v1616_v7 = vadd.f32 %v1612_v62, %v1553_v63 }
 0x37e   : > { %v1677_v8 = vadd.f32 %v1654_v1, %v1615_v17  ;;  %v1678_v9 = vadd.f32 %v1674_v2, %v1616_v7 }
 0x383   : > { %v1707_v5 = vpop.f32.mrf.mxu0  ;;  %v1727_v6 = vpop.f32.mrf.mxu1 }
 0x384   : > { %v1730_v12 = vadd.f32 %v1707_v5, %v1677_v8  ;;  %v1731_v13 = vadd.f32 %v1727_v6, %v1678_v9  ;;  %v2179_v5 = vld [vmem:[#allocation2 + $0x78] sm:$0xf]  ;;  %v2232_v6 = vld [vmem:[#allocation2 + $0x7c] sm:$0xf] }
 0x38a   : > { %v1769_v10 = vpop.f32.mrf.mxu2  ;;  %v1789_v11 = vpop.f32.mrf.mxu3 }
 0x38b   : > { %v1831_v14 = vpop.f32.mrf.mxu0  ;;  %v1851_v16 = vpop.f32.mrf.mxu1  ;;  %v1792_v18 = vadd.f32 %v1769_v10, %v1730_v12  ;;  %v1793_v19 = vadd.f32 %v1789_v11, %v1731_v13 }
 0x38d   : > { %v1854_v21 = vadd.f32 %v1831_v14, %v1792_v18  ;;  %v1855_v22 = vadd.f32 %v1851_v16, %v1793_v19  ;;  %v2293_v19 = vld [vmem:[#allocation2 + $0x80] sm:$0xf] }
 0x392   : > { %v1893_v38 = vpop.f32.mrf.mxu2  ;;  %v1913_v25 = vpop.f32.mrf.mxu3 }
 0x393   : > { %v1916_v28 = vadd.f32 %v1893_v38, %v1854_v21  ;;  %v1917_v29 = vadd.f32 %v1913_v25, %v1855_v22  ;;  %v1955_v30 = vpop.f32.mrf.mxu0  ;;  %v1975_v31 = vpop.f32.mrf.mxu1  ;;  %v2354_v21 = vld [vmem:[#allocation2 + $0x84] sm:$0xf] }
 0x395   : > { %v1978_v32 = vadd.f32 %v1955_v30, %v1916_v28  ;;  %v1979_v33 = vadd.f32 %v1975_v31, %v1917_v29  ;;  %v2476_v30 = vld [vmem:[#allocation2 + $0x8c] sm:$0xf] }
 0x397   : > { %v1987_v35 = vadd.f32 %v1985_v34, %v1978_v32  ;;  %v1988_v0 = vadd.f32 %v1985_v34, %v1979_v33 }
 0x399   : > { %v1989_v36 = vmax.f32 %v1987_v35, 0.0  ;;  %v1990_v37 = vmax.f32 %v1988_v0, 0.0  ;;  %v2415_v35 = vld [vmem:[#allocation2 + $0x88] sm:$0xf] }
 0x39b   : > { %2003 = vrot.lane.b32.xlu2 %v1990_v37, %s5267_s21  ;;  %2109 = vrot.lane.b32.xlu0 %v1989_v36, %s5268_s23 }
 0x39c   : > { %2001 = vrot.lane.b32.xlu1 %v1989_v36, %s5267_s21 }
 0x3a3   : > { %1991 = vrot.lane.b32.xlu2 %v1989_v36, %s5266_s20  ;;  %1993 = vrot.lane.b32.xlu0 %v1990_v37, %s5266_s20 }
 0x3a4   : > { %2111 = vrot.lane.b32.xlu1 %v1990_v37, %s5268_s23  ;;  %s5279_s23 = smov 120  }
 0x3ab   : > { %2172 = vrot.lane.b32.xlu2 %v1990_v37, %s5265_s19  ;;  %2345 = vrot.lane.b32.xlu0 %v1989_v36, %s5269_s24 }
 0x3ac   : > { %2170 = vrot.lane.b32.xlu1 %v1989_v36, %s5265_s19 }
 0x3b3   : > { %2284 = vrot.lane.b32.xlu2 %v1989_v36, %s5270_s25  ;;  %2286 = vrot.lane.b32.xlu0 %v1990_v37, %s5270_s25 }
 0x3b4   : > { %2347 = vrot.lane.b32.xlu1 %v1990_v37, %s5269_s24  ;;  %s5280_s24 = smov 8  }
 0x3bb   : > { %2469 = vrot.lane.b32.xlu2 %v1990_v37, %s5272_s30  ;;  %2406 = vrot.lane.b32.xlu0 %v1989_v36, %s5271_s26 }
 0x3bc   : > { %2467 = vrot.lane.b32.xlu1 %v1989_v36, %s5272_s30 }
 0x3c3   : > { %2532 = vperm.xlu2 %5210, %v5015_v15  }
 0x3c4   : > { %2408 = vrot.lane.b32.xlu1 %v1990_v37, %s5271_s26 }
 0x3f5   : > { %v2004_v39 = vpop.permute.xlu2 %2003 }
 0x3fd   : > { %v1992_v45 = vpop.permute.xlu2 %1991 }
 0x405   : > { %v2173_v57 = vpop.permute.xlu2 %2172 }
 0x40d   : > { %v2110_v40 = vpop.permute.xlu0 %2109  ;;  %v2285_v8 = vpop.permute.xlu2 %2284 }
 0x40e   : > { %v2002_v41 = vpop.permute.xlu1 %2001 }
 0x40f   : > { %v2005_v43 = vsel %vm1450_vm0, %v2002_v41, %v2004_v39  ;;  %v2006_v44 = vsel %vm1450_vm0, %v2004_v39, %v2002_v41 }
 0x410   : > { %v2007_v47 = vsel %vm1419_vm8, %v2006_v44, 0.0  ;;  %4981 = vmatpush.msk.msrb.mxu3 %vm302_vm5, %v2005_v43  ;;  %vm6429_vm8 = vcmp.lt.s32.totalorder %v5362_v20, 2 }
 0x411   : > { %4979 = vmatpush.msk.msrb.mxu2 %vm302_vm5, %v2007_v47  ;;  %4982 = vmatmul.msk.f32.vlgmr.msrb.gmra.mxu3 %vm298_vm6, %v2010_v42 }
 0x412   : > { %4980 = vmatmul.msk.f32.vlgmr.msrb.gmra.mxu2 %vm298_vm6, %v2010_v42 }
 0x415   : > { %v1994_v48 = vpop.permute.xlu0 %1993  ;;  %v2470_v25 = vpop.permute.xlu2 %2469 }
 0x416   : > { %v1995_v3 = vsel %vm1439_vm14, %v1992_v45, %v1994_v48  ;;  %v1996_v49 = vsel %vm1439_vm14, %v1994_v48, %v1992_v45  ;;  %v2112_v52 = vpop.permute.xlu1 %2111  ;;  %vm6430_vm14 = vmmov %vm6429_vm8 }
 0x417   : > { %v1997_v53 = vsel %vm5690_vm15, %v1996_v49, 0.0  ;;  %v1998_v54 = vsel %vm1422_vm12, %v1995_v3, 0.0  ;;  %v2113_v55 = vsel %vm1559_vm4, %v2110_v40, %v2112_v52  ;;  %v2114_v56 = vsel %vm1559_vm4, %v2112_v52, %v2110_v40 }
 0x418   : > { %v2115_v61 = vsel %vm5736_vm9, %v2114_v56, 0.0  ;;  %v2116_v62 = vsel %vm1426_vm7, %v2113_v55, 0.0  ;;  %4983 = vmatpush.msk.msra.mxu0 %vm302_vm5, %v1997_v53  ;;  %4985 = vmatpush.msk.msra.mxu1 %vm302_vm5, %v1998_v54  ;;  %vm6431_vm15 = vcmp.lt.s32.totalorder %v5362_v20, 126  ;;  %vm2547_vm9 = vcmp.lt.s32.totalorder %v5371_v24, 12 }
 0x419   : > { %4987 = vmatpush.msk.msra.mxu2 %vm302_vm5, %v2115_v61  ;;  %4989 = vmatpush.msk.msra.mxu3 %vm302_vm5, %v2116_v62  ;;  %vm6432_vm0 = vmmov %vm6431_vm15 }
 0x41a   : > { %4986 = vmatmul.msk.f32.vlgmr.msra.gmra.mxu1 %vm298_vm6, %v2000_v58  ;;  %4988 = vmatmul.msk.f32.vlgmr.msra.gmra.mxu2 %vm298_vm6, %v2118_v60 }
 0x41b   : > { %4990 = vmatmul.msk.f32.vlgmr.msra.gmra.mxu3 %vm298_vm6, %v2118_v60  ;;  %4995 = vmatpush.msk.msrb.mxu2 %vm302_vm5, %v1989_v36 }
 0x41c   : > { %4997 = vmatpush.msk.msrb.mxu3 %vm302_vm5, %v1990_v37  ;;  %4984 = vmatmul.msk.f32.vlgmr.msra.gmra.mxu0 %vm298_vm6, %v2000_v58 }
 0x41d   : > { %v2346_v63 = vpop.permute.xlu0 %2345 }
 0x41e   : > { %v2171_v1 = vpop.permute.xlu1 %2170 }
 0x41f   : > { %v2174_v2 = vsel %vm6429_vm8, %v2171_v1, %v2173_v57  ;;  %v2175_v4 = vsel %vm6430_vm14, %v2173_v57, %v2171_v1  ;;  %vm2548_vm8 = vcmp.lt.s32.totalorder %v5374_v26, 12 }
 0x420   : > { %v2176_v17 = vsel %vm1421_vm1, %v2175_v4, 0.0  ;;  %v2177_v7 = vsel %vm1422_vm12, %v2174_v2, 0.0  ;;  %vm6433_vm12 = vcmp.lt.s32.totalorder %v5362_v20, 98 }
 0x421   : > { %4991 = vmatpush.msk.msrb.mxu0 %vm302_vm5, %v2176_v17  ;;  %4993 = vmatpush.msk.msrb.mxu1 %vm302_vm5, %v2177_v7  ;;  %vm6434_vm4 = vmmov %vm6433_vm12 }
 0x422   : > { %4994 = vmatmul.msk.f32.vlgmr.msrb.gmra.mxu1 %vm298_vm6, %v2179_v5  ;;  %4996 = vmatmul.msk.f32.vlgmr.msrb.gmra.mxu2 %vm298_vm6, %v2232_v6 }
 0x423   : > { %4998 = vmatmul.msk.f32.vlgmr.msrb.gmra.mxu3 %vm298_vm6, %v2232_v6 }
 0x424   : > { %4992 = vmatmul.msk.f32.vlgmr.msrb.gmra.mxu0 %vm298_vm6, %v2179_v5 }
 0x425   : > { %v2287_v9 = vpop.permute.xlu0 %2286 }
 0x426   : > { %v2288_v10 = vsel %vm6431_vm15, %v2285_v8, %v2287_v9  ;;  %v2289_v11 = vsel %vm6432_vm0, %v2287_v9, %v2285_v8  ;;  %v2348_v12 = vpop.permute.xlu1 %2347  ;;  %v2533_v9 = vpop.permute.xlu2 %2532  ;;  %vm2544_vm15 = vcmp.ge.s32.totalorder %v5374_v26, 4 }
 0x427   : > { %v2290_v13 = vsel %vm1425_vm2, %v2288_v10, 0.0  ;;  %v2291_v14 = vsel %vm1426_vm7, %v2289_v11, 0.0  ;;  %v2349_v16 = vsel %vm6433_vm12, %v2346_v63, %v2348_v12  ;;  %v2350_v18 = vsel %vm6434_vm4, %v2348_v12, %v2346_v63 }
 0x428   : > { %v2351_v22 = vsel %vm1421_vm1, %v2349_v16, 0.0  ;;  %v2352_v38 = vsel %vm5786_vm10, %v2350_v18, 0.0  ;;  %4999 = vmatpush.msk.msra.mxu0 %vm302_vm5, %v2290_v13  ;;  %5001 = vmatpush.msk.msra.mxu1 %vm302_vm5, %v2291_v14  ;;  %vm6435_vm1 = vcmp.lt.s32.totalorder %v5362_v20, 96  ;;  %vm2541_vm7 = vcmp.ge.s32.totalorder %v5368_v23, 4 }
 0x429   : > { %5003 = vmatpush.msk.msra.mxu2 %vm302_vm5, %v2351_v22  ;;  %5005 = vmatpush.msk.msra.mxu3 %vm302_vm5, %v2352_v38  ;;  %vm6436_vm10 = vmmov %vm6435_vm1  ;;  %vm2552_vm12 = vcmp.lt.s32.totalorder %v5458_v59, 12  ;;  %v3559_v59 = vld [vmem:[#allocation2 + $0xd4] sm:$0xf] }
 0x42a   : > { %5002 = vmatmul.msk.f32.vlgmr.msra.gmra.mxu1 %vm298_vm6, %v2293_v19  ;;  %5004 = vmatmul.msk.f32.vlgmr.msra.gmra.mxu2 %vm298_vm6, %v2354_v21  ;;  %vm5996_vm14 = vmand %vm2541_vm7, %vm2547_vm9 }
 0x42b   : > { %5006 = vmatmul.msk.f32.vlgmr.msra.gmra.mxu3 %vm298_vm6, %v2354_v21  ;;  %v5052_v21 = vld [vmem:[%s6392_s2 + $0x10] sm:$0xf]  ;;  %vm6032_vm4 = vmand %vm2552_vm12, %vm2544_vm15 }
 0x42c   : > { %5000 = vmatmul.msk.f32.vlgmr.msra.gmra.mxu0 %vm298_vm6, %v2293_v19 }
 0x42d   : > { %v2407_v33 = vpop.permute.xlu0 %2406 }
 0x42e   : > { %v2468_v28 = vpop.permute.xlu1 %2467 }
 0x42f   : > { %v2471_v27 = vsel %vm1922_vm11, %v2468_v28, %v2470_v25  ;;  %v2472_v29 = vsel %vm1922_vm11, %v2470_v25, %v2468_v28  ;;  %v2578_v28 = vld [vmem:[#allocation2 + $0x94] sm:$0xf]  ;;  %vm2543_vm11 = vcmp.ge.s32.totalorder %v5371_v24, 4 }
 0x430   : > { %v2473_v31 = vsel %vm1425_vm2, %v2471_v27, 0.0  ;;  %v2474_v32 = vsel %vm5809_vm3, %v2472_v29, 0.0  ;;  %vm2572_vm2 = vcmp.lt.s32.totalorder %v5362_v20, 64  ;;  %vm2681_vm3 = vcmp.lt.s32.totalorder %v5362_v20, 60  ;;  %vm6005_vm0 = vmand %vm2541_vm7, %vm2543_vm11 }
 0x431   : > { %5011 = vmatpush.msk.msrb.mxu2 %vm302_vm5, %v2473_v31  ;;  %5013 = vmatpush.msk.msrb.mxu3 %vm302_vm5, %v2474_v32 }
 0x432   : > { %5012 = vmatmul.msk.f32.vlgmr.msrb.gmra.mxu2 %vm298_vm6, %v2476_v30 }
 0x433   : > { %5014 = vmatmul.msk.f32.vlgmr.msrb.gmra.mxu3 %vm298_vm6, %v2476_v30 }
 0x436   : > { %v2409_v34 = vpop.permute.xlu1 %2408 }
 0x437   : > { %v2410_v0 = vsel %vm6435_vm1, %v2407_v33, %v2409_v34  ;;  %v2411_v36 = vsel %vm6436_vm10, %v2409_v34, %v2407_v33  ;;  %vm6404_vm1 = vcmp.lt.s32.totalorder %v5362_v20, 4  ;;  %vm6065_vm10 = vmand %vm2552_vm12, %vm2548_vm8 }
 0x438   : > { %v2413_v46 = vsel %vm1430_vm13, %v2411_v36, 0.0  ;;  %5007 = vmatpush.msk.msrb.mxu0 %vm302_vm5, %v2410_v0  ;;  %vm2561_vm13 = vcmp.lt.s32.totalorder %v5362_v20, 68 }
 0x439   : > { %5008 = vmatmul.msk.f32.vlgmr.msrb.gmra.mxu0 %vm298_vm6, %v2415_v35  ;;  %5009 = vmatpush.msk.msrb.mxu1 %vm302_vm5, %v2413_v46 }
 0x43a   : > { %5010 = vmatmul.msk.f32.vlgmr.msrb.gmra.mxu1 %vm298_vm6, %v2415_v35 }
 0x494   : > { %v2057_v37 = vpop.f32.mrf.mxu3 }
 0x495   : > { %v2037_v39 = vpop.f32.mrf.mxu2 }
 0x497   : > { %v2106_v41 = vpop.f32.mrf.mxu1 }
 0x498   : > { %v2107_v52 = vadd.f32 %v2106_v41, %v2057_v37  ;;  %v2567_v41 = vld [vmem:[#allocation2 + $0x90] sm:$0xf] }
 0x499   : > { %v2086_v40 = vpop.f32.mrf.mxu0 }
 0x49a   : > { %v2087_v44 = vadd.f32 %v2086_v40, %v2037_v39 }
 0x49d   : > { %v2145_v42 = vpop.f32.mrf.mxu2 }
 0x49e   : > { %v2165_v43 = vpop.f32.mrf.mxu3  ;;  %v2168_v49 = vadd.f32 %v2145_v42, %v2087_v44  ;;  %v2687_v44 = vld [vmem:[#allocation2 + $0x98] sm:$0xf] }
 0x49f   : > { %v2226_v47 = vpop.f32.mrf.mxu1  ;;  %v2169_v53 = vadd.f32 %v2165_v43, %v2107_v52 }
 0x4a1   : > { %v2206_v45 = vpop.f32.mrf.mxu0  ;;  %v2230_v55 = vadd.f32 %v2226_v47, %v2169_v53 }
 0x4a2   : > { %v2229_v54 = vadd.f32 %v2206_v45, %v2168_v49 }
 0x4a5   : > { %v2259_v48 = vpop.f32.mrf.mxu2 }
 0x4a6   : > { %v2279_v3 = vpop.f32.mrf.mxu3  ;;  %v2282_v60 = vadd.f32 %v2259_v48, %v2229_v54 }
 0x4a7   : > { %v2340_v61 = vpop.f32.mrf.mxu1  ;;  %v2283_v57 = vadd.f32 %v2279_v3, %v2230_v55 }
 0x4a9   : > { %v2320_v56 = vpop.f32.mrf.mxu0  ;;  %v2344_v63 = vadd.f32 %v2340_v61, %v2283_v57 }
 0x4aa   : > { %v2343_v15 = vadd.f32 %v2320_v56, %v2282_v60  ;;  %v2749_v56 = vld [vmem:[#allocation2 + $0x9c] sm:$0xf]  ;;  %v2802_v60 = vld [vmem:[#allocation2 + $0xa0] sm:$0xf] }
 0x4ad   : > { %v2381_v58 = vpop.f32.mrf.mxu2 }
 0x4ae   : > { %v2401_v62 = vpop.f32.mrf.mxu3  ;;  %v2404_v1 = vadd.f32 %v2381_v58, %v2343_v15 }
 0x4af   : > { %v2405_v2 = vadd.f32 %v2401_v62, %v2344_v63 }
 0x4b5   : > { %v2503_v5 = vpop.f32.mrf.mxu2 }
 0x4b6   : > { %v2442_v4 = vpop.f32.mrf.mxu0  ;;  %v2523_v7 = vpop.f32.mrf.mxu3 }
 0x4b7   : > { %v2465_v6 = vadd.f32 %v2442_v4, %v2404_v1  ;;  %v2462_v17 = vpop.f32.mrf.mxu1 }
 0x4b8   : > { %v2466_v8 = vadd.f32 %v2462_v17, %v2405_v2  ;;  %v2919_v17 = vld [vmem:[#allocation2 + $0xa8] sm:$0xf] }
 0x4b9   : > { %v2526_v10 = vadd.f32 %v2503_v5, %v2465_v6  ;;  %v2864_v5 = vld [vmem:[#allocation2 + $0xa4] sm:$0xf] }
 0x4ba   : > { %v2527_v11 = vadd.f32 %v2523_v7, %v2466_v8  ;;  %v2974_v7 = vld [vmem:[#allocation2 + $0xac] sm:$0xf]  ;;  %v3029_v8 = vld [vmem:[#allocation2 + $0xb0] sm:$0xf] }
 0x4bb   : > { %v2535_v12 = vadd.f32 %v2533_v9, %v2526_v10 }
 0x4bc   : > { %v2536_v13 = vadd.f32 %v2533_v9, %v2527_v11 }
 0x4bd   : > { %v2537_v14 = vadd.f32 %v2535_v12, %v5644_v51 }
 0x4be   : > { %v2538_v16 = vadd.f32 %v2536_v13, %v5642_v50 }
 0x4bf   : > { %v5942_v18 = vmax.f32 %v2537_v14, 0.0 }
 0x4c0   : > { %v5944_v19 = vmax.f32 %v2538_v16, 0.0 }
 0x4c1   : > { %2568 = vrot.lane.b32.xlu2 %v5942_v18, %s5273_s8 }
 0x4c2   : > { %2570 = vrot.lane.b32.xlu0 %v5944_v19, %s5273_s8  ;;  %2559 = vrot.lane.b32.xlu1 %v5944_v19, %s5274_s9 }
 0x4c9   : > { %2679 = vrot.lane.b32.xlu2 %v5944_v19, %s5275_s10 }
 0x4ca   : > { %2677 = vrot.lane.b32.xlu1 %v5942_v18, %s5275_s10  ;;  %2557 = vrot.lane.b32.xlu0 %v5942_v18, %s5274_s9 }
 0x4d1   : > { %2854 = vrot.lane.b32.xlu2 %v5942_v18, %s5276_s11 }
 0x4d2   : > { %2741 = vrot.lane.b32.xlu1 %v5944_v19, %s5277_s12  ;;  %2739 = vrot.lane.b32.xlu0 %v5942_v18, %s5277_s12 }
 0x4da   : > { %3085 = vperm.xlu1 %5208, %v5052_v21   ;;  %2856 = vrot.lane.b32.xlu0 %v5944_v19, %s5276_s11 }
 0x51b   : > { %v2569_v22 = vpop.permute.xlu2 %2568 }
 0x523   : > { %v2680_v31 = vpop.permute.xlu2 %2679 }
 0x52b   : > { %v2855_v57 = vpop.permute.xlu2 %2854 }
 0x534   : > { %v2571_v38 = vpop.permute.xlu0 %2570  ;;  %v2560_v25 = vpop.permute.xlu1 %2559 }
 0x535   : > { %v5973_v27 = vsel %vm2572_vm2, %v2569_v22, %v2571_v38  ;;  %v5977_v29 = vsel %vm2572_vm2, %v2571_v38, %v2569_v22 }
 0x536   : > { %v2575_v30 = vsel %vm2541_vm7, %v5977_v29, 0.0  ;;  %5018 = vmatpush.msk.msra.mxu1 %vm302_vm5, %v5973_v27  ;;  %v2972_v6 = vsel %vm2552_vm12, %v5977_v29, 0.0 }
 0x537   : > { %5016 = vmatpush.msk.msra.mxu0 %vm302_vm5, %v2575_v30  ;;  %5019 = vmatmul.msk.f32.vlgmr.msra.gmra.mxu1 %vm298_vm6, %v2578_v28 }
 0x538   : > { %5017 = vmatmul.msk.f32.vlgmr.msra.gmra.mxu0 %vm298_vm6, %v2578_v28 }
 0x53c   : > { %v2678_v33 = vpop.permute.xlu1 %2677  ;;  %v2558_v35 = vpop.permute.xlu0 %2557 }
 0x53d   : > { %v2682_v0 = vsel %vm2681_vm3, %v2678_v33, %v2680_v31  ;;  %v2683_v36 = vsel %vm2681_vm3, %v2680_v31, %v2678_v33  ;;  %v2562_v46 = vsel %vm2561_vm13, %v2558_v35, %v2560_v25  ;;  %v2563_v37 = vsel %vm2561_vm13, %v2560_v25, %v2558_v35 }
 0x53e   : > { %v2684_v39 = vsel %vm5996_vm14, %v2683_v36, 0.0  ;;  %v2685_v40 = vsel %vm2548_vm8, %v2682_v0, 0.0  ;;  %v2564_v42 = vsel %vm6005_vm0, %v2563_v37, 0.0  ;;  %v2565_v43 = vsel %vm2544_vm15, %v2562_v46, 0.0 }
 0x53f   : > { %5024 = vmatpush.msk.msrb.mxu0 %vm302_vm5, %v2684_v39  ;;  %5026 = vmatpush.msk.msrb.mxu1 %vm302_vm5, %v2685_v40  ;;  %v2916_v47 = vsel %vm2543_vm11, %v2562_v46, 0.0  ;;  %v2917_v48 = vsel %vm6032_vm4, %v2563_v37, 0.0  ;;  %v3026_v61 = vsel %vm2547_vm9, %v2682_v0, 0.0  ;;  %v3027_v62 = vsel %vm6065_vm10, %v2683_v36, 0.0 }
 0x540   : > { %5020 = vmatpush.msk.msra.mxu2 %vm302_vm5, %v2564_v42  ;;  %5022 = vmatpush.msk.msra.mxu3 %vm302_vm5, %v2565_v43 }
 0x541   : > { %5021 = vmatmul.msk.f32.vlgmr.msra.gmra.mxu2 %vm298_vm6, %v2567_v41  ;;  %5023 = vmatmul.msk.f32.vlgmr.msra.gmra.mxu3 %vm298_vm6, %v2567_v41 }
 0x542   : > { %5025 = vmatmul.msk.f32.vlgmr.msrb.gmra.mxu0 %vm298_vm6, %v2687_v44  ;;  %5027 = vmatmul.msk.f32.vlgmr.msrb.gmra.mxu1 %vm298_vm6, %v2687_v44 }
 0x543   : > { %5032 = vmatpush.msk.msra.mxu0 %vm302_vm5, %v5942_v18  ;;  %5034 = vmatpush.msk.msra.mxu1 %vm302_vm5, %v5944_v19 }
 0x544   : > { %v2742_v3 = vpop.permute.xlu1 %2741  ;;  %v2740_v49 = vpop.permute.xlu0 %2739 }
 0x545   : > { %5040 = vmatpush.msk.msrb.mxu0 %vm302_vm5, %v2916_v47  ;;  %5042 = vmatpush.msk.msrb.mxu1 %vm302_vm5, %v2917_v48  ;;  %v2744_v52 = vsel %vm6404_vm1, %v2740_v49, %v2742_v3  ;;  %v2745_v53 = vsel %vm6404_vm1, %v2742_v3, %v2740_v49  ;;  %vm2858_vm1 = vcmp.lt.s32.totalorder %v5362_v20, 124 }
 0x546   : > { %v2746_v54 = vsel %vm2543_vm11, %v2745_v53, 0.0  ;;  %v2747_v55 = vsel %vm2544_vm15, %v2744_v52, 0.0 }
 0x547   : > { %5028 = vmatpush.msk.msrb.mxu2 %vm302_vm5, %v2746_v54  ;;  %5030 = vmatpush.msk.msrb.mxu3 %vm302_vm5, %v2747_v55 }
 0x549   : > { %5029 = vmatmul.msk.f32.vlgmr.msrb.gmra.mxu2 %vm298_vm6, %v2749_v56  ;;  %5031 = vmatmul.msk.f32.vlgmr.msrb.gmra.mxu3 %vm298_vm6, %v2749_v56 }
 0x54a   : > { %5033 = vmatmul.msk.f32.vlgmr.msra.gmra.mxu0 %vm298_vm6, %v2802_v60  ;;  %5035 = vmatmul.msk.f32.vlgmr.msra.gmra.mxu1 %vm298_vm6, %v2802_v60 }
 0x54b   : > { %5048 = vmatpush.msk.msra.mxu0 %vm302_vm5, %v3026_v61  ;;  %5050 = vmatpush.msk.msra.mxu1 %vm302_vm5, %v3027_v62  ;;  %v5089_v62 = vld [vmem:[%s6392_s2 + $0x14] sm:$0xf] }
 0x54c   : > { %v2857_v15 = vpop.permute.xlu0 %2856  ;;  %v3086_v54 = vpop.permute.xlu1 %3085 }
 0x54d   : > { %v2859_v63 = vsel %vm2858_vm1, %v2855_v57, %v2857_v15  ;;  %v2860_v1 = vsel %vm2858_vm1, %v2857_v15, %v2855_v57  ;;  %v3631_v57 = vld [vmem:[%s6394_s4] sm:$0xf] }
 0x54e   : > { %v2861_v2 = vsel %vm2547_vm9, %v2859_v63, 0.0  ;;  %v2862_v4 = vsel %vm2548_vm8, %v2860_v1, 0.0 }
 0x54f   : > { %5036 = vmatpush.msk.msra.mxu2 %vm302_vm5, %v2861_v2  ;;  %5038 = vmatpush.msk.msra.mxu3 %vm302_vm5, %v2862_v4  ;;  %v3111_v4 = vld [vmem:[#allocation2 + $0xb8] sm:$0xf] }
 0x551   : > { %5044 = vmatpush.msk.msrb.mxu2 %vm302_vm5, %v5973_v27  ;;  %5046 = vmatpush.msk.msrb.mxu3 %vm302_vm5, %v2972_v6 }
 0x552   : > { %5037 = vmatmul.msk.f32.vlgmr.msra.gmra.mxu2 %vm298_vm6, %v2864_v5  ;;  %5039 = vmatmul.msk.f32.vlgmr.msra.gmra.mxu3 %vm298_vm6, %v2864_v5 }
 0x553   : > { %5041 = vmatmul.msk.f32.vlgmr.msrb.gmra.mxu0 %vm298_vm6, %v2919_v17  ;;  %5043 = vmatmul.msk.f32.vlgmr.msrb.gmra.mxu1 %vm298_vm6, %v2919_v17 }
 0x55a   : > { %5045 = vmatmul.msk.f32.vlgmr.msrb.gmra.mxu2 %vm298_vm6, %v2974_v7  ;;  %5047 = vmatmul.msk.f32.vlgmr.msrb.gmra.mxu3 %vm298_vm6, %v2974_v7 }
 0x55b   : > { %5049 = vmatmul.msk.f32.vlgmr.msra.gmra.mxu0 %vm298_vm6, %v3029_v8  ;;  %5051 = vmatmul.msk.f32.vlgmr.msra.gmra.mxu1 %vm298_vm6, %v3029_v8 }
 0x5b4   : > { %v2625_v10 = vpop.f32.mrf.mxu1 }
 0x5b5   : > { %v2605_v9 = vpop.f32.mrf.mxu0 }
 0x5bf   : > { %v2714_v11 = vpop.f32.mrf.mxu0  ;;  %v2734_v12 = vpop.f32.mrf.mxu1 }
 0x5c4   : > { %v2654_v13 = vpop.f32.mrf.mxu2  ;;  %v2674_v14 = vpop.f32.mrf.mxu3 }
 0x5c5   : > { %v2655_v22 = vadd.f32 %v2654_v13, %v2605_v9  ;;  %v2675_v38 = vadd.f32 %v2674_v14, %v2625_v10  ;;  %v3219_v14 = vld [vmem:[#allocation2 + $0xbc] sm:$0xf] }
 0x5c7   : > { %v2829_v16 = vpop.f32.mrf.mxu0  ;;  %v2849_v21 = vpop.f32.mrf.mxu1  ;;  %v2737_v27 = vadd.f32 %v2714_v11, %v2655_v22  ;;  %v2738_v29 = vadd.f32 %v2734_v12, %v2675_v38 }
 0x5cc   : > { %v2776_v25 = vpop.f32.mrf.mxu2  ;;  %v2796_v28 = vpop.f32.mrf.mxu3 }
 0x5cd   : > { %v2799_v30 = vadd.f32 %v2776_v25, %v2737_v27  ;;  %v2800_v31 = vadd.f32 %v2796_v28, %v2738_v29 }
 0x5cf   : > { %v2852_v46 = vadd.f32 %v2829_v16, %v2799_v30  ;;  %v2853_v37 = vadd.f32 %v2849_v21, %v2800_v31  ;;  %v3101_v16 = vld [vmem:[#allocation2 + $0xb4] sm:$0xf] }
 0x5d0   : > { %v2946_v33 = vpop.f32.mrf.mxu0  ;;  %v2966_v35 = vpop.f32.mrf.mxu1 }
 0x5d5   : > { %v2891_v0 = vpop.f32.mrf.mxu2  ;;  %v2911_v36 = vpop.f32.mrf.mxu3 }
 0x5d6   : > { %v2914_v39 = vadd.f32 %v2891_v0, %v2852_v46  ;;  %v2915_v40 = vadd.f32 %v2911_v36, %v2853_v37 }
 0x5d8   : > { %v2969_v41 = vadd.f32 %v2946_v33, %v2914_v39  ;;  %v2970_v42 = vadd.f32 %v2966_v35, %v2915_v40  ;;  %v3056_v43 = vpop.f32.mrf.mxu0  ;;  %v3076_v44 = vpop.f32.mrf.mxu1  ;;  %v3333_v33 = vld [vmem:[#allocation2 + $0xc4] sm:$0xf]  ;;  %v3280_v35 = vld [vmem:[#allocation2 + $0xc0] sm:$0xf] }
 0x5dd   : > { %v3001_v47 = vpop.f32.mrf.mxu2  ;;  %v3021_v48 = vpop.f32.mrf.mxu3 }
 0x5de   : > { %v3024_v3 = vadd.f32 %v3001_v47, %v2969_v41  ;;  %v3025_v49 = vadd.f32 %v3021_v48, %v2970_v42  ;;  %v3449_v41 = vld [vmem:[#allocation2 + $0xcc] sm:$0xf]  ;;  %v3394_v42 = vld [vmem:[#allocation2 + $0xc8] sm:$0xf] }
 0x5e0   : > { %v3079_v52 = vadd.f32 %v3056_v43, %v3024_v3  ;;  %v3080_v53 = vadd.f32 %v3076_v44, %v3025_v49  ;;  %v3504_v43 = vld [vmem:[#allocation2 + $0xd0] sm:$0xf] }
 0x5e2   : > { %v3088_v55 = vadd.f32 %v3086_v54, %v3079_v52  ;;  %v3089_v56 = vadd.f32 %v3086_v54, %v3080_v53 }
 0x5e4   : > { %v3090_v60 = vmax.f32 %v3088_v55, 0.0  ;;  %v3091_v61 = vmax.f32 %v3089_v56, 0.0 }
 0x5e6   : > { %3104 = vrot.lane.b32.xlu0 %v3091_v61, %s5273_s8  ;;  %3210 = vrot.lane.b32.xlu1 %v3090_v60, %s5275_s10 }
 0x5e7   : > { %3102 = vrot.lane.b32.xlu2 %v3090_v60, %s5273_s8 }
 0x5ee   : > { %3092 = vrot.lane.b32.xlu0 %v3090_v60, %s5274_s9  ;;  %3094 = vrot.lane.b32.xlu1 %v3091_v61, %s5274_s9 }
 0x5ef   : > { %3212 = vrot.lane.b32.xlu2 %v3091_v61, %s5275_s10 }
 0x5f6   : > { %3273 = vrot.lane.b32.xlu0 %v3091_v61, %s5277_s12  ;;  %3385 = vrot.lane.b32.xlu1 %v3090_v60, %s5276_s11 }
 0x5f7   : > { %3271 = vrot.lane.b32.xlu2 %v3090_v60, %s5277_s12 }
 0x5fe   : > { %3615 = vperm.xlu0 %5209, %v5089_v62   ;;  %3634 = vperm.xlu1 %5208, %v3631_v57  }
 0x5ff   : > { %3387 = vrot.lane.b32.xlu2 %v3091_v61, %s5276_s11  ;;  %s241_s11 = scalar_lea.vmem %s6395_s5, %s5160_s27 }
 0x641   : > { %v3103_v15 = vpop.permute.xlu2 %3102 }
 0x649   : > { %v3213_v63 = vpop.permute.xlu2 %3212 }
 0x651   : > { %v3272_v11 = vpop.permute.xlu2 %3271 }
 0x658   : > { %v3105_v1 = vpop.permute.xlu0 %3104  ;;  %v3211_v2 = vpop.permute.xlu1 %3210 }
 0x659   : > { %v3106_v5 = vsel %vm2572_vm2, %v3103_v15, %v3105_v1  ;;  %v3107_v6 = vsel %vm2572_vm2, %v3105_v1, %v3103_v15  ;;  %v3214_v17 = vsel %vm2681_vm3, %v3211_v2, %v3213_v63  ;;  %v3215_v7 = vsel %vm2681_vm3, %v3213_v63, %v3211_v2  ;;  %v3388_v34 = vpop.permute.xlu2 %3387 }
 0x65a   : > { %v3108_v8 = vsel %vm2541_vm7, %v3107_v6, 0.0  ;;  %v3216_v9 = vsel %vm5996_vm14, %v3215_v7, 0.0  ;;  %v3217_v10 = vsel %vm2548_vm8, %v3214_v17, 0.0  ;;  %5055 = vmatpush.msk.msra.mxu3 %vm302_vm5, %v3106_v5  ;;  %vm6445_vm2 = vcmp.lt.s32.totalorder %v5362_v20, 4 }
 0x65b   : > { %5053 = vmatpush.msk.msra.mxu2 %vm302_vm5, %v3108_v8  ;;  %5056 = vmatmul.msk.f32.vlgmr.msra.gmra.mxu3 %vm298_vm6, %v3111_v4  ;;  %vm6446_vm7 = vmmov %vm6445_vm2  ;;  %v3557_v37 = vsel %vm6065_vm10, %v3215_v7, 0.0  ;;  %v3556_v40 = vsel %vm2547_vm9, %v3214_v17, 0.0  ;;  %v3502_v58 = vsel %vm2552_vm12, %v3107_v6, 0.0  ;;  %vm3688_vm3 = vcmp.lt.s32.totalorder %v5374_v26, 8 }
 0x65c   : > { %5063 = vmatpush.msk.msrb.mxu3 %vm302_vm5, %v3217_v10  ;;  %5054 = vmatmul.msk.f32.vlgmr.msra.gmra.mxu2 %vm298_vm6, %v3111_v4  ;;  %vm3684_vm14 = vcmp.ge.s32.totalorder %v5374_v26, 8 }
 0x65d   : > { %5061 = vmatpush.msk.msrb.mxu2 %vm302_vm5, %v3216_v9 }
 0x65e   : > { %5071 = vmatpush.msk.msra.mxu3 %vm302_vm5, %v3091_v61 }
 0x65f   : > { %5069 = vmatpush.msk.msra.mxu2 %vm302_vm5, %v3090_v60 }
 0x660   : > { %v3093_v23 = vpop.permute.xlu0 %3092  ;;  %v3095_v32 = vpop.permute.xlu1 %3094 }
 0x661   : > { %v3096_v12 = vsel %vm2561_vm13, %v3093_v23, %v3095_v32  ;;  %v3097_v13 = vsel %vm2561_vm13, %v3095_v32, %v3093_v23  ;;  %vm3701_vm13 = vcmp.lt.s32.totalorder %v5362_v20, 8 }
 0x662   : > { %v3098_v21 = vsel %vm6005_vm0, %v3097_v13, 0.0  ;;  %v3099_v22 = vsel %vm2544_vm15, %v3096_v12, 0.0  ;;  %v3447_v38 = vsel %vm6032_vm4, %v3097_v13, 0.0  ;;  %v3446_v25 = vsel %vm2543_vm11, %v3096_v12, 0.0 }
 0x663   : > { %5057 = vmatpush.msk.msrb.mxu0 %vm302_vm5, %v3098_v21  ;;  %5059 = vmatpush.msk.msrb.mxu1 %vm302_vm5, %v3099_v22 }
 0x664   : > { %5064 = vmatmul.msk.f32.vlgmr.msrb.gmra.mxu3 %vm298_vm6, %v3219_v14  ;;  %5058 = vmatmul.msk.f32.vlgmr.msrb.gmra.mxu0 %vm298_vm6, %v3101_v16 }
 0x665   : > { %5079 = vmatpush.msk.msrb.mxu3 %vm302_vm5, %v3447_v38  ;;  %5060 = vmatmul.msk.f32.vlgmr.msrb.gmra.mxu1 %vm298_vm6, %v3101_v16 }
 0x666   : > { %5062 = vmatmul.msk.f32.vlgmr.msrb.gmra.mxu2 %vm298_vm6, %v3219_v14 }
 0x667   : > { %5077 = vmatpush.msk.msrb.mxu2 %vm302_vm5, %v3446_v25 }
 0x668   : > { %v3274_v45 = vpop.permute.xlu0 %3273  ;;  %v3386_v28 = vpop.permute.xlu1 %3385 }
 0x669   : > { %v3275_v27 = vsel %vm6445_vm2, %v3272_v11, %v3274_v45  ;;  %v3276_v29 = vsel %vm6446_vm7, %v3274_v45, %v3272_v11  ;;  %v3389_v30 = vsel %vm2858_vm1, %v3386_v28, %v3388_v34  ;;  %v3390_v31 = vsel %vm2858_vm1, %v3388_v34, %v3386_v28 }
 0x66a   : > { %v3277_v0 = vsel %vm2543_vm11, %v3276_v29, 0.0  ;;  %v3278_v36 = vsel %vm2544_vm15, %v3275_v27, 0.0  ;;  %v3391_v46 = vsel %vm2547_vm9, %v3389_v30, 0.0  ;;  %v3392_v39 = vsel %vm2548_vm8, %v3390_v31, 0.0  ;;  %v3630_v29 = vld [vmem:[%s6393_s3] sm:$0xf] }
 0x66b   : > { %5065 = vmatpush.msk.msra.mxu0 %vm302_vm5, %v3277_v0  ;;  %5067 = vmatpush.msk.msra.mxu1 %vm302_vm5, %v3278_v36  ;;  %v3625_v27 = vrot.slane %v5642_v50, 4  ;;  %vm3637_vm9 = vcmask 64512   ;;  %v5278_v50 = vmov 0.0   ;;  %vm3814_vm11 = vcmp.lt.s32.totalorder %v5362_v20, 120  ;;  %v4660_v20 = vld [vmem:[#allocation2 + $0x11c] sm:$0xf] }
 0x66c   : > { %5072 = vmatmul.msk.f32.vlgmr.msra.gmra.mxu3 %vm298_vm6, %v3333_v33  ;;  %5066 = vmatmul.msk.f32.vlgmr.msra.gmra.mxu0 %vm298_vm6, %v3280_v35  ;;  %vm3683_vm8 = vcmp.ge.s32.totalorder %v5371_v24, 8  ;;  %vm3687_vm15 = vcmp.lt.s32.totalorder %v5371_v24, 8  ;;  %v4605_v24 = vld [vmem:[#allocation2 + $0x118] sm:$0xf] }
 0x66d   : > { %5087 = vmatpush.msk.msra.mxu3 %vm302_vm5, %v3557_v37  ;;  %5068 = vmatmul.msk.f32.vlgmr.msra.gmra.mxu1 %vm298_vm6, %v3280_v35  ;;  %v5122_v37 = vld [vmem:[%s6392_s2 + $0x18] sm:$0xf] }
 0x66e   : > { %5070 = vmatmul.msk.f32.vlgmr.msra.gmra.mxu2 %vm298_vm6, %v3333_v33  ;;  %5073 = vmatpush.msk.msrb.mxu0 %vm302_vm5, %v3391_v46  ;;  %v3624_v33 = vrot.slane %v5644_v51, 4 }
 0x66f   : > { %5075 = vmatpush.msk.msrb.mxu1 %vm302_vm5, %v3392_v39  ;;  %5085 = vmatpush.msk.msra.mxu2 %vm302_vm5, %v3556_v40  ;;  %v3820_v39 = vld [vmem:[#allocation2 + $0xe0] sm:$0xf]  ;;  %v3707_v40 = vld [vmem:[#allocation2 + $0xd8] sm:$0xf] }
 0x670   : > { %5081 = vmatpush.msk.msra.mxu0 %vm302_vm5, %v3106_v5  ;;  %v3616_v16 = vpop.permute.xlu0 %3615 }
 0x671   : > { %5083 = vmatpush.msk.msra.mxu1 %vm302_vm5, %v3502_v58  ;;  %v3928_v58 = vld [vmem:[#allocation2 + $0xe8] sm:$0xf] }
 0x674   : > { %5080 = vmatmul.msk.f32.vlgmr.msrb.gmra.mxu3 %vm298_vm6, %v3449_v41  ;;  %5074 = vmatmul.msk.f32.vlgmr.msrb.gmra.mxu0 %vm298_vm6, %v3394_v42 }
 0x675   : > { %5076 = vmatmul.msk.f32.vlgmr.msrb.gmra.mxu1 %vm298_vm6, %v3394_v42 }
 0x676   : > { %5078 = vmatmul.msk.f32.vlgmr.msrb.gmra.mxu2 %vm298_vm6, %v3449_v41 }
 0x677   : > { %3736 = vmatpush.msrb.mxu2 %v5278_v50 }
 0x67c   : > { %5088 = vmatmul.msk.f32.vlgmr.msra.gmra.mxu3 %vm298_vm6, %v3559_v59  ;;  %5082 = vmatmul.msk.f32.vlgmr.msra.gmra.mxu0 %vm298_vm6, %v3504_v43 }
 0x67d   : > { %5084 = vmatmul.msk.f32.vlgmr.msra.gmra.mxu1 %vm298_vm6, %v3504_v43 }
 0x67e   : > { %5086 = vmatmul.msk.f32.vlgmr.msra.gmra.mxu2 %vm298_vm6, %v3559_v59 }
 0x67f   : > { %3845 = vmatpush.msra.mxu2 %v5278_v50 }
 0x6de   : > { %v3158_v44 = vpop.f32.mrf.mxu3 }
 0x6df   : > { %v3138_v47 = vpop.f32.mrf.mxu2 }
 0x6e1   : > { %v3187_v48 = vpop.f32.mrf.mxu0 }
 0x6e2   : > { %v3207_v3 = vpop.f32.mrf.mxu1  ;;  %v3188_v56 = vadd.f32 %v3187_v48, %v3138_v47 }
 0x6e3   : > { %v3208_v55 = vadd.f32 %v3207_v3, %v3158_v44 }
 0x6e7   : > { %v3266_v49 = vpop.f32.mrf.mxu3 }
 0x6e8   : > { %v3270_v60 = vadd.f32 %v3266_v49, %v3208_v55 }
 0x6e9   : > { %v3246_v52 = vpop.f32.mrf.mxu2  ;;  %v3307_v53 = vpop.f32.mrf.mxu0 }
 0x6ea   : > { %v3327_v54 = vpop.f32.mrf.mxu1  ;;  %v3269_v62 = vadd.f32 %v3246_v52, %v3188_v56 }
 0x6eb   : > { %v3331_v15 = vadd.f32 %v3327_v54, %v3270_v60  ;;  %v3875_v54 = vld [vmem:[#allocation2 + $0xe4] sm:$0xf] }
 0x6ec   : > { %v3330_v2 = vadd.f32 %v3307_v53, %v3269_v62 }
 0x6ef   : > { %v3380_v61 = vpop.f32.mrf.mxu3 }
 0x6f0   : > { %v3384_v4 = vadd.f32 %v3380_v61, %v3331_v15  ;;  %v4038_v61 = vld [vmem:[#allocation2 + $0xf0] sm:$0xf]  ;;  %v3983_v15 = vld [vmem:[#allocation2 + $0xec] sm:$0xf] }
 0x6f1   : > { %v3360_v57 = vpop.f32.mrf.mxu2  ;;  %v3421_v1 = vpop.f32.mrf.mxu0 }
 0x6f2   : > { %v3441_v63 = vpop.f32.mrf.mxu1  ;;  %v3383_v5 = vadd.f32 %v3360_v57, %v3330_v2 }
 0x6f3   : > { %v3445_v17 = vadd.f32 %v3441_v63, %v3384_v4  ;;  %v4148_v63 = vld [vmem:[#allocation2 + $0xf8] sm:$0xf] }
 0x6f4   : > { %v3444_v8 = vadd.f32 %v3421_v1, %v3383_v5  ;;  %v4093_v1 = vld [vmem:[#allocation2 + $0xf4] sm:$0xf] }
 0x6f7   : > { %v3496_v6 = vpop.f32.mrf.mxu3 }
 0x6f8   : > { %v3500_v9 = vadd.f32 %v3496_v6, %v3445_v17  ;;  %v4224_v17 = vld [vmem:[#allocation2 + $0x100] sm:$0xf] }
 0x6f9   : > { %v3476_v7 = vpop.f32.mrf.mxu2  ;;  %v3531_v23 = vpop.f32.mrf.mxu0 }
 0x6fa   : > { %v3551_v10 = vpop.f32.mrf.mxu1  ;;  %v3499_v11 = vadd.f32 %v3476_v7, %v3444_v8 }
 0x6fb   : > { %v3555_v32 = vadd.f32 %v3551_v10, %v3500_v9 }
 0x6fc   : > { %v3554_v13 = vadd.f32 %v3531_v23, %v3499_v11 }
 0x6ff   : > { %v3606_v12 = vpop.f32.mrf.mxu3 }
 0x700   : > { %v3610_v14 = vadd.f32 %v3606_v12, %v3555_v32 }
 0x701   : > { %v3586_v21 = vpop.f32.mrf.mxu2 }
 0x702   : > { %v3619_v22 = vadd.f32 %v3616_v16, %v3610_v14  ;;  %v3609_v38 = vadd.f32 %v3586_v21, %v3554_v13 }
 0x704   : > { %v3621_v25 = vadd.f32 %v3619_v22, %v5944_v19  ;;  %v3618_v34 = vadd.f32 %v3616_v16, %v3609_v38  ;;  %v3635_v19 = vpop.permute.xlu1 %3634 }
 0x706   : > { %v3623_v45 = vmax.f32 %v3621_v25, 0.0  ;;  %v3620_v28 = vadd.f32 %v3618_v34, %v5942_v18  ;;  %v3711_v18 = vld [vmem:[#allocation2 + $0xdc] sm:$0xf] }
 0x707   : > { %5092 = vmatmul.msk.f32.vlgmr.msrb.gmra.mxu2 %vm298_vm6, %v3711_v18 }
 0x708   : > { %v3622_v30 = vmax.f32 %v3620_v28, 0.0  ;;  %v3629_v31 = vsel %vm302_vm5, %v3623_v45, %v3625_v27 }
 0x709   : > { %3676 = vmatpush.msrb.mxu1 %v3629_v31 }
 0x70a   : > { %v3628_v35 = vsel %vm302_vm5, %v3622_v30, %v3624_v33  ;;  %5091 = vmatmul.msk.f32.vlgmr.msrb.gmra.mxu1 %vm3637_vm9, %v3630_v29 }
 0x70b   : > { %3656 = vmatpush.msrb.mxu0 %v3628_v35 }
 0x70c   : > { %5090 = vmatmul.msk.f32.vlgmr.msrb.gmra.mxu0 %vm3637_vm9, %v3630_v29 }
 0x70d   : > { %3785 = vmatpush.msra.mxu0 %v5278_v50 }
 0x70f   : > { %5098 = vmatmul.msk.f32.vlgmr.msra.gmra.mxu2 %vm298_vm6, %v3820_v39 }
 0x714   : > { %5095 = vmatmul.msk.f32.vlgmr.msra.gmra.mxu0 %vm298_vm6, %v3707_v40 }
 0x787   : > { %v3678_v51 = vpop.f32.mrf.mxu1 }
 0x788   : > { %v6221_v0 = vadd.f32 %v3678_v51, %v3635_v19 }
 0x789   : > { %v3658_v36 = vpop.f32.mrf.mxu0 }
 0x78a   : > { %v6223_v46 = vadd.f32 %v3658_v36, %v3635_v19  ;;  %3812 = vrot.lane.b32.xlu0 %v6221_v0, %s5279_s23  ;;  %v3738_v2 = vpop.f32.mrf.mxu2 }
 0x78c   : > { %3697 = vrot.lane.b32.xlu1 %v6223_v46, %s5280_s24  ;;  %3810 = vrot.lane.b32.xlu2 %v6223_v46, %s5279_s23 }
 0x78d   : > { %5093 = vmatpush.msk.msrb.mxu3 %vm302_vm5, %v6223_v46  ;;  %5105 = vmatpush.msk.msrb.mxu2 %vm302_vm5, %v6223_v46 }
 0x78e   : > { %5094 = vmatmul.msk.f32.vlgmr.msrb.gmra.mxu3 %vm298_vm6, %v3711_v18  ;;  %5106 = vmatmul.msk.f32.vlgmr.msrb.gmra.mxu2 %vm298_vm6, %v3928_v58 }
 0x791   : > { %v3787_v5 = vpop.f32.mrf.mxu0 }
 0x792   : > { %4204 = vperm.xlu0 %5209, %v5122_v37   ;;  %v3847_v4 = vpop.f32.mrf.mxu2  ;;  %v3788_v7 = vadd.f32 %v3787_v5, %v3738_v2 }
 0x794   : > { %3699 = vrot.lane.b32.xlu2 %v6221_v0, %s5280_s24  ;;  %v3870_v11 = vadd.f32 %v3847_v4, %v3788_v7  ;;  %v4495_v7 = vld [vmem:[#allocation2 + $0x110] sm:$0xf] }
 0x7e6   : > { %v3811_v41 = vpop.permute.xlu2 %3810 }
 0x7ee   : > { %v3700_v43 = vpop.permute.xlu2 %3699 }
 0x7fc   : > { %v3813_v42 = vpop.permute.xlu0 %3812 }
 0x7fd   : > { %v3815_v59 = vsel %vm3814_vm11, %v3811_v41, %v3813_v42  ;;  %v3816_v55 = vsel %vm3814_vm11, %v3813_v42, %v3811_v41 }
 0x7fe   : > { %v3818_v44 = vsel %vm3688_vm3, %v3815_v59, 0.0  ;;  %v3698_v47 = vpop.permute.xlu1 %3697  ;;  %v3980_v60 = vsel %vm3687_vm15, %v3815_v59, 0.0  ;;  %v3981_v62 = vsel %vm3688_vm3, %v3816_v55, 0.0  ;;  %v4145_v57 = vsel %vm3687_vm15, %v3816_v55, 0.0  ;;  %v5155_v59 = vld [vmem:[%s6394_s4 + $0x4] sm:$0xf] }
 0x7ff   : > { %v3702_v48 = vsel %vm3701_vm13, %v3698_v47, %v3700_v43  ;;  %v3703_v3 = vsel %vm3701_vm13, %v3700_v43, %v3698_v47  ;;  %5099 = vmatpush.msk.msra.mxu3 %vm302_vm5, %v3818_v44  ;;  %v5153_v44 = vld [vmem:[%s6392_s2 + $0x1c] sm:$0xf]  ;;  %v4220_v47 = vld [vmem:[#allocation2 + $0xfc] sm:$0xf] }
 0x800   : > { %v3705_v49 = vsel %vm3684_vm14, %v3703_v3, 0.0  ;;  %v3872_v52 = vsel %vm3683_vm8, %v3703_v3, 0.0  ;;  %v4035_v53 = vsel %vm3683_vm8, %v3702_v48, 0.0  ;;  %5100 = vmatmul.msk.f32.vlgmr.msra.gmra.mxu3 %vm298_vm6, %v3820_v39  ;;  %v3873_v56 = vsel %vm3684_vm14, %v3702_v48, 0.0  ;;  %v4332_v48 = vld [vmem:[#allocation2 + $0x104] sm:$0xf] }
 0x801   : > { %5096 = vmatpush.msk.msra.mxu1 %vm302_vm5, %v3705_v49  ;;  %5101 = vmatpush.msk.msrb.mxu0 %vm302_vm5, %v3872_v52  ;;  %v4440_v3 = vld [vmem:[#allocation2 + $0x10c] sm:$0xf] }
 0x802   : > { %5107 = vmatpush.msk.msrb.mxu3 %vm302_vm5, %v6221_v0  ;;  %5113 = vmatpush.msk.msra.mxu2 %vm302_vm5, %v4035_v53 }
 0x803   : > { %5097 = vmatmul.msk.f32.vlgmr.msra.gmra.mxu1 %vm298_vm6, %v3707_v40  ;;  %5102 = vmatmul.msk.f32.vlgmr.msrb.gmra.mxu0 %vm298_vm6, %v3875_v54 }
 0x804   : > { %5103 = vmatpush.msk.msrb.mxu1 %vm302_vm5, %v3873_v56  ;;  %5109 = vmatpush.msk.msra.mxu0 %vm302_vm5, %v3980_v60  ;;  %v4205_v18 = vpop.permute.xlu0 %4204 }
 0x805   : > { %5119 = vmatpush.msk.msrb.mxu2 %vm302_vm5, %v4145_v57  ;;  %4083 = vmatpush.msra.mxu3 %v5278_v50  ;;  %v4550_v57 = vld [vmem:[#allocation2 + $0x114] sm:$0xf] }
 0x806   : > { %5111 = vmatpush.msk.msra.mxu1 %vm302_vm5, %v3981_v62  ;;  %5116 = vmatpush.msk.msrb.mxu0 %vm302_vm5, %v6221_v0  ;;  %v4387_v62 = vld [vmem:[#allocation2 + $0x108] sm:$0xf] }
 0x807   : > { %5114 = vmatmul.msk.f32.vlgmr.msra.gmra.mxu2 %vm298_vm6, %v4038_v61 }
 0x808   : > { %4298 = vmatpush.msra.mxu2 %v5278_v50  ;;  %5108 = vmatmul.msk.f32.vlgmr.msrb.gmra.mxu3 %vm298_vm6, %v3928_v58 }
 0x809   : > { %4193 = vmatpush.msrb.mxu3 %v5278_v50 }
 0x80b   : > { %5104 = vmatmul.msk.f32.vlgmr.msrb.gmra.mxu1 %vm298_vm6, %v3875_v54  ;;  %5110 = vmatmul.msk.f32.vlgmr.msra.gmra.mxu0 %vm298_vm6, %v3983_v15 }
 0x80c   : > { %4138 = vmatpush.msrb.mxu1 %v5278_v50  ;;  %4249 = vmatpush.msra.mxu0 %v5278_v50 }
 0x80f   : > { %5120 = vmatmul.msk.f32.vlgmr.msrb.gmra.mxu2 %vm298_vm6, %v4148_v63 }
 0x810   : > { %5115 = vmatmul.msk.f32.vlgmr.msra.gmra.mxu3 %vm298_vm6, %v4038_v61 }
 0x811   : > { %v3758_v6 = vpop.f32.mrf.mxu3  ;;  %v3955_v8 = vpop.f32.mrf.mxu2 }
 0x813   : > { %5112 = vmatmul.msk.f32.vlgmr.msra.gmra.mxu1 %vm298_vm6, %v3983_v15  ;;  %5117 = vmatmul.msk.f32.vlgmr.msrb.gmra.mxu0 %vm298_vm6, %v4093_v1 }
 0x814   : > { %4357 = vmatpush.msrb.mxu0 %v5278_v50 }
 0x817   : > { %5126 = vmatmul.msk.f32.vlgmr.msra.gmra.mxu2 %vm298_vm6, %v4220_v47 }
 0x818   : > { %5121 = vmatmul.msk.f32.vlgmr.msrb.gmra.mxu3 %vm298_vm6, %v4148_v63 }
 0x81b   : > { %5118 = vmatmul.msk.f32.vlgmr.msrb.gmra.mxu1 %vm298_vm6, %v4093_v1  ;;  %5123 = vmatmul.msk.f32.vlgmr.msra.gmra.mxu0 %vm298_vm6, %v4224_v17 }
 0x823   : > { %5129 = vmatmul.msk.f32.vlgmr.msrb.gmra.mxu0 %vm298_vm6, %v4332_v48 }
 0x880   : > { %v3807_v9 = vpop.f32.mrf.mxu1  ;;  %v3902_v10 = vpop.f32.mrf.mxu0 }
 0x881   : > { %v3925_v32 = vadd.f32 %v3902_v10, %v3870_v11  ;;  %v3808_v12 = vadd.f32 %v3807_v9, %v3758_v6 }
 0x883   : > { %v3867_v23 = vpop.f32.mrf.mxu3  ;;  %v3978_v16 = vadd.f32 %v3955_v8, %v3925_v32 }
 0x884   : > { %v3871_v22 = vadd.f32 %v3867_v23, %v3808_v12 }
 0x888   : > { %v3922_v13 = vpop.f32.mrf.mxu1  ;;  %v4010_v14 = vpop.f32.mrf.mxu0 }
 0x889   : > { %v4033_v38 = vadd.f32 %v4010_v14, %v3978_v16  ;;  %v3926_v34 = vadd.f32 %v3922_v13, %v3871_v22 }
 0x88a   : > { %v4065_v21 = vpop.f32.mrf.mxu2 }
 0x88b   : > { %v3975_v25 = vpop.f32.mrf.mxu3  ;;  %v4088_v45 = vadd.f32 %v4065_v21, %v4033_v38 }
 0x88c   : > { %v3979_v28 = vadd.f32 %v3975_v25, %v3926_v34 }
 0x890   : > { %v4030_v27 = vpop.f32.mrf.mxu1  ;;  %v4120_v29 = vpop.f32.mrf.mxu0 }
 0x891   : > { %v4143_v30 = vadd.f32 %v4120_v29, %v4088_v45  ;;  %v4034_v19 = vadd.f32 %v4030_v27, %v3979_v28 }
 0x892   : > { %v4175_v31 = vpop.f32.mrf.mxu2 }
 0x893   : > { %v4198_v33 = vadd.f32 %v4175_v31, %v4143_v30  ;;  %v4085_v35 = vpop.f32.mrf.mxu3 }
 0x894   : > { %v4089_v36 = vadd.f32 %v4085_v35, %v4034_v19 }
 0x895   : > { %v4207_v51 = vadd.f32 %v4205_v18, %v4198_v33 }
 0x897   : > { %v4209_v37 = vmax.f32 %v4207_v51, 0.0 }
 0x898   : > { %v4140_v39 = vpop.f32.mrf.mxu1  ;;  %v4251_v26 = vpop.f32.mrf.mxu0 }
 0x899   : > { %4323 = vrot.lane.b32.xlu0 %v4209_v37, %s5279_s23  ;;  %4211 = vrot.lane.b32.xlu1 %v4209_v37, %s5280_s24  ;;  %v4144_v40 = vadd.f32 %v4140_v39, %v4089_v36 }
 0x89a   : > { %5124 = vmatpush.msk.msra.mxu1 %vm302_vm5, %v4209_v37  ;;  %5136 = vmatpush.msk.msra.mxu0 %vm302_vm5, %v4209_v37  ;;  %v4300_v9 = vpop.f32.mrf.mxu2 }
 0x89b   : > { %v4195_v58 = vpop.f32.mrf.mxu3  ;;  %5125 = vmatmul.msk.f32.vlgmr.msra.gmra.mxu1 %vm298_vm6, %v4224_v17  ;;  %5137 = vmatmul.msk.f32.vlgmr.msra.gmra.mxu0 %vm298_vm6, %v4440_v3  ;;  %v4301_v23 = vadd.f32 %v4300_v9, %v4251_v26 }
 0x89c   : > { %v4199_v41 = vadd.f32 %v4195_v58, %v4144_v40 }
 0x89e   : > { %v4208_v42 = vadd.f32 %v4205_v18, %v4199_v41 }
 0x8a0   : > { %v4210_v43 = vmax.f32 %v4208_v42, 0.0  ;;  %v4359_v8 = vpop.f32.mrf.mxu0 }
 0x8a1   : > { %4739 = vperm.xlu0 %5209, %v5155_v59   ;;  %v4382_v13 = vadd.f32 %v4359_v8, %v4301_v23  ;;  %v4727_v59 = vld.sshfl [vmem:[#allocation1] sm:$0xff pattern:$0x75316420] }
 0x8a2   : > { %4325 = vrot.lane.b32.xlu1 %v4210_v43, %s5279_s23  ;;  %4213 = vrot.lane.b32.xlu2 %v4210_v43, %s5280_s24 }
 0x8aa   : > { %4716 = vperm.xlu2 %5210, %v5153_v44  }
 0x8fc   : > { %v4214_v49 = vpop.permute.xlu2 %4213 }
 0x904   : > { %v4717_v37 = vpop.permute.xlu2 %4716 }
 0x90b   : > { %v4212_v52 = vpop.permute.xlu1 %4211  ;;  %v4324_v15 = vpop.permute.xlu0 %4323 }
 0x90c   : > { %v4215_v53 = vsel %vm3701_vm13, %v4212_v52, %v4214_v49  ;;  %v4216_v54 = vsel %vm3701_vm13, %v4214_v49, %v4212_v52 }
 0x90d   : > { %v4218_v55 = vsel %vm3684_vm14, %v4216_v54, 0.0  ;;  %v4384_v56 = vsel %vm3683_vm8, %v4216_v54, 0.0  ;;  %v4385_v60 = vsel %vm3684_vm14, %v4215_v53, 0.0  ;;  %v4547_v61 = vsel %vm3683_vm8, %v4215_v53, 0.0 }
 0x90e   : > { %5127 = vmatpush.msk.msra.mxu3 %vm302_vm5, %v4218_v55  ;;  %5132 = vmatpush.msk.msrb.mxu2 %vm302_vm5, %v4384_v56  ;;  %v4728_v53 = vld.sshfl [vmem:[#allocation1 + $0x8] sm:$0xff pattern:$0x75316420] }
 0x90f   : > { %5144 = vmatpush.msk.msrb.mxu0 %vm302_vm5, %v4547_v61  ;;  %5128 = vmatmul.msk.f32.vlgmr.msra.gmra.mxu3 %vm298_vm6, %v4220_v47 }
 0x910   : > { %5134 = vmatpush.msk.msrb.mxu3 %vm302_vm5, %v4385_v60  ;;  %5133 = vmatmul.msk.f32.vlgmr.msrb.gmra.mxu2 %vm298_vm6, %v4387_v62 }
 0x911   : > { %5145 = vmatmul.msk.f32.vlgmr.msrb.gmra.mxu0 %vm298_vm6, %v4550_v57 }
 0x913   : > { %v4740_v55 = vpop.permute.xlu0 %4739 }
 0x914   : > { %v4326_v63 = vpop.permute.xlu1 %4325 }
 0x915   : > { %v4327_v1 = vsel %vm3814_vm11, %v4324_v15, %v4326_v63  ;;  %v4328_v2 = vsel %vm3814_vm11, %v4326_v63, %v4324_v15 }
 0x916   : > { %v4330_v4 = vsel %vm3688_vm3, %v4327_v1, 0.0  ;;  %v4492_v5 = vsel %vm3687_vm15, %v4327_v1, 0.0  ;;  %v4493_v6 = vsel %vm3688_vm3, %v4328_v2, 0.0  ;;  %v4657_v17 = vsel %vm3687_vm15, %v4328_v2, 0.0 }
 0x917   : > { %5135 = vmatmul.msk.f32.vlgmr.msrb.gmra.mxu3 %vm298_vm6, %v4387_v62  ;;  %5130 = vmatpush.msk.msrb.mxu1 %vm302_vm5, %v4330_v4 }
 0x918   : > { %5140 = vmatpush.msk.msra.mxu2 %vm302_vm5, %v4492_v5  ;;  %5142 = vmatpush.msk.msra.mxu3 %vm302_vm5, %v4493_v6  ;;  %v4271_v10 = vpop.f32.mrf.mxu1  ;;  %v4467_v11 = vpop.f32.mrf.mxu0 }
 0x919   : > { %5150 = vmatpush.msk.msra.mxu0 %vm302_vm5, %v4657_v17  ;;  %5131 = vmatmul.msk.f32.vlgmr.msrb.gmra.mxu1 %vm298_vm6, %v4332_v48  ;;  %v5154_v48 = vld [vmem:[%s6393_s3 + $0x4] sm:$0xf] }
 0x91a   : > { %5138 = vmatpush.msk.msra.mxu1 %vm302_vm5, %v4210_v43  ;;  %5141 = vmatmul.msk.f32.vlgmr.msra.gmra.mxu2 %vm298_vm6, %v4495_v7 }
 0x91b   : > { %5147 = vmatpush.msk.msrb.mxu2 %vm302_vm5, %v4210_v43  ;;  %4650 = vmatpush.msrb.mxu3 %v5278_v50 }
 0x91c   : > { %4595 = vmatpush.msrb.mxu1 %v5278_v50  ;;  %5151 = vmatmul.msk.f32.vlgmr.msra.gmra.mxu0 %vm298_vm6, %v4660_v20 }
 0x91f   : > { %5143 = vmatmul.msk.f32.vlgmr.msra.gmra.mxu3 %vm298_vm6, %v4495_v7 }
 0x921   : > { %5139 = vmatmul.msk.f32.vlgmr.msra.gmra.mxu1 %vm298_vm6, %v4440_v3 }
 0x922   : > { %5148 = vmatmul.msk.f32.vlgmr.msrb.gmra.mxu2 %vm298_vm6, %v4605_v24  ;;  %4705 = vmatpush.msra.mxu1 %v5278_v50 }
 0x927   : > { %5149 = vmatmul.msk.f32.vlgmr.msrb.gmra.mxu3 %vm298_vm6, %v4605_v24 }
 0x929   : > { %5146 = vmatmul.msk.f32.vlgmr.msrb.gmra.mxu1 %vm298_vm6, %v4550_v57 }
 0x931   : > { %5152 = vmatmul.msk.f32.vlgmr.msra.gmra.mxu1 %vm298_vm6, %v4660_v20 }
 0x98e   : > { %v4577_v50 = vpop.f32.mrf.mxu0 }
 0x992   : > { %v4320_v32 = vpop.f32.mrf.mxu3 }
 0x993   : > { %v4414_v12 = vpop.f32.mrf.mxu2  ;;  %v4321_v22 = vadd.f32 %v4320_v32, %v4271_v10 }
 0x994   : > { %v4437_v16 = vadd.f32 %v4414_v12, %v4382_v13 }
 0x996   : > { %v4379_v14 = vpop.f32.mrf.mxu1  ;;  %v4490_v34 = vadd.f32 %v4467_v11, %v4437_v16 }
 0x997   : > { %v4383_v38 = vadd.f32 %v4379_v14, %v4321_v22 }
 0x999   : > { %v4687_v35 = vpop.f32.mrf.mxu0 }
 0x99a   : > { %v4434_v21 = vpop.f32.mrf.mxu3 }
 0x99b   : > { %v4438_v27 = vadd.f32 %v4434_v21, %v4383_v38 }
 0x99d   : > { %v4522_v25 = vpop.f32.mrf.mxu2 }
 0x99e   : > { %v4487_v45 = vpop.f32.mrf.mxu1  ;;  %v4545_v28 = vadd.f32 %v4522_v25, %v4490_v34 }
 0x99f   : > { %v4491_v30 = vadd.f32 %v4487_v45, %v4438_v27 }
 0x9a0   : > { %v4600_v31 = vadd.f32 %v4577_v50, %v4545_v28 }
 0x9a2   : > { %v4542_v29 = vpop.f32.mrf.mxu3 }
 0x9a3   : > { %v4546_v51 = vadd.f32 %v4542_v29, %v4491_v30 }
 0x9a5   : > { %v4632_v33 = vpop.f32.mrf.mxu2 }
 0x9a6   : > { %v4655_v18 = vadd.f32 %v4632_v33, %v4600_v31  ;;  %v4597_v19 = vpop.f32.mrf.mxu1 }
 0x9a7   : > { %v4601_v39 = vadd.f32 %v4597_v19, %v4546_v51 }
 0x9a8   : > { %v4710_v36 = vadd.f32 %v4687_v35, %v4655_v18 }
 0x9aa   : > { %v4719_v40 = vadd.f32 %v4717_v37, %v4710_v36  ;;  %v4652_v58 = vpop.f32.mrf.mxu3 }
 0x9ab   : > { %v4656_v42 = vadd.f32 %v4652_v58, %v4601_v39 }
 0x9ac   : > { %v4721_v41 = vadd.f32 %v4719_v40, %v6223_v46 }
 0x9ae   : > { %v4723_v43 = vmax.f32 %v4721_v41, 0.0  ;;  %v4707_v44 = vpop.f32.mrf.mxu1 }
 0x9af   : > { %v4711_v47 = vadd.f32 %v4707_v44, %v4656_v42 }
 0x9b0   : > { %v4731_v3 = vsel %vm302_vm5, %v4723_v43, %v4727_v59 }
 0x9b1   : > { %v4720_v49 = vadd.f32 %v4717_v37, %v4711_v47  ;;  %4760 = vmatpush.msra.mxu2 %v4731_v3 }
 0x9b2   : > { %5156 = vmatmul.msk.f32.vlgmr.msra.gmra.mxu2 %vm3637_vm9, %v5154_v48 }
 0x9b3   : > { %v4722_v52 = vadd.f32 %v4720_v49, %v6221_v0 }
 0x9b5   : > { %v4724_v46 = vmax.f32 %v4722_v52, 0.0 }
 0x9b7   : > { %v4732_v54 = vsel %vm302_vm5, %v4724_v46, %v4728_v53 }
 0x9b8   : > { %4780 = vmatpush.msra.mxu3 %v4732_v54 }
 0x9b9   : > { %5157 = vmatmul.msk.f32.vlgmr.msra.gmra.mxu3 %vm3637_vm9, %v5154_v48 }
 0xa35   : > { %v4762_v56 = vpop.f32.mrf.mxu2 }
 0xa36   : > { %v4763_v62 = vadd.f32 %v4762_v56, %v4740_v55 }
 0xa3c   : > { %v4782_v60 = vpop.f32.mrf.mxu3 }
 0xa3d   : > { %v4783_v61 = vadd.f32 %v4782_v60, %v4740_v55 }
 0xa3f   : > { %v4787_v57 = vrot.slane %v4783_v61, 4 }
 0xa41   : > { %v4788_v0 = vsel %vm302_vm5, %v4763_v62, %v4787_v57 }
 0xa42   : > { %4790 = vst [vmem:[%s241_s11] sm:$0xff] %v4788_v0 }
 0xa43 PF: > { %s16_s18 = sadd.s32 1, %s5251_s18  }
 0xa44   : > { %p13_p7 = scmp.ge.s32.totalorder %s16_s18, 4  }
 0xa46   :  { %15 = sbr.rel (!%p13_p7) target bundleno = 1 (0x1), region = 156 }
 0xa4b   :  { %4812 = vsyncpa [#allocation3], 1 }
 0xa4c   :  { %4814 = vsyncpa [#allocation3 + $0x1], 1 }

</bundles_post_ra>
